<compile_context>
chip_gen: v6e
topology: v6e:2x2x1
jax: 0.10.0
libtpu: 0.0.40
codegen_flags: <defaults>
</compile_context>

<pallas_src>
import math
import functools
import jax
import jax.numpy as jnp
from jax.experimental import pallas as pl
from jax.experimental.pallas import tpu as pltpu


def _softplus(x):
    # matches torch.nn.Softplus(beta=1, threshold=20)
    return jnp.where(x > 20.0, x, jnp.log1p(jnp.exp(jnp.minimum(x, 20.0))))


def _make_kernel(T, Tm1, B, SB, RP, H, L, D, alpha, enc_offs, sde_offs, slab_r, slab_c):
    sqrt_alpha = math.sqrt(alpha)
    f32 = jnp.float32
    bf16 = jnp.bfloat16
    H2, H3, H4, H6 = 2 * H, 3 * H, 4 * H, 6 * H
    L2, L3 = 2 * L, 3 * L
    o_w0ih, o_w1ih, o_w0hh, o_w1hh, o_wctx, o_wqz0 = enc_offs
    o_wz, o_w2, o_w3 = sde_offs

    def kernel(xp_ref, sel_ref, tsel_ref, en_ref, encw_ref, sdew_ref, b_ref,
               out_ref, seq0_scr, seq1_scr):
        def mmb(a, w):                       # bf16 MXU operands, f32 accumulation
            return jnp.dot(a.astype(bf16), w, preferred_element_type=f32)

        # ---- static slices of the packed weight / bias slabs ----
        w0ih = encw_ref[o_w0ih:o_w0ih + 2 * D + 1, :]
        w1ih = encw_ref[o_w1ih:o_w1ih + H4, :]
        w0hh = encw_ref[o_w0hh:o_w0hh + H2, :]
        w1hh = encw_ref[o_w1hh:o_w1hh + H2, :]
        wctx = encw_ref[o_wctx:o_wctx + H2, 0:H3]
        wqz0 = encw_ref[o_wqz0:o_wqz0 + H4, 0:L2]
        wz = sdew_ref[o_wz:o_wz + L, 0:H3]
        w2 = sdew_ref[o_w2:o_w2 + H3, 0:H2]
        w3 = sdew_ref[o_w3:o_w3 + H3, 0:L3]
        b0hh = b_ref[0:1, 0:H6]
        b1hh = b_ref[1:2, 0:H6]
        b1ih = b_ref[2:3, 0:H6]
        bctx = b_ref[3:4, 0:H3]
        bqz0 = b_ref[4:5, 0:L2]
        b2 = b_ref[5:6, 0:H2]
        b3 = b_ref[6:7, 0:L3]

        # ---------------- encoder: fwd+bwd directions fused block-diagonally --------
        # carry h = [h_fwd | h_bwd] (RP, 2H); gate columns [r_f r_b | z_f z_b | n_f n_b]
        def cell(gi, h, whh, bhh):
            gh = mmb(h, whh) + bhh
            ru = jax.nn.sigmoid(gi[:, 0:H4] + gh[:, 0:H4])   # fused r/z, both directions
            r, u = ru[:, 0:H2], ru[:, H2:H4]
            n = jnp.tanh(gi[:, H4:H6] + r * gh[:, H4:H6])
            return (1.0 - u) * n + u * h

        # layer 0: hoisted input-gate projection (bias folded via the ones column)
        gi0 = mmb(xp_ref[...], w0ih)                          # (T*RP, 6H)
        h = jnp.zeros((RP, H2), f32)
        for j in range(T):
            h = cell(gi0[j * RP:(j + 1) * RP], h, w0hh, b0hh)
            # paired layer-1 input: seq0[k] = [o0f_k | o0b_{T-1-k} | o0f_{T-1-k} | o0b_k]
            seq0_scr[j * RP:(j + 1) * RP, 0:H2] = h
            seq0_scr[(T - 1 - j) * RP:(T - j) * RP, H2:H4] = h
        fin0 = h                                              # [h0f_fin | h0b_fin]

        # layer 1
        gi1 = mmb(seq0_scr[...], w1ih) + b1ih                 # (T*RP, 6H)
        h = jnp.zeros((RP, H2), f32)
        for j in range(T):
            h = cell(gi1[j * RP:(j + 1) * RP], h, w1hh, b1hh)
            # seq1[k] = [h1f_k | h1b_k]  (encoder-time order, what the ctx head needs)
            seq1_scr[j * RP:(j + 1) * RP, 0:H] = h[:, 0:H]
            seq1_scr[(T - 1 - j) * RP:(T - j) * RP, H:H2] = h[:, H:H2]
        fin1 = h                                              # [h1f_fin | h1b_fin]

        # qz0 head on the stacked final hiddens [l0f | l0b | l1f | l1b]
        qz0_p = mmb(jnp.concatenate([fin0, fin1], axis=1), wqz0) + bqz0     # (RP, 2L)

        # context head fused with f_net's ctx matmul + all layer-1 SDE biases; the
        # per-step time gather + per-sample broadcast is one one-hot selection matmul.
        fc_all = mmb(seq1_scr[...], wctx) + bctx              # (T*RP, 3H)
        fcb = jnp.dot(sel_ref[...], fc_all, preferred_element_type=f32)     # (Tm1*SB, 3H)

        # initial latent sample z0 (rows ordered sample-major s*B+b)
        z0p = jnp.dot(tsel_ref[...], qz0_p, preferred_element_type=f32)     # (SB, 2L)
        z = z0p[:, 0:L] + jnp.exp(z0p[:, L:L2]) * en_ref[0:SB, :]

        # ---------------- discrete SDE Euler loop (fully unrolled) ----------------
        zs_list = [z]
        kl_acc = jnp.zeros((SB, L), f32)
        for t in range(Tm1):
            zz = mmb(z, wz) + fcb[t * SB:(t + 1) * SB]        # fused f1|h1|g1 layer
            a = _softplus(zz)                                 # one softplus over 3H
            u2 = _softplus(mmb(a, w2) + b2)                   # fused f2|h2
            o3 = mmb(jnp.concatenate([u2, a[:, H2:H3]], axis=1), w3) + b3   # f3|h3|g2
            f_d = o3[:, 0:L]
            h_d = o3[:, L:L2]
            g = jax.nn.sigmoid(o3[:, L2:L3])
            post_std = sqrt_alpha * g
            diff = alpha * (f_d - h_d)                        # post_mean - prior_mean
            # analytic KL(N(post_mean,s) || N(prior_mean,s)) = diff^2 / (2 s^2)
            kl_acc = kl_acc + diff * diff * pl.reciprocal(
                2.0 * post_std * post_std, approx=True)
            z = z + alpha * f_d + post_std * en_ref[(t + 1) * SB:(t + 2) * SB, :]
            zs_list.append(z)

        # ---------------- pack all outputs in one lane-dense slab, stored once ------
        def pad_rows(x, r):
            return x if x.shape[0] == r else jnp.concatenate(
                [x, jnp.zeros((r - x.shape[0], x.shape[1]), x.dtype)], axis=0)

        zs_cat = jnp.concatenate(zs_list, axis=1)             # (SB, T_out*L)
        left = pad_rows(jnp.concatenate([zs_cat, kl_acc], axis=1), slab_r)
        slab = jnp.concatenate([left, pad_rows(qz0_p, slab_r)], axis=1)
        if slab.shape[1] < slab_c:
            slab = jnp.concatenate(
                [slab, jnp.zeros((slab_r, slab_c - slab.shape[1]), f32)], axis=1)
        out_ref[...] = slab

    return kernel


def _pair_cols(wf, wb, H):
    """(in,3H)x2 with gate blocks [r|z|n] -> (in,6H) cols [r_f r_b z_f z_b n_f n_b]."""
    return jnp.concatenate([wf[:, 0:H], wb[:, 0:H],
                            wf[:, H:2 * H], wb[:, H:2 * H],
                            wf[:, 2 * H:3 * H], wb[:, 2 * H:3 * H]], axis=1)


def _pack_rows(blocks, ncols, dtype, align=8):
    """Row-stack 2-D blocks, zero-padding each to ncols and an align-row boundary."""
    rows, offs, cur = [], [], 0
    for blk in blocks:
        r, c = blk.shape
        rows.append(jnp.zeros((r, ncols), dtype).at[:, :c].set(blk.astype(dtype)))
        offs.append(cur)
        pad = (-r) % align
        if pad:
            rows.append(jnp.zeros((pad, ncols), dtype))
        cur += r + pad
    return jnp.concatenate(rows, axis=0), offs


# ----------------------------- Full forward pass -----------------------------
def discrete_latent_sde_forward(p, xs, ts_in, ts_out, key, *, alpha=0.1, n_samples=1):
    T_in, B, D = xs.shape
    T_out = ts_out.shape[0]
    Tm1 = T_out - 1
    L = p['pz0_mean'].shape[1]
    H = p['h1_w'].shape[1]
    S = n_samples
    SB = S * B
    RP = ((B + 7) // 8) * 8
    f32 = jnp.float32
    bf16 = jnp.bfloat16

    # column_dropout == 0.0 path.
    # TODO(synk): bernoulli column-group dropout (column_dropout > 0) not implemented.
    # TODO(synk): context_mode 'ic_only'/'constant' and kl_estimator='sample' not implemented.
    # TODO(synk): v7x second TensorCore idle; splitting the independent posterior-sample /
    #             GRU-direction chains across cores via pl.core_map is not implemented.

    # encoder input, paired per fused step: row j holds [x_flipped[j] | x_flipped[T-1-j] | 1]
    x2 = jnp.zeros((T_in, RP, D), f32).at[:, :B, :].set(xs[::-1])
    xp = jnp.concatenate([x2, x2[::-1]], axis=-1).reshape(T_in * RP, 2 * D)
    xp = jnp.concatenate([xp, jnp.ones((T_in * RP, 1), f32)], axis=1).astype(bf16)

    # per-Euler-step context index i = min(searchsorted(ts_in, t, right=True), T_in-1),
    # mapped to encoder (flipped) time and expanded over (sample, batch) as one-hot rows.
    idx = jnp.minimum(jnp.searchsorted(ts_in, ts_out[:-1], side='right'), T_in - 1)
    kflip = (T_in - 1) - idx
    cols = kflip[:, None] * RP + jnp.arange(B)[None, :]
    sel = jax.nn.one_hot(cols, T_in * RP, dtype=f32)                       # (Tm1, B, T*RP)
    sel = jnp.broadcast_to(sel[:, None], (Tm1, S, B, T_in * RP)).reshape(Tm1 * SB, T_in * RP)
    tile_sel = jnp.tile(jnp.eye(B, RP, dtype=f32), (S, 1))                 # (SB, RP)

    k0, k1 = jax.random.split(key)
    eps0 = jax.random.normal(k0, (S, B, L), f32).reshape(SB, L)
    noise = jax.random.normal(k1, (Tm1, S, B, L), f32).reshape(Tm1 * SB, L)
    eps_noise = jnp.concatenate([eps0, noise], axis=0)                     # ((Tm1+1)*SB, L)

    # -------- paired (fwd+bwd block-diag) GRU weights, built once wrapper-side --------
    g0f, g0b, g1f, g1b = p['gru_l0_f'], p['gru_l0_b'], p['gru_l1_f'], p['gru_l1_b']
    zD = jnp.zeros((D, 3 * H), f32)
    zH = jnp.zeros((H, 3 * H), f32)
    w0ih = jnp.concatenate([_pair_cols(g0f['wih'], zD, H),
                            _pair_cols(zD, g0b['wih'], H),
                            _pair_cols(g0f['bih'], g0b['bih'], H)], axis=0)   # (2D+1, 6H)
    w0hh = jnp.concatenate([_pair_cols(g0f['whh'], zH, H),
                            _pair_cols(zH, g0b['whh'], H)], axis=0)           # (2H, 6H)
    # layer-1 paired input rows are [o0f_k | o0b_{T-1-k} | o0f_{T-1-k} | o0b_k]
    w1ih = jnp.concatenate([_pair_cols(g1f['wih'][0:H], zH, H),
                            _pair_cols(zH, g1b['wih'][H:2 * H], H),
                            _pair_cols(zH, g1b['wih'][0:H], H),
                            _pair_cols(g1f['wih'][H:2 * H], zH, H)], axis=0)  # (4H, 6H)
    w1hh = jnp.concatenate([_pair_cols(g1f['whh'], zH, H),
                            _pair_cols(zH, g1b['whh'], H)], axis=0)           # (2H, 6H)
    b0hh = _pair_cols(g0f['bhh'], g0b['bhh'], H)
    b1hh = _pair_cols(g1f['bhh'], g1b['bhh'], H)
    b1ih = _pair_cols(g1f['bih'], g1b['bih'], H)

    # -------- fused context / SDE-step weights --------
    f1_wz, f1_wc = p['f1_w'][0:L, :], p['f1_w'][L:, :]
    wctx = jnp.zeros((2 * H, 3 * H), f32).at[:, 0:H].set(p['lin_w'] @ f1_wc)
    bctx = jnp.concatenate([p['f1_b'] + p['lin_b'] @ f1_wc, p['h1_b'], p['g1_b']], axis=1)
    wz = jnp.concatenate([f1_wz, p['h1_w'], p['g1_w']], axis=1)               # (L, 3H)
    w2 = (jnp.zeros((3 * H, 2 * H), f32)
          .at[0:H, 0:H].set(p['f2_w']).at[H:2 * H, H:2 * H].set(p['h2_w']))
    b2 = jnp.concatenate([p['f2_b'], p['h2_b']], axis=1)
    w3 = (jnp.zeros((3 * H, 3 * L), f32)
          .at[0:H, 0:L].set(p['f3_w'])
          .at[H:2 * H, L:2 * L].set(p['h3_w'])
          .at[2 * H:3 * H, 2 * L:3 * L].set(p['g2_w']))
    b3 = jnp.concatenate([p['f3_b'], p['h3_b'], p['g2_b']], axis=1)

    # -------- pack operands into a few slabs (bf16 matmul weights, f32 biases) --------
    enc_w, enc_offs = _pack_rows([w0ih, w1ih, w0hh, w1hh, wctx, p['qz0_w']],
                                 6 * H, bf16, align=16)
    sde_w, sde_offs = _pack_rows([wz, w2, w3], 3 * H, bf16, align=16)
    bias_slab, _ = _pack_rows([b0hh, b1hh, b1ih, bctx, p['qz0_b'], b2, b3],
                              6 * H, f32, align=1)

    slab_r = max(RP, ((SB + 7) // 8) * 8)
    zc = T_out * L
    slab_c = ((zc + L + 2 * L + 127) // 128) * 128

    kernel = _make_kernel(T_in, Tm1, B, SB, RP, H, L, D, alpha,
                          enc_offs, sde_offs, slab_r, slab_c)
    vmem = pl.BlockSpec(memory_space=pltpu.MemorySpace.VMEM)
    slab = pl.pallas_call(
        kernel,
        out_shape=jax.ShapeDtypeStruct((slab_r, slab_c), f32),
        in_specs=[vmem] * 7,
        out_specs=vmem,
        scratch_shapes=[pltpu.VMEM((T_in * RP, 4 * H), f32),   # paired layer-0 outputs
                        pltpu.VMEM((T_in * RP, 2 * H), f32)],  # layer-1 outputs (ctx input)
    )(xp, sel, tile_sel, eps_noise, enc_w, sde_w, bias_slab)

    zs_flat = slab[0:SB, 0:zc]
    kl_elem = slab[0:SB, zc:zc + L]
    qz0_params = slab[0:B, zc + L:zc + 3 * L]

    zs = zs_flat.reshape(S, B, T_out, L).mean(axis=0).transpose(1, 0, 2)      # (T_out, B, L)
    # sum_steps KL.mean(samples) -> .sum(latent).mean(batch)  ==  total / (B*S)
    logqp_path = kl_elem.sum() / (B * S)
    qz0_mean, qz0_logstd = qz0_params[:, :L], qz0_params[:, L:]

    # reconstruction likelihood on the observed window
    mu = zs[:T_in] @ p['mu_w'] + p['mu_b']
    std = jnp.exp(jnp.clip(zs[:T_in] @ p['ls_w'] + p['ls_b'], -10.0, 2.0))
    log_prob = (-(xs - mu) ** 2 / (2.0 * std * std)
                - jnp.log(std) - 0.5 * math.log(2.0 * math.pi))
    log_pxs = log_prob.sum(axis=(0, 2)).mean(axis=0)

    # KL(qz0 || pz0), analytic
    q_std = jnp.exp(qz0_logstd)
    p_std = jnp.exp(p['pz0_logstd'])
    kl0 = (p['pz0_logstd'] - qz0_logstd
           + (q_std ** 2 + (qz0_mean - p['pz0_mean']) ** 2) / (2.0 * p_std ** 2) - 0.5)
    logqp0 = kl0.sum(axis=1).mean(axis=0)

    output = zs[T_in:] @ p['out_w'] + p['out_b']                              # (T_out-T_in, B, O)
    return output, log_pxs, logqp0 + logqp_path


# ----------------------------- Deterministic parameter init -----------------------------
def init_params(key, D, L, C, H, O):
    keys = iter(jax.random.split(key, 64))

    def lin(fan_in, fan_out):
        b = 1.0 / math.sqrt(fan_in)
        w = jax.random.uniform(next(keys), (fan_in, fan_out), jnp.float32, -b, b)
        bias = jax.random.uniform(next(keys), (1, fan_out), jnp.float32, -b, b)
        return w, bias

    def gru_dir(in_size):
        b = 1.0 / math.sqrt(H)
        return dict(
            wih=jax.random.uniform(next(keys), (in_size, 3 * H), jnp.float32, -b, b),
            whh=jax.random.uniform(next(keys), (H, 3 * H), jnp.float32, -b, b),
            bih=jax.random.uniform(next(keys), (1, 3 * H), jnp.float32, -b, b),
            bhh=jax.random.uniform(next(keys), (1, 3 * H), jnp.float32, -b, b))

    p = {}
    p['gru_l0_f'] = gru_dir(D)
    p['gru_l0_b'] = gru_dir(D)
    p['gru_l1_f'] = gru_dir(2 * H)
    p['gru_l1_b'] = gru_dir(2 * H)
    p['qz0_w'], p['qz0_b'] = lin(4 * H, 2 * L)          # Linear(hidden*num_layers*2, latent*2)
    p['lin_w'], p['lin_b'] = lin(2 * H, C)              # context head (context_mode='full')
    p['f1_w'], p['f1_b'] = lin(L + C, H)                # f_net layer 1 (input = [z | ctx])
    p['f2_w'], p['f2_b'] = lin(H, H)
    p['f3_w'], p['f3_b'] = lin(H, L)
    p['h1_w'], p['h1_b'] = lin(L, H)
    p['h2_w'], p['h2_b'] = lin(H, H)
    p['h3_w'], p['h3_b'] = lin(H, L)
    p['g1_w'], p['g1_b'] = lin(L, H)
    p['g2_w'], p['g2_b'] = lin(H, L)
    p['mu_w'], p['mu_b'] = lin(L, D)
    p['ls_w'], p['ls_b'] = lin(L, D)
    p['out_w'], p['out_b'] = lin(L, O)
    p['pz0_mean'] = jnp.zeros((1, L), jnp.float32)
    p['pz0_logstd'] = jnp.zeros((1, L), jnp.float32)
    return p


if __name__ == "__main__":
    D, L, C, H, O = 12, 8, 8, 32, 6          # data, latent, context, hidden, output sizes
    B, S = 2, 2                              # batch, posterior samples
    T_in, T_out = 8, 12                      # observed steps, total (obs + forecast) steps

    key = jax.random.PRNGKey(0)
    kp, kx, kn = jax.random.split(key, 3)
    params = init_params(kp, D, L, C, H, O)

    xs = jax.random.normal(kx, (T_in, B, D), jnp.float32)
    ts_in = jnp.arange(T_in, dtype=jnp.float32) * 0.1
    ts_out = jnp.arange(T_out, dtype=jnp.float32) * 0.1

    fwd = jax.jit(functools.partial(discrete_latent_sde_forward, alpha=0.1, n_samples=S))
    output, log_pxs, kl_total = fwd(params, xs, ts_in, ts_out, kn)
    jax.block_until_ready((output, log_pxs, kl_total))

    assert output.shape == (T_out - T_in, B, O)
    assert log_pxs.shape == () and kl_total.shape == ()
    assert bool(jnp.isfinite(log_pxs)) and bool(jnp.isfinite(kl_total))
    print("KERNEL_OK")
</pallas_src>

<mosaic_0001>
module attributes {stable_mosaic.version = 11 : i64} {
  func.func @kernel(%arg0: memref<64x25xbf16, #tpu.memory_space<vmem>>, %arg1: memref<44x64xf32, #tpu.memory_space<vmem>>, %arg2: memref<4x8xf32, #tpu.memory_space<vmem>>, %arg3: memref<48x8xf32, #tpu.memory_space<vmem>>, %arg4: memref<480x192xbf16, #tpu.memory_space<vmem>>, %arg5: memref<208x96xbf16, #tpu.memory_space<vmem>>, %arg6: memref<7x192xf32, #tpu.memory_space<vmem>>, %arg7: memref<8x128xf32, #tpu.memory_space<vmem>>, %arg8: memref<64x128xf32, #tpu.memory_space<vmem>>, %arg9: memref<64x64xf32, #tpu.memory_space<vmem>>) attributes {dimension_semantics = [], scalar_prefetch = 0 : i64, scratch_operands = 2 : i64, tpu.core_type = #tpu.core_type<tc>} {
    %c0 = arith.constant 0 : index
    %c0_0 = arith.constant 0 : index
    %0 = vector.load %arg4[%c0, %c0_0] : memref<480x192xbf16, #tpu.memory_space<vmem>>, vector<25x192xbf16>
    %c32 = arith.constant 32 : index
    %c0_1 = arith.constant 0 : index
    %1 = vector.load %arg4[%c32, %c0_1] : memref<480x192xbf16, #tpu.memory_space<vmem>>, vector<128x192xbf16>
    %c160 = arith.constant 160 : index
    %c0_2 = arith.constant 0 : index
    %2 = vector.load %arg4[%c160, %c0_2] : memref<480x192xbf16, #tpu.memory_space<vmem>>, vector<64x192xbf16>
    %c224 = arith.constant 224 : index
    %c0_3 = arith.constant 0 : index
    %3 = vector.load %arg4[%c224, %c0_3] : memref<480x192xbf16, #tpu.memory_space<vmem>>, vector<64x192xbf16>
    %c288 = arith.constant 288 : index
    %c0_4 = arith.constant 0 : index
    %4 = vector.load %arg4[%c288, %c0_4] : memref<480x192xbf16, #tpu.memory_space<vmem>>, vector<64x96xbf16>
    %c352 = arith.constant 352 : index
    %c0_5 = arith.constant 0 : index
    %5 = vector.load %arg4[%c352, %c0_5] : memref<480x192xbf16, #tpu.memory_space<vmem>>, vector<128x16xbf16>
    %c0_6 = arith.constant 0 : index
    %c0_7 = arith.constant 0 : index
    %6 = vector.load %arg5[%c0_6, %c0_7] : memref<208x96xbf16, #tpu.memory_space<vmem>>, vector<8x96xbf16>
    %c16 = arith.constant 16 : index
    %c0_8 = arith.constant 0 : index
    %7 = vector.load %arg5[%c16, %c0_8] : memref<208x96xbf16, #tpu.memory_space<vmem>>, vector<96x64xbf16>
    %c112 = arith.constant 112 : index
    %c0_9 = arith.constant 0 : index
    %8 = vector.load %arg5[%c112, %c0_9] : memref<208x96xbf16, #tpu.memory_space<vmem>>, vector<96x24xbf16>
    %c0_10 = arith.constant 0 : index
    %c0_11 = arith.constant 0 : index
    %9 = vector.load %arg6[%c0_10, %c0_11] : memref<7x192xf32, #tpu.memory_space<vmem>>, vector<1x192xf32>
    %c1 = arith.constant 1 : index
    %c0_12 = arith.constant 0 : index
    %10 = vector.load %arg6[%c1, %c0_12] : memref<7x192xf32, #tpu.memory_space<vmem>>, vector<1x192xf32>
    %c2 = arith.constant 2 : index
    %c0_13 = arith.constant 0 : index
    %11 = vector.load %arg6[%c2, %c0_13] : memref<7x192xf32, #tpu.memory_space<vmem>>, vector<1x192xf32>
    %c3 = arith.constant 3 : index
    %c0_14 = arith.constant 0 : index
    %12 = vector.load %arg6[%c3, %c0_14] : memref<7x192xf32, #tpu.memory_space<vmem>>, vector<1x96xf32>
    %c4 = arith.constant 4 : index
    %c0_15 = arith.constant 0 : index
    %13 = vector.load %arg6[%c4, %c0_15] : memref<7x192xf32, #tpu.memory_space<vmem>>, vector<1x16xf32>
    %c5 = arith.constant 5 : index
    %c0_16 = arith.constant 0 : index
    %14 = vector.load %arg6[%c5, %c0_16] : memref<7x192xf32, #tpu.memory_space<vmem>>, vector<1x64xf32>
    %c6 = arith.constant 6 : index
    %c0_17 = arith.constant 0 : index
    %15 = vector.load %arg6[%c6, %c0_17] : memref<7x192xf32, #tpu.memory_space<vmem>>, vector<1x24xf32>
    %c0_18 = arith.constant 0 : index
    %c0_19 = arith.constant 0 : index
    %16 = vector.load %arg0[%c0_18, %c0_19] : memref<64x25xbf16, #tpu.memory_space<vmem>>, vector<64x25xbf16>
    %cst = arith.constant dense<0.000000e+00> : vector<64x192xf32>
    %17 = tpu.matmul %16, %0, %cst {dimension_numbers = #tpu.dot_dimension_numbers<[1], [0], [0], [1], [0, 0, 1, 1], [], []>} : vector<64x25xbf16>, vector<25x192xbf16>, vector<64x192xf32> -> vector<64x192xf32>
    %cst_20 = arith.constant 0.000000e+00 : f32
    %18 = vector.broadcast %cst_20 : f32 to vector<8x64xf32>
    %19 = vector.extract_strided_slice %17 {offsets = [0, 0], sizes = [8, 192], strides = [1, 1]} : vector<64x192xf32> to vector<8x192xf32>
    %20 = arith.truncf %18 : vector<8x64xf32> to vector<8x64xbf16>
    %cst_21 = arith.constant dense<0.000000e+00> : vector<8x192xf32>
    %21 = tpu.matmul %20, %2, %cst_21 {dimension_numbers = #tpu.dot_dimension_numbers<[1], [0], [0], [1], [0, 0, 1, 1], [], []>} : vector<8x64xbf16>, vector<64x192xbf16>, vector<8x192xf32> -> vector<8x192xf32>
    %22 = vector.broadcast %9 : vector<1x192xf32> to vector<8x192xf32>
    %23 = arith.addf %21, %22 : vector<8x192xf32>
    %24 = vector.extract_strided_slice %19 {offsets = [0, 0], sizes = [8, 128], strides = [1, 1]} : vector<8x192xf32> to vector<8x128xf32>
    %25 = vector.extract_strided_slice %23 {offsets = [0, 0], sizes = [8, 128], strides = [1, 1]} : vector<8x192xf32> to vector<8x128xf32>
    %26 = arith.addf %24, %25 : vector<8x128xf32>
    %27 = arith.negf %26 : vector<8x128xf32>
    %28 = math.exp %27 : vector<8x128xf32>
    %cst_22 = arith.constant 1.000000e+00 : f32
    %29 = vector.broadcast %cst_22 : f32 to vector<8x128xf32>
    %30 = arith.addf %29, %28 : vector<8x128xf32>
    %31 = arith.divf %29, %30 : vector<8x128xf32>
    %32 = vector.extract_strided_slice %31 {offsets = [0, 0], sizes = [8, 64], strides = [1, 1]} : vector<8x128xf32> to vector<8x64xf32>
    %33 = vector.extract_strided_slice %31 {offsets = [0, 64], sizes = [8, 64], strides = [1, 1]} : vector<8x128xf32> to vector<8x64xf32>
    %34 = vector.extract_strided_slice %19 {offsets = [0, 128], sizes = [8, 64], strides = [1, 1]} : vector<8x192xf32> to vector<8x64xf32>
    %35 = vector.extract_strided_slice %23 {offsets = [0, 128], sizes = [8, 64], strides = [1, 1]} : vector<8x192xf32> to vector<8x64xf32>
    %36 = arith.mulf %32, %35 : vector<8x64xf32>
    %37 = arith.addf %34, %36 : vector<8x64xf32>
    %38 = math.tanh %37 : vector<8x64xf32>
    %cst_23 = arith.constant 1.000000e+00 : f32
    %39 = vector.broadcast %cst_23 : f32 to vector<8x64xf32>
    %40 = arith.subf %39, %33 : vector<8x64xf32>
    %41 = arith.mulf %40, %38 : vector<8x64xf32>
    %42 = arith.mulf %33, %18 : vector<8x64xf32>
    %43 = arith.addf %41, %42 : vector<8x64xf32>
    %c0_24 = arith.constant 0 : index
    %c0_25 = arith.constant 0 : index
    %44 = vector.load %arg8[%c0_24, %c0_25] : memref<64x128xf32, #tpu.memory_space<vmem>>, vector<8x64xf32>
    tpu.vector_store %arg8[%c0_24, %c0_25], %43 {strides = array<i32>} : memref<64x128xf32, #tpu.memory_space<vmem>>, vector<8x64xf32>,
    %c56 = arith.constant 56 : index
    %c64 = arith.constant 64 : index
    %45 = vector.load %arg8[%c56, %c64] : memref<64x128xf32, #tpu.memory_space<vmem>>, vector<8x64xf32>
    tpu.vector_store %arg8[%c56, %c64], %43 {strides = array<i32>} : memref<64x128xf32, #tpu.memory_space<vmem>>, vector<8x64xf32>,
    %46 = vector.extract_strided_slice %17 {offsets = [8, 0], sizes = [8, 192], strides = [1, 1]} : vector<64x192xf32> to vector<8x192xf32>
    %47 = arith.truncf %43 : vector<8x64xf32> to vector<8x64xbf16>
    %cst_26 = arith.constant dense<0.000000e+00> : vector<8x192xf32>
    %48 = tpu.matmul %47, %2, %cst_26 {dimension_numbers = #tpu.dot_dimension_numbers<[1], [0], [0], [1], [0, 0, 1, 1], [], []>} : vector<8x64xbf16>, vector<64x192xbf16>, vector<8x192xf32> -> vector<8x192xf32>
    %49 = vector.broadcast %9 : vector<1x192xf32> to vector<8x192xf32>
    %50 = arith.addf %48, %49 : vector<8x192xf32>
    %51 = vector.extract_strided_slice %46 {offsets = [0, 0], sizes = [8, 128], strides = [1, 1]} : vector<8x192xf32> to vector<8x128xf32>
    %52 = vector.extract_strided_slice %50 {offsets = [0, 0], sizes = [8, 128], strides = [1, 1]} : vector<8x192xf32> to vector<8x128xf32>
    %53 = arith.addf %51, %52 : vector<8x128xf32>
    %54 = arith.negf %53 : vector<8x128xf32>
    %55 = math.exp %54 : vector<8x128xf32>
    %cst_27 = arith.constant 1.000000e+00 : f32
    %56 = vector.broadcast %cst_27 : f32 to vector<8x128xf32>
    %57 = arith.addf %56, %55 : vector<8x128xf32>
    %58 = arith.divf %56, %57 : vector<8x128xf32>
    %59 = vector.extract_strided_slice %58 {offsets = [0, 0], sizes = [8, 64], strides = [1, 1]} : vector<8x128xf32> to vector<8x64xf32>
    %60 = vector.extract_strided_slice %58 {offsets = [0, 64], sizes = [8, 64], strides = [1, 1]} : vector<8x128xf32> to vector<8x64xf32>
    %61 = vector.extract_strided_slice %46 {offsets = [0, 128], sizes = [8, 64], strides = [1, 1]} : vector<8x192xf32> to vector<8x64xf32>
    %62 = vector.extract_strided_slice %50 {offsets = [0, 128], sizes = [8, 64], strides = [1, 1]} : vector<8x192xf32> to vector<8x64xf32>
    %63 = arith.mulf %59, %62 : vector<8x64xf32>
    %64 = arith.addf %61, %63 : vector<8x64xf32>
    %65 = math.tanh %64 : vector<8x64xf32>
    %cst_28 = arith.constant 1.000000e+00 : f32
    %66 = vector.broadcast %cst_28 : f32 to vector<8x64xf32>
    %67 = arith.subf %66, %60 : vector<8x64xf32>
    %68 = arith.mulf %67, %65 : vector<8x64xf32>
    %69 = arith.mulf %60, %43 : vector<8x64xf32>
    %70 = arith.addf %68, %69 : vector<8x64xf32>
    %c8 = arith.constant 8 : index
    %c0_29 = arith.constant 0 : index
    %71 = vector.load %arg8[%c8, %c0_29] : memref<64x128xf32, #tpu.memory_space<vmem>>, vector<8x64xf32>
    tpu.vector_store %arg8[%c8, %c0_29], %70 {strides = array<i32>} : memref<64x128xf32, #tpu.memory_space<vmem>>, vector<8x64xf32>,
    %c48 = arith.constant 48 : index
    %c64_30 = arith.constant 64 : index
    %72 = vector.load %arg8[%c48, %c64_30] : memref<64x128xf32, #tpu.memory_space<vmem>>, vector<8x64xf32>
    tpu.vector_store %arg8[%c48, %c64_30], %70 {strides = array<i32>} : memref<64x128xf32, #tpu.memory_space<vmem>>, vector<8x64xf32>,
    %73 = vector.extract_strided_slice %17 {offsets = [16, 0], sizes = [8, 192], strides = [1, 1]} : vector<64x192xf32> to vector<8x192xf32>
    %74 = arith.truncf %70 : vector<8x64xf32> to vector<8x64xbf16>
    %cst_31 = arith.constant dense<0.000000e+00> : vector<8x192xf32>
    %75 = tpu.matmul %74, %2, %cst_31 {dimension_numbers = #tpu.dot_dimension_numbers<[1], [0], [0], [1], [0, 0, 1, 1], [], []>} : vector<8x64xbf16>, vector<64x192xbf16>, vector<8x192xf32> -> vector<8x192xf32>
    %76 = vector.broadcast %9 : vector<1x192xf32> to vector<8x192xf32>
    %77 = arith.addf %75, %76 : vector<8x192xf32>
    %78 = vector.extract_strided_slice %73 {offsets = [0, 0], sizes = [8, 128], strides = [1, 1]} : vector<8x192xf32> to vector<8x128xf32>
    %79 = vector.extract_strided_slice %77 {offsets = [0, 0], sizes = [8, 128], strides = [1, 1]} : vector<8x192xf32> to vector<8x128xf32>
    %80 = arith.addf %78, %79 : vector<8x128xf32>
    %81 = arith.negf %80 : vector<8x128xf32>
    %82 = math.exp %81 : vector<8x128xf32>
    %cst_32 = arith.constant 1.000000e+00 : f32
    %83 = vector.broadcast %cst_32 : f32 to vector<8x128xf32>
    %84 = arith.addf %83, %82 : vector<8x128xf32>
    %85 = arith.divf %83, %84 : vector<8x128xf32>
    %86 = vector.extract_strided_slice %85 {offsets = [0, 0], sizes = [8, 64], strides = [1, 1]} : vector<8x128xf32> to vector<8x64xf32>
    %87 = vector.extract_strided_slice %85 {offsets = [0, 64], sizes = [8, 64], strides = [1, 1]} : vector<8x128xf32> to vector<8x64xf32>
    %88 = vector.extract_strided_slice %73 {offsets = [0, 128], sizes = [8, 64], strides = [1, 1]} : vector<8x192xf32> to vector<8x64xf32>
    %89 = vector.extract_strided_slice %77 {offsets = [0, 128], sizes = [8, 64], strides = [1, 1]} : vector<8x192xf32> to vector<8x64xf32>
    %90 = arith.mulf %86, %89 : vector<8x64xf32>
    %91 = arith.addf %88, %90 : vector<8x64xf32>
    %92 = math.tanh %91 : vector<8x64xf32>
    %cst_33 = arith.constant 1.000000e+00 : f32
    %93 = vector.broadcast %cst_33 : f32 to vector<8x64xf32>
    %94 = arith.subf %93, %87 : vector<8x64xf32>
    %95 = arith.mulf %94, %92 : vector<8x64xf32>
    %96 = arith.mulf %87, %70 : vector<8x64xf32>
    %97 = arith.addf %95, %96 : vector<8x64xf32>
    %c16_34 = arith.constant 16 : index
    %c0_35 = arith.constant 0 : index
    %98 = vector.load %arg8[%c16_34, %c0_35] : memref<64x128xf32, #tpu.memory_space<vmem>>, vector<8x64xf32>
    tpu.vector_store %arg8[%c16_34, %c0_35], %97 {strides = array<i32>} : memref<64x128xf32, #tpu.memory_space<vmem>>, vector<8x64xf32>,
    %c40 = arith.constant 40 : index
    %c64_36 = arith.constant 64 : index
    %99 = vector.load %arg8[%c40, %c64_36] : memref<64x128xf32, #tpu.memory_space<vmem>>, vector<8x64xf32>
    tpu.vector_store %arg8[%c40, %c64_36], %97 {strides = array<i32>} : memref<64x128xf32, #tpu.memory_space<vmem>>, vector<8x64xf32>,
    %100 = vector.extract_strided_slice %17 {offsets = [24, 0], sizes = [8, 192], strides = [1, 1]} : vector<64x192xf32> to vector<8x192xf32>
    %101 = arith.truncf %97 : vector<8x64xf32> to vector<8x64xbf16>
    %cst_37 = arith.constant dense<0.000000e+00> : vector<8x192xf32>
    %102 = tpu.matmul %101, %2, %cst_37 {dimension_numbers = #tpu.dot_dimension_numbers<[1], [0], [0], [1], [0, 0, 1, 1], [], []>} : vector<8x64xbf16>, vector<64x192xbf16>, vector<8x192xf32> -> vector<8x192xf32>
    %103 = vector.broadcast %9 : vector<1x192xf32> to vector<8x192xf32>
    %104 = arith.addf %102, %103 : vector<8x192xf32>
    %105 = vector.extract_strided_slice %100 {offsets = [0, 0], sizes = [8, 128], strides = [1, 1]} : vector<8x192xf32> to vector<8x128xf32>
    %106 = vector.extract_strided_slice %104 {offsets = [0, 0], sizes = [8, 128], strides = [1, 1]} : vector<8x192xf32> to vector<8x128xf32>
    %107 = arith.addf %105, %106 : vector<8x128xf32>
    %108 = arith.negf %107 : vector<8x128xf32>
    %109 = math.exp %108 : vector<8x128xf32>
    %cst_38 = arith.constant 1.000000e+00 : f32
    %110 = vector.broadcast %cst_38 : f32 to vector<8x128xf32>
    %111 = arith.addf %110, %109 : vector<8x128xf32>
    %112 = arith.divf %110, %111 : vector<8x128xf32>
    %113 = vector.extract_strided_slice %112 {offsets = [0, 0], sizes = [8, 64], strides = [1, 1]} : vector<8x128xf32> to vector<8x64xf32>
    %114 = vector.extract_strided_slice %112 {offsets = [0, 64], sizes = [8, 64], strides = [1, 1]} : vector<8x128xf32> to vector<8x64xf32>
    %115 = vector.extract_strided_slice %100 {offsets = [0, 128], sizes = [8, 64], strides = [1, 1]} : vector<8x192xf32> to vector<8x64xf32>
    %116 = vector.extract_strided_slice %104 {offsets = [0, 128], sizes = [8, 64], strides = [1, 1]} : vector<8x192xf32> to vector<8x64xf32>
    %117 = arith.mulf %113, %116 : vector<8x64xf32>
    %118 = arith.addf %115, %117 : vector<8x64xf32>
    %119 = math.tanh %118 : vector<8x64xf32>
    %cst_39 = arith.constant 1.000000e+00 : f32
    %120 = vector.broadcast %cst_39 : f32 to vector<8x64xf32>
    %121 = arith.subf %120, %114 : vector<8x64xf32>
    %122 = arith.mulf %121, %119 : vector<8x64xf32>
    %123 = arith.mulf %114, %97 : vector<8x64xf32>
    %124 = arith.addf %122, %123 : vector<8x64xf32>
    %c24 = arith.constant 24 : index
    %c0_40 = arith.constant 0 : index
    %125 = vector.load %arg8[%c24, %c0_40] : memref<64x128xf32, #tpu.memory_space<vmem>>, vector<8x64xf32>
    tpu.vector_store %arg8[%c24, %c0_40], %124 {strides = array<i32>} : memref<64x128xf32, #tpu.memory_space<vmem>>, vector<8x64xf32>,
    %c32_41 = arith.constant 32 : index
    %c64_42 = arith.constant 64 : index
    %126 = vector.load %arg8[%c32_41, %c64_42] : memref<64x128xf32, #tpu.memory_space<vmem>>, vector<8x64xf32>
    tpu.vector_store %arg8[%c32_41, %c64_42], %124 {strides = array<i32>} : memref<64x128xf32, #tpu.memory_space<vmem>>, vector<8x64xf32>,
    %127 = vector.extract_strided_slice %17 {offsets = [32, 0], sizes = [8, 192], strides = [1, 1]} : vector<64x192xf32> to vector<8x192xf32>
    %128 = arith.truncf %124 : vector<8x64xf32> to vector<8x64xbf16>
    %cst_43 = arith.constant dense<0.000000e+00> : vector<8x192xf32>
    %129 = tpu.matmul %128, %2, %cst_43 {dimension_numbers = #tpu.dot_dimension_numbers<[1], [0], [0], [1], [0, 0, 1, 1], [], []>} : vector<8x64xbf16>, vector<64x192xbf16>, vector<8x192xf32> -> vector<8x192xf32>
    %130 = vector.broadcast %9 : vector<1x192xf32> to vector<8x192xf32>
    %131 = arith.addf %129, %130 : vector<8x192xf32>
    %132 = vector.extract_strided_slice %127 {offsets = [0, 0], sizes = [8, 128], strides = [1, 1]} : vector<8x192xf32> to vector<8x128xf32>
    %133 = vector.extract_strided_slice %131 {offsets = [0, 0], sizes = [8, 128], strides = [1, 1]} : vector<8x192xf32> to vector<8x128xf32>
    %134 = arith.addf %132, %133 : vector<8x128xf32>
    %135 = arith.negf %134 : vector<8x128xf32>
    %136 = math.exp %135 : vector<8x128xf32>
    %cst_44 = arith.constant 1.000000e+00 : f32
    %137 = vector.broadcast %cst_44 : f32 to vector<8x128xf32>
    %138 = arith.addf %137, %136 : vector<8x128xf32>
    %139 = arith.divf %137, %138 : vector<8x128xf32>
    %140 = vector.extract_strided_slice %139 {offsets = [0, 0], sizes = [8, 64], strides = [1, 1]} : vector<8x128xf32> to vector<8x64xf32>
    %141 = vector.extract_strided_slice %139 {offsets = [0, 64], sizes = [8, 64], strides = [1, 1]} : vector<8x128xf32> to vector<8x64xf32>
    %142 = vector.extract_strided_slice %127 {offsets = [0, 128], sizes = [8, 64], strides = [1, 1]} : vector<8x192xf32> to vector<8x64xf32>
    %143 = vector.extract_strided_slice %131 {offsets = [0, 128], sizes = [8, 64], strides = [1, 1]} : vector<8x192xf32> to vector<8x64xf32>
    %144 = arith.mulf %140, %143 : vector<8x64xf32>
    %145 = arith.addf %142, %144 : vector<8x64xf32>
    %146 = math.tanh %145 : vector<8x64xf32>
    %cst_45 = arith.constant 1.000000e+00 : f32
    %147 = vector.broadcast %cst_45 : f32 to vector<8x64xf32>
    %148 = arith.subf %147, %141 : vector<8x64xf32>
    %149 = arith.mulf %148, %146 : vector<8x64xf32>
    %150 = arith.mulf %141, %124 : vector<8x64xf32>
    %151 = arith.addf %149, %150 : vector<8x64xf32>
    %c32_46 = arith.constant 32 : index
    %c0_47 = arith.constant 0 : index
    %152 = vector.load %arg8[%c32_46, %c0_47] : memref<64x128xf32, #tpu.memory_space<vmem>>, vector<8x64xf32>
    tpu.vector_store %arg8[%c32_46, %c0_47], %151 {strides = array<i32>} : memref<64x128xf32, #tpu.memory_space<vmem>>, vector<8x64xf32>,
    %c24_48 = arith.constant 24 : index
    %c64_49 = arith.constant 64 : index
    %153 = vector.load %arg8[%c24_48, %c64_49] : memref<64x128xf32, #tpu.memory_space<vmem>>, vector<8x64xf32>
    tpu.vector_store %arg8[%c24_48, %c64_49], %151 {strides = array<i32>} : memref<64x128xf32, #tpu.memory_space<vmem>>, vector<8x64xf32>,
    %154 = vector.extract_strided_slice %17 {offsets = [40, 0], sizes = [8, 192], strides = [1, 1]} : vector<64x192xf32> to vector<8x192xf32>
    %155 = arith.truncf %151 : vector<8x64xf32> to vector<8x64xbf16>
    %cst_50 = arith.constant dense<0.000000e+00> : vector<8x192xf32>
    %156 = tpu.matmul %155, %2, %cst_50 {dimension_numbers = #tpu.dot_dimension_numbers<[1], [0], [0], [1], [0, 0, 1, 1], [], []>} : vector<8x64xbf16>, vector<64x192xbf16>, vector<8x192xf32> -> vector<8x192xf32>
    %157 = vector.broadcast %9 : vector<1x192xf32> to vector<8x192xf32>
    %158 = arith.addf %156, %157 : vector<8x192xf32>
    %159 = vector.extract_strided_slice %154 {offsets = [0, 0], sizes = [8, 128], strides = [1, 1]} : vector<8x192xf32> to vector<8x128xf32>
    %160 = vector.extract_strided_slice %158 {offsets = [0, 0], sizes = [8, 128], strides = [1, 1]} : vector<8x192xf32> to vector<8x128xf32>
    %161 = arith.addf %159, %160 : vector<8x128xf32>
    %162 = arith.negf %161 : vector<8x128xf32>
    %163 = math.exp %162 : vector<8x128xf32>
    %cst_51 = arith.constant 1.000000e+00 : f32
    %164 = vector.broadcast %cst_51 : f32 to vector<8x128xf32>
    %165 = arith.addf %164, %163 : vector<8x128xf32>
    %166 = arith.divf %164, %165 : vector<8x128xf32>
    %167 = vector.extract_strided_slice %166 {offsets = [0, 0], sizes = [8, 64], strides = [1, 1]} : vector<8x128xf32> to vector<8x64xf32>
    %168 = vector.extract_strided_slice %166 {offsets = [0, 64], sizes = [8, 64], strides = [1, 1]} : vector<8x128xf32> to vector<8x64xf32>
    %169 = vector.extract_strided_slice %154 {offsets = [0, 128], sizes = [8, 64], strides = [1, 1]} : vector<8x192xf32> to vector<8x64xf32>
    %170 = vector.extract_strided_slice %158 {offsets = [0, 128], sizes = [8, 64], strides = [1, 1]} : vector<8x192xf32> to vector<8x64xf32>
    %171 = arith.mulf %167, %170 : vector<8x64xf32>
    %172 = arith.addf %169, %171 : vector<8x64xf32>
    %173 = math.tanh %172 : vector<8x64xf32>
    %cst_52 = arith.constant 1.000000e+00 : f32
    %174 = vector.broadcast %cst_52 : f32 to vector<8x64xf32>
    %175 = arith.subf %174, %168 : vector<8x64xf32>
    %176 = arith.mulf %175, %173 : vector<8x64xf32>
    %177 = arith.mulf %168, %151 : vector<8x64xf32>
    %178 = arith.addf %176, %177 : vector<8x64xf32>
    %c40_53 = arith.constant 40 : index
    %c0_54 = arith.constant 0 : index
    %179 = vector.load %arg8[%c40_53, %c0_54] : memref<64x128xf32, #tpu.memory_space<vmem>>, vector<8x64xf32>
    tpu.vector_store %arg8[%c40_53, %c0_54], %178 {strides = array<i32>} : memref<64x128xf32, #tpu.memory_space<vmem>>, vector<8x64xf32>,
    %c16_55 = arith.constant 16 : index
    %c64_56 = arith.constant 64 : index
    %180 = vector.load %arg8[%c16_55, %c64_56] : memref<64x128xf32, #tpu.memory_space<vmem>>, vector<8x64xf32>
    tpu.vector_store %arg8[%c16_55, %c64_56], %178 {strides = array<i32>} : memref<64x128xf32, #tpu.memory_space<vmem>>, vector<8x64xf32>,
    %181 = vector.extract_strided_slice %17 {offsets = [48, 0], sizes = [8, 192], strides = [1, 1]} : vector<64x192xf32> to vector<8x192xf32>
    %182 = arith.truncf %178 : vector<8x64xf32> to vector<8x64xbf16>
    %cst_57 = arith.constant dense<0.000000e+00> : vector<8x192xf32>
    %183 = tpu.matmul %182, %2, %cst_57 {dimension_numbers = #tpu.dot_dimension_numbers<[1], [0], [0], [1], [0, 0, 1, 1], [], []>} : vector<8x64xbf16>, vector<64x192xbf16>, vector<8x192xf32> -> vector<8x192xf32>
    %184 = vector.broadcast %9 : vector<1x192xf32> to vector<8x192xf32>
    %185 = arith.addf %183, %184 : vector<8x192xf32>
    %186 = vector.extract_strided_slice %181 {offsets = [0, 0], sizes = [8, 128], strides = [1, 1]} : vector<8x192xf32> to vector<8x128xf32>
    %187 = vector.extract_strided_slice %185 {offsets = [0, 0], sizes = [8, 128], strides = [1, 1]} : vector<8x192xf32> to vector<8x128xf32>
    %188 = arith.addf %186, %187 : vector<8x128xf32>
    %189 = arith.negf %188 : vector<8x128xf32>
    %190 = math.exp %189 : vector<8x128xf32>
    %cst_58 = arith.constant 1.000000e+00 : f32
    %191 = vector.broadcast %cst_58 : f32 to vector<8x128xf32>
    %192 = arith.addf %191, %190 : vector<8x128xf32>
    %193 = arith.divf %191, %192 : vector<8x128xf32>
    %194 = vector.extract_strided_slice %193 {offsets = [0, 0], sizes = [8, 64], strides = [1, 1]} : vector<8x128xf32> to vector<8x64xf32>
    %195 = vector.extract_strided_slice %193 {offsets = [0, 64], sizes = [8, 64], strides = [1, 1]} : vector<8x128xf32> to vector<8x64xf32>
    %196 = vector.extract_strided_slice %181 {offsets = [0, 128], sizes = [8, 64], strides = [1, 1]} : vector<8x192xf32> to vector<8x64xf32>
    %197 = vector.extract_strided_slice %185 {offsets = [0, 128], sizes = [8, 64], strides = [1, 1]} : vector<8x192xf32> to vector<8x64xf32>
    %198 = arith.mulf %194, %197 : vector<8x64xf32>
    %199 = arith.addf %196, %198 : vector<8x64xf32>
    %200 = math.tanh %199 : vector<8x64xf32>
    %cst_59 = arith.constant 1.000000e+00 : f32
    %201 = vector.broadcast %cst_59 : f32 to vector<8x64xf32>
    %202 = arith.subf %201, %195 : vector<8x64xf32>
    %203 = arith.mulf %202, %200 : vector<8x64xf32>
    %204 = arith.mulf %195, %178 : vector<8x64xf32>
    %205 = arith.addf %203, %204 : vector<8x64xf32>
    %c48_60 = arith.constant 48 : index
    %c0_61 = arith.constant 0 : index
    %206 = vector.load %arg8[%c48_60, %c0_61] : memref<64x128xf32, #tpu.memory_space<vmem>>, vector<8x64xf32>
    tpu.vector_store %arg8[%c48_60, %c0_61], %205 {strides = array<i32>} : memref<64x128xf32, #tpu.memory_space<vmem>>, vector<8x64xf32>,
    %c8_62 = arith.constant 8 : index
    %c64_63 = arith.constant 64 : index
    %207 = vector.load %arg8[%c8_62, %c64_63] : memref<64x128xf32, #tpu.memory_space<vmem>>, vector<8x64xf32>
    tpu.vector_store %arg8[%c8_62, %c64_63], %205 {strides = array<i32>} : memref<64x128xf32, #tpu.memory_space<vmem>>, vector<8x64xf32>,
    %208 = vector.extract_strided_slice %17 {offsets = [56, 0], sizes = [8, 192], strides = [1, 1]} : vector<64x192xf32> to vector<8x192xf32>
    %209 = arith.truncf %205 : vector<8x64xf32> to vector<8x64xbf16>
    %cst_64 = arith.constant dense<0.000000e+00> : vector<8x192xf32>
    %210 = tpu.matmul %209, %2, %cst_64 {dimension_numbers = #tpu.dot_dimension_numbers<[1], [0], [0], [1], [0, 0, 1, 1], [], []>} : vector<8x64xbf16>, vector<64x192xbf16>, vector<8x192xf32> -> vector<8x192xf32>
    %211 = vector.broadcast %9 : vector<1x192xf32> to vector<8x192xf32>
    %212 = arith.addf %210, %211 : vector<8x192xf32>
    %213 = vector.extract_strided_slice %208 {offsets = [0, 0], sizes = [8, 128], strides = [1, 1]} : vector<8x192xf32> to vector<8x128xf32>
    %214 = vector.extract_strided_slice %212 {offsets = [0, 0], sizes = [8, 128], strides = [1, 1]} : vector<8x192xf32> to vector<8x128xf32>
    %215 = arith.addf %213, %214 : vector<8x128xf32>
    %216 = arith.negf %215 : vector<8x128xf32>
    %217 = math.exp %216 : vector<8x128xf32>
    %cst_65 = arith.constant 1.000000e+00 : f32
    %218 = vector.broadcast %cst_65 : f32 to vector<8x128xf32>
    %219 = arith.addf %218, %217 : vector<8x128xf32>
    %220 = arith.divf %218, %219 : vector<8x128xf32>
    %221 = vector.extract_strided_slice %220 {offsets = [0, 0], sizes = [8, 64], strides = [1, 1]} : vector<8x128xf32> to vector<8x64xf32>
    %222 = vector.extract_strided_slice %220 {offsets = [0, 64], sizes = [8, 64], strides = [1, 1]} : vector<8x128xf32> to vector<8x64xf32>
    %223 = vector.extract_strided_slice %208 {offsets = [0, 128], sizes = [8, 64], strides = [1, 1]} : vector<8x192xf32> to vector<8x64xf32>
    %224 = vector.extract_strided_slice %212 {offsets = [0, 128], sizes = [8, 64], strides = [1, 1]} : vector<8x192xf32> to vector<8x64xf32>
    %225 = arith.mulf %221, %224 : vector<8x64xf32>
    %226 = arith.addf %223, %225 : vector<8x64xf32>
    %227 = math.tanh %226 : vector<8x64xf32>
    %cst_66 = arith.constant 1.000000e+00 : f32
    %228 = vector.broadcast %cst_66 : f32 to vector<8x64xf32>
    %229 = arith.subf %228, %222 : vector<8x64xf32>
    %230 = arith.mulf %229, %227 : vector<8x64xf32>
    %231 = arith.mulf %222, %205 : vector<8x64xf32>
    %232 = arith.addf %230, %231 : vector<8x64xf32>
    %c56_67 = arith.constant 56 : index
    %c0_68 = arith.constant 0 : index
    %233 = vector.load %arg8[%c56_67, %c0_68] : memref<64x128xf32, #tpu.memory_space<vmem>>, vector<8x64xf32>
    tpu.vector_store %arg8[%c56_67, %c0_68], %232 {strides = array<i32>} : memref<64x128xf32, #tpu.memory_space<vmem>>, vector<8x64xf32>,
    %c0_69 = arith.constant 0 : index
    %c64_70 = arith.constant 64 : index
    %234 = vector.load %arg8[%c0_69, %c64_70] : memref<64x128xf32, #tpu.memory_space<vmem>>, vector<8x64xf32>
    tpu.vector_store %arg8[%c0_69, %c64_70], %232 {strides = array<i32>} : memref<64x128xf32, #tpu.memory_space<vmem>>, vector<8x64xf32>,
    %c0_71 = arith.constant 0 : index
    %c0_72 = arith.constant 0 : index
    %235 = vector.load %arg8[%c0_71, %c0_72] : memref<64x128xf32, #tpu.memory_space<vmem>>, vector<64x128xf32>
    %236 = arith.truncf %235 : vector<64x128xf32> to vector<64x128xbf16>
    %cst_73 = arith.constant dense<0.000000e+00> : vector<64x192xf32>
    %237 = tpu.matmul %236, %1, %cst_73 {dimension_numbers = #tpu.dot_dimension_numbers<[1], [0], [0], [1], [0, 0, 1, 1], [], []>} : vector<64x128xbf16>, vector<128x192xbf16>, vector<64x192xf32> -> vector<64x192xf32>
    %238 = vector.broadcast %11 : vector<1x192xf32> to vector<64x192xf32>
    %239 = arith.addf %237, %238 : vector<64x192xf32>
    %cst_74 = arith.constant 0.000000e+00 : f32
    %240 = vector.broadcast %cst_74 : f32 to vector<8x64xf32>
    %241 = vector.extract_strided_slice %239 {offsets = [0, 0], sizes = [8, 192], strides = [1, 1]} : vector<64x192xf32> to vector<8x192xf32>
    %242 = arith.truncf %240 : vector<8x64xf32> to vector<8x64xbf16>
    %cst_75 = arith.constant dense<0.000000e+00> : vector<8x192xf32>
    %243 = tpu.matmul %242, %3, %cst_75 {dimension_numbers = #tpu.dot_dimension_numbers<[1], [0], [0], [1], [0, 0, 1, 1], [], []>} : vector<8x64xbf16>, vector<64x192xbf16>, vector<8x192xf32> -> vector<8x192xf32>
    %244 = vector.broadcast %10 : vector<1x192xf32> to vector<8x192xf32>
    %245 = arith.addf %243, %244 : vector<8x192xf32>
    %246 = vector.extract_strided_slice %241 {offsets = [0, 0], sizes = [8, 128], strides = [1, 1]} : vector<8x192xf32> to vector<8x128xf32>
    %247 = vector.extract_strided_slice %245 {offsets = [0, 0], sizes = [8, 128], strides = [1, 1]} : vector<8x192xf32> to vector<8x128xf32>
    %248 = arith.addf %246, %247 : vector<8x128xf32>
    %249 = arith.negf %248 : vector<8x128xf32>
    %250 = math.exp %249 : vector<8x128xf32>
    %cst_76 = arith.constant 1.000000e+00 : f32
    %251 = vector.broadcast %cst_76 : f32 to vector<8x128xf32>
    %252 = arith.addf %251, %250 : vector<8x128xf32>
    %253 = arith.divf %251, %252 : vector<8x128xf32>
    %254 = vector.extract_strided_slice %253 {offsets = [0, 0], sizes = [8, 64], strides = [1, 1]} : vector<8x128xf32> to vector<8x64xf32>
    %255 = vector.extract_strided_slice %253 {offsets = [0, 64], sizes = [8, 64], strides = [1, 1]} : vector<8x128xf32> to vector<8x64xf32>
    %256 = vector.extract_strided_slice %241 {offsets = [0, 128], sizes = [8, 64], strides = [1, 1]} : vector<8x192xf32> to vector<8x64xf32>
    %257 = vector.extract_strided_slice %245 {offsets = [0, 128], sizes = [8, 64], strides = [1, 1]} : vector<8x192xf32> to vector<8x64xf32>
    %258 = arith.mulf %254, %257 : vector<8x64xf32>
    %259 = arith.addf %256, %258 : vector<8x64xf32>
    %260 = math.tanh %259 : vector<8x64xf32>
    %cst_77 = arith.constant 1.000000e+00 : f32
    %261 = vector.broadcast %cst_77 : f32 to vector<8x64xf32>
    %262 = arith.subf %261, %255 : vector<8x64xf32>
    %263 = arith.mulf %262, %260 : vector<8x64xf32>
    %264 = arith.mulf %255, %240 : vector<8x64xf32>
    %265 = arith.addf %263, %264 : vector<8x64xf32>
    %266 = vector.extract_strided_slice %265 {offsets = [0, 0], sizes = [8, 32], strides = [1, 1]} : vector<8x64xf32> to vector<8x32xf32>
    %c0_78 = arith.constant 0 : index
    %c0_79 = arith.constant 0 : index
    %267 = vector.load %arg9[%c0_78, %c0_79] : memref<64x64xf32, #tpu.memory_space<vmem>>, vector<8x32xf32>
    tpu.vector_store %arg9[%c0_78, %c0_79], %266 {strides = array<i32>} : memref<64x64xf32, #tpu.memory_space<vmem>>, vector<8x32xf32>,
    %268 = vector.extract_strided_slice %265 {offsets = [0, 32], sizes = [8, 32], strides = [1, 1]} : vector<8x64xf32> to vector<8x32xf32>
    %c56_80 = arith.constant 56 : index
    %c32_81 = arith.constant 32 : index
    %269 = vector.load %arg9[%c56_80, %c32_81] : memref<64x64xf32, #tpu.memory_space<vmem>>, vector<8x32xf32>
    tpu.vector_store %arg9[%c56_80, %c32_81], %268 {strides = array<i32>} : memref<64x64xf32, #tpu.memory_space<vmem>>, vector<8x32xf32>,
    %270 = vector.extract_strided_slice %239 {offsets = [8, 0], sizes = [8, 192], strides = [1, 1]} : vector<64x192xf32> to vector<8x192xf32>
    %271 = arith.truncf %265 : vector<8x64xf32> to vector<8x64xbf16>
    %cst_82 = arith.constant dense<0.000000e+00> : vector<8x192xf32>
    %272 = tpu.matmul %271, %3, %cst_82 {dimension_numbers = #tpu.dot_dimension_numbers<[1], [0], [0], [1], [0, 0, 1, 1], [], []>} : vector<8x64xbf16>, vector<64x192xbf16>, vector<8x192xf32> -> vector<8x192xf32>
    %273 = vector.broadcast %10 : vector<1x192xf32> to vector<8x192xf32>
    %274 = arith.addf %272, %273 : vector<8x192xf32>
    %275 = vector.extract_strided_slice %270 {offsets = [0, 0], sizes = [8, 128], strides = [1, 1]} : vector<8x192xf32> to vector<8x128xf32>
    %276 = vector.extract_strided_slice %274 {offsets = [0, 0], sizes = [8, 128], strides = [1, 1]} : vector<8x192xf32> to vector<8x128xf32>
    %277 = arith.addf %275, %276 : vector<8x128xf32>
    %278 = arith.negf %277 : vector<8x128xf32>
    %279 = math.exp %278 : vector<8x128xf32>
    %cst_83 = arith.constant 1.000000e+00 : f32
    %280 = vector.broadcast %cst_83 : f32 to vector<8x128xf32>
    %281 = arith.addf %280, %279 : vector<8x128xf32>
    %282 = arith.divf %280, %281 : vector<8x128xf32>
    %283 = vector.extract_strided_slice %282 {offsets = [0, 0], sizes = [8, 64], strides = [1, 1]} : vector<8x128xf32> to vector<8x64xf32>
    %284 = vector.extract_strided_slice %282 {offsets = [0, 64], sizes = [8, 64], strides = [1, 1]} : vector<8x128xf32> to vector<8x64xf32>
    %285 = vector.extract_strided_slice %270 {offsets = [0, 128], sizes = [8, 64], strides = [1, 1]} : vector<8x192xf32> to vector<8x64xf32>
    %286 = vector.extract_strided_slice %274 {offsets = [0, 128], sizes = [8, 64], strides = [1, 1]} : vector<8x192xf32> to vector<8x64xf32>
    %287 = arith.mulf %283, %286 : vector<8x64xf32>
    %288 = arith.addf %285, %287 : vector<8x64xf32>
    %289 = math.tanh %288 : vector<8x64xf32>
    %cst_84 = arith.constant 1.000000e+00 : f32
    %290 = vector.broadcast %cst_84 : f32 to vector<8x64xf32>
    %291 = arith.subf %290, %284 : vector<8x64xf32>
    %292 = arith.mulf %291, %289 : vector<8x64xf32>
    %293 = arith.mulf %284, %265 : vector<8x64xf32>
    %294 = arith.addf %292, %293 : vector<8x64xf32>
    %295 = vector.extract_strided_slice %294 {offsets = [0, 0], sizes = [8, 32], strides = [1, 1]} : vector<8x64xf32> to vector<8x32xf32>
    %c8_85 = arith.constant 8 : index
    %c0_86 = arith.constant 0 : index
    %296 = vector.load %arg9[%c8_85, %c0_86] : memref<64x64xf32, #tpu.memory_space<vmem>>, vector<8x32xf32>
    tpu.vector_store %arg9[%c8_85, %c0_86], %295 {strides = array<i32>} : memref<64x64xf32, #tpu.memory_space<vmem>>, vector<8x32xf32>,
    %297 = vector.extract_strided_slice %294 {offsets = [0, 32], sizes = [8, 32], strides = [1, 1]} : vector<8x64xf32> to vector<8x32xf32>
    %c48_87 = arith.constant 48 : index
    %c32_88 = arith.constant 32 : index
    %298 = vector.load %arg9[%c48_87, %c32_88] : memref<64x64xf32, #tpu.memory_space<vmem>>, vector<8x32xf32>
    tpu.vector_store %arg9[%c48_87, %c32_88], %297 {strides = array<i32>} : memref<64x64xf32, #tpu.memory_space<vmem>>, vector<8x32xf32>,
    %299 = vector.extract_strided_slice %239 {offsets = [16, 0], sizes = [8, 192], strides = [1, 1]} : vector<64x192xf32> to vector<8x192xf32>
    %300 = arith.truncf %294 : vector<8x64xf32> to vector<8x64xbf16>
    %cst_89 = arith.constant dense<0.000000e+00> : vector<8x192xf32>
    %301 = tpu.matmul %300, %3, %cst_89 {dimension_numbers = #tpu.dot_dimension_numbers<[1], [0], [0], [1], [0, 0, 1, 1], [], []>} : vector<8x64xbf16>, vector<64x192xbf16>, vector<8x192xf32> -> vector<8x192xf32>
    %302 = vector.broadcast %10 : vector<1x192xf32> to vector<8x192xf32>
    %303 = arith.addf %301, %302 : vector<8x192xf32>
    %304 = vector.extract_strided_slice %299 {offsets = [0, 0], sizes = [8, 128], strides = [1, 1]} : vector<8x192xf32> to vector<8x128xf32>
    %305 = vector.extract_strided_slice %303 {offsets = [0, 0], sizes = [8, 128], strides = [1, 1]} : vector<8x192xf32> to vector<8x128xf32>
    %306 = arith.addf %304, %305 : vector<8x128xf32>
    %307 = arith.negf %306 : vector<8x128xf32>
    %308 = math.exp %307 : vector<8x128xf32>
    %cst_90 = arith.constant 1.000000e+00 : f32
    %309 = vector.broadcast %cst_90 : f32 to vector<8x128xf32>
    %310 = arith.addf %309, %308 : vector<8x128xf32>
    %311 = arith.divf %309, %310 : vector<8x128xf32>
    %312 = vector.extract_strided_slice %311 {offsets = [0, 0], sizes = [8, 64], strides = [1, 1]} : vector<8x128xf32> to vector<8x64xf32>
    %313 = vector.extract_strided_slice %311 {offsets = [0, 64], sizes = [8, 64], strides = [1, 1]} : vector<8x128xf32> to vector<8x64xf32>
    %314 = vector.extract_strided_slice %299 {offsets = [0, 128], sizes = [8, 64], strides = [1, 1]} : vector<8x192xf32> to vector<8x64xf32>
    %315 = vector.extract_strided_slice %303 {offsets = [0, 128], sizes = [8, 64], strides = [1, 1]} : vector<8x192xf32> to vector<8x64xf32>
    %316 = arith.mulf %312, %315 : vector<8x64xf32>
    %317 = arith.addf %314, %316 : vector<8x64xf32>
    %318 = math.tanh %317 : vector<8x64xf32>
    %cst_91 = arith.constant 1.000000e+00 : f32
    %319 = vector.broadcast %cst_91 : f32 to vector<8x64xf32>
    %320 = arith.subf %319, %313 : vector<8x64xf32>
    %321 = arith.mulf %320, %318 : vector<8x64xf32>
    %322 = arith.mulf %313, %294 : vector<8x64xf32>
    %323 = arith.addf %321, %322 : vector<8x64xf32>
    %324 = vector.extract_strided_slice %323 {offsets = [0, 0], sizes = [8, 32], strides = [1, 1]} : vector<8x64xf32> to vector<8x32xf32>
    %c16_92 = arith.constant 16 : index
    %c0_93 = arith.constant 0 : index
    %325 = vector.load %arg9[%c16_92, %c0_93] : memref<64x64xf32, #tpu.memory_space<vmem>>, vector<8x32xf32>
    tpu.vector_store %arg9[%c16_92, %c0_93], %324 {strides = array<i32>} : memref<64x64xf32, #tpu.memory_space<vmem>>, vector<8x32xf32>,
    %326 = vector.extract_strided_slice %323 {offsets = [0, 32], sizes = [8, 32], strides = [1, 1]} : vector<8x64xf32> to vector<8x32xf32>
    %c40_94 = arith.constant 40 : index
    %c32_95 = arith.constant 32 : index
    %327 = vector.load %arg9[%c40_94, %c32_95] : memref<64x64xf32, #tpu.memory_space<vmem>>, vector<8x32xf32>
    tpu.vector_store %arg9[%c40_94, %c32_95], %326 {strides = array<i32>} : memref<64x64xf32, #tpu.memory_space<vmem>>, vector<8x32xf32>,
    %328 = vector.extract_strided_slice %239 {offsets = [24, 0], sizes = [8, 192], strides = [1, 1]} : vector<64x192xf32> to vector<8x192xf32>
    %329 = arith.truncf %323 : vector<8x64xf32> to vector<8x64xbf16>
    %cst_96 = arith.constant dense<0.000000e+00> : vector<8x192xf32>
    %330 = tpu.matmul %329, %3, %cst_96 {dimension_numbers = #tpu.dot_dimension_numbers<[1], [0], [0], [1], [0, 0, 1, 1], [], []>} : vector<8x64xbf16>, vector<64x192xbf16>, vector<8x192xf32> -> vector<8x192xf32>
    %331 = vector.broadcast %10 : vector<1x192xf32> to vector<8x192xf32>
    %332 = arith.addf %330, %331 : vector<8x192xf32>
    %333 = vector.extract_strided_slice %328 {offsets = [0, 0], sizes = [8, 128], strides = [1, 1]} : vector<8x192xf32> to vector<8x128xf32>
    %334 = vector.extract_strided_slice %332 {offsets = [0, 0], sizes = [8, 128], strides = [1, 1]} : vector<8x192xf32> to vector<8x128xf32>
    %335 = arith.addf %333, %334 : vector<8x128xf32>
    %336 = arith.negf %335 : vector<8x128xf32>
    %337 = math.exp %336 : vector<8x128xf32>
    %cst_97 = arith.constant 1.000000e+00 : f32
    %338 = vector.broadcast %cst_97 : f32 to vector<8x128xf32>
    %339 = arith.addf %338, %337 : vector<8x128xf32>
    %340 = arith.divf %338, %339 : vector<8x128xf32>
    %341 = vector.extract_strided_slice %340 {offsets = [0, 0], sizes = [8, 64], strides = [1, 1]} : vector<8x128xf32> to vector<8x64xf32>
    %342 = vector.extract_strided_slice %340 {offsets = [0, 64], sizes = [8, 64], strides = [1, 1]} : vector<8x128xf32> to vector<8x64xf32>
    %343 = vector.extract_strided_slice %328 {offsets = [0, 128], sizes = [8, 64], strides = [1, 1]} : vector<8x192xf32> to vector<8x64xf32>
    %344 = vector.extract_strided_slice %332 {offsets = [0, 128], sizes = [8, 64], strides = [1, 1]} : vector<8x192xf32> to vector<8x64xf32>
    %345 = arith.mulf %341, %344 : vector<8x64xf32>
    %346 = arith.addf %343, %345 : vector<8x64xf32>
    %347 = math.tanh %346 : vector<8x64xf32>
    %cst_98 = arith.constant 1.000000e+00 : f32
    %348 = vector.broadcast %cst_98 : f32 to vector<8x64xf32>
    %349 = arith.subf %348, %342 : vector<8x64xf32>
    %350 = arith.mulf %349, %347 : vector<8x64xf32>
    %351 = arith.mulf %342, %323 : vector<8x64xf32>
    %352 = arith.addf %350, %351 : vector<8x64xf32>
    %353 = vector.extract_strided_slice %352 {offsets = [0, 0], sizes = [8, 32], strides = [1, 1]} : vector<8x64xf32> to vector<8x32xf32>
    %c24_99 = arith.constant 24 : index
    %c0_100 = arith.constant 0 : index
    %354 = vector.load %arg9[%c24_99, %c0_100] : memref<64x64xf32, #tpu.memory_space<vmem>>, vector<8x32xf32>
    tpu.vector_store %arg9[%c24_99, %c0_100], %353 {strides = array<i32>} : memref<64x64xf32, #tpu.memory_space<vmem>>, vector<8x32xf32>,
    %355 = vector.extract_strided_slice %352 {offsets = [0, 32], sizes = [8, 32], strides = [1, 1]} : vector<8x64xf32> to vector<8x32xf32>
    %c32_101 = arith.constant 32 : index
    %c32_102 = arith.constant 32 : index
    %356 = vector.load %arg9[%c32_101, %c32_102] : memref<64x64xf32, #tpu.memory_space<vmem>>, vector<8x32xf32>
    tpu.vector_store %arg9[%c32_101, %c32_102], %355 {strides = array<i32>} : memref<64x64xf32, #tpu.memory_space<vmem>>, vector<8x32xf32>,
    %357 = vector.extract_strided_slice %239 {offsets = [32, 0], sizes = [8, 192], strides = [1, 1]} : vector<64x192xf32> to vector<8x192xf32>
    %358 = arith.truncf %352 : vector<8x64xf32> to vector<8x64xbf16>
    %cst_103 = arith.constant dense<0.000000e+00> : vector<8x192xf32>
    %359 = tpu.matmul %358, %3, %cst_103 {dimension_numbers = #tpu.dot_dimension_numbers<[1], [0], [0], [1], [0, 0, 1, 1], [], []>} : vector<8x64xbf16>, vector<64x192xbf16>, vector<8x192xf32> -> vector<8x192xf32>
    %360 = vector.broadcast %10 : vector<1x192xf32> to vector<8x192xf32>
    %361 = arith.addf %359, %360 : vector<8x192xf32>
    %362 = vector.extract_strided_slice %357 {offsets = [0, 0], sizes = [8, 128], strides = [1, 1]} : vector<8x192xf32> to vector<8x128xf32>
    %363 = vector.extract_strided_slice %361 {offsets = [0, 0], sizes = [8, 128], strides = [1, 1]} : vector<8x192xf32> to vector<8x128xf32>
    %364 = arith.addf %362, %363 : vector<8x128xf32>
    %365 = arith.negf %364 : vector<8x128xf32>
    %366 = math.exp %365 : vector<8x128xf32>
    %cst_104 = arith.constant 1.000000e+00 : f32
    %367 = vector.broadcast %cst_104 : f32 to vector<8x128xf32>
    %368 = arith.addf %367, %366 : vector<8x128xf32>
    %369 = arith.divf %367, %368 : vector<8x128xf32>
    %370 = vector.extract_strided_slice %369 {offsets = [0, 0], sizes = [8, 64], strides = [1, 1]} : vector<8x128xf32> to vector<8x64xf32>
    %371 = vector.extract_strided_slice %369 {offsets = [0, 64], sizes = [8, 64], strides = [1, 1]} : vector<8x128xf32> to vector<8x64xf32>
    %372 = vector.extract_strided_slice %357 {offsets = [0, 128], sizes = [8, 64], strides = [1, 1]} : vector<8x192xf32> to vector<8x64xf32>
    %373 = vector.extract_strided_slice %361 {offsets = [0, 128], sizes = [8, 64], strides = [1, 1]} : vector<8x192xf32> to vector<8x64xf32>
    %374 = arith.mulf %370, %373 : vector<8x64xf32>
    %375 = arith.addf %372, %374 : vector<8x64xf32>
    %376 = math.tanh %375 : vector<8x64xf32>
    %cst_105 = arith.constant 1.000000e+00 : f32
    %377 = vector.broadcast %cst_105 : f32 to vector<8x64xf32>
    %378 = arith.subf %377, %371 : vector<8x64xf32>
    %379 = arith.mulf %378, %376 : vector<8x64xf32>
    %380 = arith.mulf %371, %352 : vector<8x64xf32>
    %381 = arith.addf %379, %380 : vector<8x64xf32>
    %382 = vector.extract_strided_slice %381 {offsets = [0, 0], sizes = [8, 32], strides = [1, 1]} : vector<8x64xf32> to vector<8x32xf32>
    %c32_106 = arith.constant 32 : index
    %c0_107 = arith.constant 0 : index
    %383 = vector.load %arg9[%c32_106, %c0_107] : memref<64x64xf32, #tpu.memory_space<vmem>>, vector<8x32xf32>
    tpu.vector_store %arg9[%c32_106, %c0_107], %382 {strides = array<i32>} : memref<64x64xf32, #tpu.memory_space<vmem>>, vector<8x32xf32>,
    %384 = vector.extract_strided_slice %381 {offsets = [0, 32], sizes = [8, 32], strides = [1, 1]} : vector<8x64xf32> to vector<8x32xf32>
    %c24_108 = arith.constant 24 : index
    %c32_109 = arith.constant 32 : index
    %385 = vector.load %arg9[%c24_108, %c32_109] : memref<64x64xf32, #tpu.memory_space<vmem>>, vector<8x32xf32>
    tpu.vector_store %arg9[%c24_108, %c32_109], %384 {strides = array<i32>} : memref<64x64xf32, #tpu.memory_space<vmem>>, vector<8x32xf32>,
    %386 = vector.extract_strided_slice %239 {offsets = [40, 0], sizes = [8, 192], strides = [1, 1]} : vector<64x192xf32> to vector<8x192xf32>
    %387 = arith.truncf %381 : vector<8x64xf32> to vector<8x64xbf16>
    %cst_110 = arith.constant dense<0.000000e+00> : vector<8x192xf32>
    %388 = tpu.matmul %387, %3, %cst_110 {dimension_numbers = #tpu.dot_dimension_numbers<[1], [0], [0], [1], [0, 0, 1, 1], [], []>} : vector<8x64xbf16>, vector<64x192xbf16>, vector<8x192xf32> -> vector<8x192xf32>
    %389 = vector.broadcast %10 : vector<1x192xf32> to vector<8x192xf32>
    %390 = arith.addf %388, %389 : vector<8x192xf32>
    %391 = vector.extract_strided_slice %386 {offsets = [0, 0], sizes = [8, 128], strides = [1, 1]} : vector<8x192xf32> to vector<8x128xf32>
    %392 = vector.extract_strided_slice %390 {offsets = [0, 0], sizes = [8, 128], strides = [1, 1]} : vector<8x192xf32> to vector<8x128xf32>
    %393 = arith.addf %391, %392 : vector<8x128xf32>
    %394 = arith.negf %393 : vector<8x128xf32>
    %395 = math.exp %394 : vector<8x128xf32>
    %cst_111 = arith.constant 1.000000e+00 : f32
    %396 = vector.broadcast %cst_111 : f32 to vector<8x128xf32>
    %397 = arith.addf %396, %395 : vector<8x128xf32>
    %398 = arith.divf %396, %397 : vector<8x128xf32>
    %399 = vector.extract_strided_slice %398 {offsets = [0, 0], sizes = [8, 64], strides = [1, 1]} : vector<8x128xf32> to vector<8x64xf32>
    %400 = vector.extract_strided_slice %398 {offsets = [0, 64], sizes = [8, 64], strides = [1, 1]} : vector<8x128xf32> to vector<8x64xf32>
    %401 = vector.extract_strided_slice %386 {offsets = [0, 128], sizes = [8, 64], strides = [1, 1]} : vector<8x192xf32> to vector<8x64xf32>
    %402 = vector.extract_strided_slice %390 {offsets = [0, 128], sizes = [8, 64], strides = [1, 1]} : vector<8x192xf32> to vector<8x64xf32>
    %403 = arith.mulf %399, %402 : vector<8x64xf32>
    %404 = arith.addf %401, %403 : vector<8x64xf32>
    %405 = math.tanh %404 : vector<8x64xf32>
    %cst_112 = arith.constant 1.000000e+00 : f32
    %406 = vector.broadcast %cst_112 : f32 to vector<8x64xf32>
    %407 = arith.subf %406, %400 : vector<8x64xf32>
    %408 = arith.mulf %407, %405 : vector<8x64xf32>
    %409 = arith.mulf %400, %381 : vector<8x64xf32>
    %410 = arith.addf %408, %409 : vector<8x64xf32>
    %411 = vector.extract_strided_slice %410 {offsets = [0, 0], sizes = [8, 32], strides = [1, 1]} : vector<8x64xf32> to vector<8x32xf32>
    %c40_113 = arith.constant 40 : index
    %c0_114 = arith.constant 0 : index
    %412 = vector.load %arg9[%c40_113, %c0_114] : memref<64x64xf32, #tpu.memory_space<vmem>>, vector<8x32xf32>
    tpu.vector_store %arg9[%c40_113, %c0_114], %411 {strides = array<i32>} : memref<64x64xf32, #tpu.memory_space<vmem>>, vector<8x32xf32>,
    %413 = vector.extract_strided_slice %410 {offsets = [0, 32], sizes = [8, 32], strides = [1, 1]} : vector<8x64xf32> to vector<8x32xf32>
    %c16_115 = arith.constant 16 : index
    %c32_116 = arith.constant 32 : index
    %414 = vector.load %arg9[%c16_115, %c32_116] : memref<64x64xf32, #tpu.memory_space<vmem>>, vector<8x32xf32>
    tpu.vector_store %arg9[%c16_115, %c32_116], %413 {strides = array<i32>} : memref<64x64xf32, #tpu.memory_space<vmem>>, vector<8x32xf32>,
    %415 = vector.extract_strided_slice %239 {offsets = [48, 0], sizes = [8, 192], strides = [1, 1]} : vector<64x192xf32> to vector<8x192xf32>
    %416 = arith.truncf %410 : vector<8x64xf32> to vector<8x64xbf16>
    %cst_117 = arith.constant dense<0.000000e+00> : vector<8x192xf32>
    %417 = tpu.matmul %416, %3, %cst_117 {dimension_numbers = #tpu.dot_dimension_numbers<[1], [0], [0], [1], [0, 0, 1, 1], [], []>} : vector<8x64xbf16>, vector<64x192xbf16>, vector<8x192xf32> -> vector<8x192xf32>
    %418 = vector.broadcast %10 : vector<1x192xf32> to vector<8x192xf32>
    %419 = arith.addf %417, %418 : vector<8x192xf32>
    %420 = vector.extract_strided_slice %415 {offsets = [0, 0], sizes = [8, 128], strides = [1, 1]} : vector<8x192xf32> to vector<8x128xf32>
    %421 = vector.extract_strided_slice %419 {offsets = [0, 0], sizes = [8, 128], strides = [1, 1]} : vector<8x192xf32> to vector<8x128xf32>
    %422 = arith.addf %420, %421 : vector<8x128xf32>
    %423 = arith.negf %422 : vector<8x128xf32>
    %424 = math.exp %423 : vector<8x128xf32>
    %cst_118 = arith.constant 1.000000e+00 : f32
    %425 = vector.broadcast %cst_118 : f32 to vector<8x128xf32>
    %426 = arith.addf %425, %424 : vector<8x128xf32>
    %427 = arith.divf %425, %426 : vector<8x128xf32>
    %428 = vector.extract_strided_slice %427 {offsets = [0, 0], sizes = [8, 64], strides = [1, 1]} : vector<8x128xf32> to vector<8x64xf32>
    %429 = vector.extract_strided_slice %427 {offsets = [0, 64], sizes = [8, 64], strides = [1, 1]} : vector<8x128xf32> to vector<8x64xf32>
    %430 = vector.extract_strided_slice %415 {offsets = [0, 128], sizes = [8, 64], strides = [1, 1]} : vector<8x192xf32> to vector<8x64xf32>
    %431 = vector.extract_strided_slice %419 {offsets = [0, 128], sizes = [8, 64], strides = [1, 1]} : vector<8x192xf32> to vector<8x64xf32>
    %432 = arith.mulf %428, %431 : vector<8x64xf32>
    %433 = arith.addf %430, %432 : vector<8x64xf32>
    %434 = math.tanh %433 : vector<8x64xf32>
    %cst_119 = arith.constant 1.000000e+00 : f32
    %435 = vector.broadcast %cst_119 : f32 to vector<8x64xf32>
    %436 = arith.subf %435, %429 : vector<8x64xf32>
    %437 = arith.mulf %436, %434 : vector<8x64xf32>
    %438 = arith.mulf %429, %410 : vector<8x64xf32>
    %439 = arith.addf %437, %438 : vector<8x64xf32>
    %440 = vector.extract_strided_slice %439 {offsets = [0, 0], sizes = [8, 32], strides = [1, 1]} : vector<8x64xf32> to vector<8x32xf32>
    %c48_120 = arith.constant 48 : index
    %c0_121 = arith.constant 0 : index
    %441 = vector.load %arg9[%c48_120, %c0_121] : memref<64x64xf32, #tpu.memory_space<vmem>>, vector<8x32xf32>
    tpu.vector_store %arg9[%c48_120, %c0_121], %440 {strides = array<i32>} : memref<64x64xf32, #tpu.memory_space<vmem>>, vector<8x32xf32>,
    %442 = vector.extract_strided_slice %439 {offsets = [0, 32], sizes = [8, 32], strides = [1, 1]} : vector<8x64xf32> to vector<8x32xf32>
    %c8_122 = arith.constant 8 : index
    %c32_123 = arith.constant 32 : index
    %443 = vector.load %arg9[%c8_122, %c32_123] : memref<64x64xf32, #tpu.memory_space<vmem>>, vector<8x32xf32>
    tpu.vector_store %arg9[%c8_122, %c32_123], %442 {strides = array<i32>} : memref<64x64xf32, #tpu.memory_space<vmem>>, vector<8x32xf32>,
    %444 = vector.extract_strided_slice %239 {offsets = [56, 0], sizes = [8, 192], strides = [1, 1]} : vector<64x192xf32> to vector<8x192xf32>
    %445 = arith.truncf %439 : vector<8x64xf32> to vector<8x64xbf16>
    %cst_124 = arith.constant dense<0.000000e+00> : vector<8x192xf32>
    %446 = tpu.matmul %445, %3, %cst_124 {dimension_numbers = #tpu.dot_dimension_numbers<[1], [0], [0], [1], [0, 0, 1, 1], [], []>} : vector<8x64xbf16>, vector<64x192xbf16>, vector<8x192xf32> -> vector<8x192xf32>
    %447 = vector.broadcast %10 : vector<1x192xf32> to vector<8x192xf32>
    %448 = arith.addf %446, %447 : vector<8x192xf32>
    %449 = vector.extract_strided_slice %444 {offsets = [0, 0], sizes = [8, 128], strides = [1, 1]} : vector<8x192xf32> to vector<8x128xf32>
    %450 = vector.extract_strided_slice %448 {offsets = [0, 0], sizes = [8, 128], strides = [1, 1]} : vector<8x192xf32> to vector<8x128xf32>
    %451 = arith.addf %449, %450 : vector<8x128xf32>
    %452 = arith.negf %451 : vector<8x128xf32>
    %453 = math.exp %452 : vector<8x128xf32>
    %cst_125 = arith.constant 1.000000e+00 : f32
    %454 = vector.broadcast %cst_125 : f32 to vector<8x128xf32>
    %455 = arith.addf %454, %453 : vector<8x128xf32>
    %456 = arith.divf %454, %455 : vector<8x128xf32>
    %457 = vector.extract_strided_slice %456 {offsets = [0, 0], sizes = [8, 64], strides = [1, 1]} : vector<8x128xf32> to vector<8x64xf32>
    %458 = vector.extract_strided_slice %456 {offsets = [0, 64], sizes = [8, 64], strides = [1, 1]} : vector<8x128xf32> to vector<8x64xf32>
    %459 = vector.extract_strided_slice %444 {offsets = [0, 128], sizes = [8, 64], strides = [1, 1]} : vector<8x192xf32> to vector<8x64xf32>
    %460 = vector.extract_strided_slice %448 {offsets = [0, 128], sizes = [8, 64], strides = [1, 1]} : vector<8x192xf32> to vector<8x64xf32>
    %461 = arith.mulf %457, %460 : vector<8x64xf32>
    %462 = arith.addf %459, %461 : vector<8x64xf32>
    %463 = math.tanh %462 : vector<8x64xf32>
    %cst_126 = arith.constant 1.000000e+00 : f32
    %464 = vector.broadcast %cst_126 : f32 to vector<8x64xf32>
    %465 = arith.subf %464, %458 : vector<8x64xf32>
    %466 = arith.mulf %465, %463 : vector<8x64xf32>
    %467 = arith.mulf %458, %439 : vector<8x64xf32>
    %468 = arith.addf %466, %467 : vector<8x64xf32>
    %469 = vector.extract_strided_slice %468 {offsets = [0, 0], sizes = [8, 32], strides = [1, 1]} : vector<8x64xf32> to vector<8x32xf32>
    %c56_127 = arith.constant 56 : index
    %c0_128 = arith.constant 0 : index
    %470 = vector.load %arg9[%c56_127, %c0_128] : memref<64x64xf32, #tpu.memory_space<vmem>>, vector<8x32xf32>
    tpu.vector_store %arg9[%c56_127, %c0_128], %469 {strides = array<i32>} : memref<64x64xf32, #tpu.memory_space<vmem>>, vector<8x32xf32>,
    %471 = vector.extract_strided_slice %468 {offsets = [0, 32], sizes = [8, 32], strides = [1, 1]} : vector<8x64xf32> to vector<8x32xf32>
    %c0_129 = arith.constant 0 : index
    %c32_130 = arith.constant 32 : index
    %472 = vector.load %arg9[%c0_129, %c32_130] : memref<64x64xf32, #tpu.memory_space<vmem>>, vector<8x32xf32>
    tpu.vector_store %arg9[%c0_129, %c32_130], %471 {strides = array<i32>} : memref<64x64xf32, #tpu.memory_space<vmem>>, vector<8x32xf32>,
    %473 = tpu.concatenate %232, %468 in 1 : vector<8x64xf32>, vector<8x64xf32> -> vector<8x128xf32>
    %474 = arith.truncf %473 : vector<8x128xf32> to vector<8x128xbf16>
    %cst_131 = arith.constant dense<0.000000e+00> : vector<8x16xf32>
    %475 = tpu.matmul %474, %5, %cst_131 {dimension_numbers = #tpu.dot_dimension_numbers<[1], [0], [0], [1], [0, 0, 1, 1], [], []>} : vector<8x128xbf16>, vector<128x16xbf16>, vector<8x16xf32> -> vector<8x16xf32>
    %476 = vector.broadcast %13 : vector<1x16xf32> to vector<8x16xf32>
    %477 = arith.addf %475, %476 : vector<8x16xf32>
    %c0_132 = arith.constant 0 : index
    %c0_133 = arith.constant 0 : index
    %478 = vector.load %arg9[%c0_132, %c0_133] : memref<64x64xf32, #tpu.memory_space<vmem>>, vector<64x64xf32>
    %479 = arith.truncf %478 : vector<64x64xf32> to vector<64x64xbf16>
    %cst_134 = arith.constant dense<0.000000e+00> : vector<64x96xf32>
    %480 = tpu.matmul %479, %4, %cst_134 {dimension_numbers = #tpu.dot_dimension_numbers<[1], [0], [0], [1], [0, 0, 1, 1], [], []>} : vector<64x64xbf16>, vector<64x96xbf16>, vector<64x96xf32> -> vector<64x96xf32>
    %481 = vector.broadcast %12 : vector<1x96xf32> to vector<64x96xf32>
    %482 = arith.addf %480, %481 : vector<64x96xf32>
    %c0_135 = arith.constant 0 : index
    %c0_136 = arith.constant 0 : index
    %483 = vector.load %arg1[%c0_135, %c0_136] : memref<44x64xf32, #tpu.memory_space<vmem>>, vector<44x64xf32>
    %cst_137 = arith.constant dense<0.000000e+00> : vector<44x96xf32>
    %484 = tpu.matmul %483, %482, %cst_137 {dimension_numbers = #tpu.dot_dimension_numbers<[1], [0], [0], [1], [0, 0, 1, 1], [], []>} : vector<44x64xf32>, vector<64x96xf32>, vector<44x96xf32> -> vector<44x96xf32>
    %c0_138 = arith.constant 0 : index
    %c0_139 = arith.constant 0 : index
    %485 = vector.load %arg2[%c0_138, %c0_139] : memref<4x8xf32, #tpu.memory_space<vmem>>, vector<4x8xf32>
    %cst_140 = arith.constant dense<0.000000e+00> : vector<4x16xf32>
    %486 = tpu.matmul %485, %477, %cst_140 {dimension_numbers = #tpu.dot_dimension_numbers<[1], [0], [0], [1], [0, 0, 1, 1], [], []>} : vector<4x8xf32>, vector<8x16xf32>, vector<4x16xf32> -> vector<4x16xf32>
    %487 = vector.extract_strided_slice %486 {offsets = [0, 0], sizes = [4, 8], strides = [1, 1]} : vector<4x16xf32> to vector<4x8xf32>
    %488 = vector.extract_strided_slice %486 {offsets = [0, 8], sizes = [4, 8], strides = [1, 1]} : vector<4x16xf32> to vector<4x8xf32>
    %489 = math.exp %488 : vector<4x8xf32>
    %c0_141 = arith.constant 0 : index
    %c0_142 = arith.constant 0 : index
    %490 = vector.load %arg3[%c0_141, %c0_142] : memref<48x8xf32, #tpu.memory_space<vmem>>, vector<4x8xf32>
    %491 = arith.mulf %489, %490 : vector<4x8xf32>
    %492 = arith.addf %487, %491 : vector<4x8xf32>
    %cst_143 = arith.constant 0.000000e+00 : f32
    %493 = vector.broadcast %cst_143 : f32 to vector<4x8xf32>
    %494 = arith.truncf %492 : vector<4x8xf32> to vector<4x8xbf16>
    %cst_144 = arith.constant dense<0.000000e+00> : vector<4x96xf32>
    %495 = tpu.matmul %494, %6, %cst_144 {dimension_numbers = #tpu.dot_dimension_numbers<[1], [0], [0], [1], [0, 0, 1, 1], [], []>} : vector<4x8xbf16>, vector<8x96xbf16>, vector<4x96xf32> -> vector<4x96xf32>
    %496 = vector.extract_strided_slice %484 {offsets = [0, 0], sizes = [4, 96], strides = [1, 1]} : vector<44x96xf32> to vector<4x96xf32>
    %497 = arith.addf %495, %496 : vector<4x96xf32>
    %cst_145 = arith.constant 2.000000e+01 : f32
    %498 = vector.broadcast %cst_145 : f32 to vector<4x96xf32>
    %499 = arith.cmpf ogt, %497, %498 : vector<4x96xf32>
    %cst_146 = arith.constant 2.000000e+01 : f32
    %500 = vector.broadcast %cst_146 : f32 to vector<4x96xf32>
    %501 = arith.minimumf %497, %500 : vector<4x96xf32>
    %502 = math.exp %501 : vector<4x96xf32>
    %503 = math.log1p %502 : vector<4x96xf32>
    %504 = arith.select %499, %497, %503 : vector<4x96xi1>, vector<4x96xf32>
    %505 = arith.truncf %504 : vector<4x96xf32> to vector<4x96xbf16>
    %cst_147 = arith.constant dense<0.000000e+00> : vector<4x64xf32>
    %506 = tpu.matmul %505, %7, %cst_147 {dimension_numbers = #tpu.dot_dimension_numbers<[1], [0], [0], [1], [0, 0, 1, 1], [], []>} : vector<4x96xbf16>, vector<96x64xbf16>, vector<4x64xf32> -> vector<4x64xf32>
    %507 = vector.broadcast %14 : vector<1x64xf32> to vector<4x64xf32>
    %508 = arith.addf %506, %507 : vector<4x64xf32>
    %cst_148 = arith.constant 2.000000e+01 : f32
    %509 = vector.broadcast %cst_148 : f32 to vector<4x64xf32>
    %510 = arith.cmpf ogt, %508, %509 : vector<4x64xf32>
    %cst_149 = arith.constant 2.000000e+01 : f32
    %511 = vector.broadcast %cst_149 : f32 to vector<4x64xf32>
    %512 = arith.minimumf %508, %511 : vector<4x64xf32>
    %513 = math.exp %512 : vector<4x64xf32>
    %514 = math.log1p %513 : vector<4x64xf32>
    %515 = arith.select %510, %508, %514 : vector<4x64xi1>, vector<4x64xf32>
    %516 = vector.extract_strided_slice %504 {offsets = [0, 64], sizes = [4, 32], strides = [1, 1]} : vector<4x96xf32> to vector<4x32xf32>
    %517 = tpu.concatenate %515, %516 in 1 : vector<4x64xf32>, vector<4x32xf32> -> vector<4x96xf32>
    %518 = arith.truncf %517 : vector<4x96xf32> to vector<4x96xbf16>
    %cst_150 = arith.constant dense<0.000000e+00> : vector<4x24xf32>
    %519 = tpu.matmul %518, %8, %cst_150 {dimension_numbers = #tpu.dot_dimension_numbers<[1], [0], [0], [1], [0, 0, 1, 1], [], []>} : vector<4x96xbf16>, vector<96x24xbf16>, vector<4x24xf32> -> vector<4x24xf32>
    %520 = vector.broadcast %15 : vector<1x24xf32> to vector<4x24xf32>
    %521 = arith.addf %519, %520 : vector<4x24xf32>
    %522 = vector.extract_strided_slice %521 {offsets = [0, 0], sizes = [4, 8], strides = [1, 1]} : vector<4x24xf32> to vector<4x8xf32>
    %523 = vector.extract_strided_slice %521 {offsets = [0, 8], sizes = [4, 8], strides = [1, 1]} : vector<4x24xf32> to vector<4x8xf32>
    %524 = vector.extract_strided_slice %521 {offsets = [0, 16], sizes = [4, 8], strides = [1, 1]} : vector<4x24xf32> to vector<4x8xf32>
    %525 = arith.negf %524 : vector<4x8xf32>
    %526 = math.exp %525 : vector<4x8xf32>
    %cst_151 = arith.constant 1.000000e+00 : f32
    %527 = vector.broadcast %cst_151 : f32 to vector<4x8xf32>
    %528 = arith.addf %527, %526 : vector<4x8xf32>
    %529 = arith.divf %527, %528 : vector<4x8xf32>
    %cst_152 = arith.constant 0.316227764 : f32
    %530 = vector.broadcast %cst_152 : f32 to vector<4x8xf32>
    %531 = arith.mulf %530, %529 : vector<4x8xf32>
    %532 = arith.subf %522, %523 : vector<4x8xf32>
    %cst_153 = arith.constant 1.000000e-01 : f32
    %533 = vector.broadcast %cst_153 : f32 to vector<4x8xf32>
    %534 = arith.mulf %533, %532 : vector<4x8xf32>
    %535 = arith.mulf %534, %534 : vector<4x8xf32>
    %cst_154 = arith.constant 2.000000e+00 : f32
    %536 = vector.broadcast %cst_154 : f32 to vector<4x8xf32>
    %537 = arith.mulf %536, %531 : vector<4x8xf32>
    %538 = arith.mulf %537, %531 : vector<4x8xf32>
    %539 = tpu.reciprocal %538 {approx = true} : vector<4x8xf32> -> vector<4x8xf32>
    %540 = arith.mulf %535, %539 : vector<4x8xf32>
    %541 = arith.addf %493, %540 : vector<4x8xf32>
    %cst_155 = arith.constant 1.000000e-01 : f32
    %542 = vector.broadcast %cst_155 : f32 to vector<4x8xf32>
    %543 = arith.mulf %542, %522 : vector<4x8xf32>
    %544 = arith.addf %492, %543 : vector<4x8xf32>
    %c4_156 = arith.constant 4 : index
    %c0_157 = arith.constant 0 : index
    %545 = vector.load %arg3[%c4_156, %c0_157] : memref<48x8xf32, #tpu.memory_space<vmem>>, vector<4x8xf32>
    %546 = arith.mulf %531, %545 : vector<4x8xf32>
    %547 = arith.addf %544, %546 : vector<4x8xf32>
    %548 = arith.truncf %547 : vector<4x8xf32> to vector<4x8xbf16>
    %cst_158 = arith.constant dense<0.000000e+00> : vector<4x96xf32>
    %549 = tpu.matmul %548, %6, %cst_158 {dimension_numbers = #tpu.dot_dimension_numbers<[1], [0], [0], [1], [0, 0, 1, 1], [], []>} : vector<4x8xbf16>, vector<8x96xbf16>, vector<4x96xf32> -> vector<4x96xf32>
    %550 = vector.extract_strided_slice %484 {offsets = [4, 0], sizes = [4, 96], strides = [1, 1]} : vector<44x96xf32> to vector<4x96xf32>
    %551 = arith.addf %549, %550 : vector<4x96xf32>
    %cst_159 = arith.constant 2.000000e+01 : f32
    %552 = vector.broadcast %cst_159 : f32 to vector<4x96xf32>
    %553 = arith.cmpf ogt, %551, %552 : vector<4x96xf32>
    %cst_160 = arith.constant 2.000000e+01 : f32
    %554 = vector.broadcast %cst_160 : f32 to vector<4x96xf32>
    %555 = arith.minimumf %551, %554 : vector<4x96xf32>
    %556 = math.exp %555 : vector<4x96xf32>
    %557 = math.log1p %556 : vector<4x96xf32>
    %558 = arith.select %553, %551, %557 : vector<4x96xi1>, vector<4x96xf32>
    %559 = arith.truncf %558 : vector<4x96xf32> to vector<4x96xbf16>
    %cst_161 = arith.constant dense<0.000000e+00> : vector<4x64xf32>
    %560 = tpu.matmul %559, %7, %cst_161 {dimension_numbers = #tpu.dot_dimension_numbers<[1], [0], [0], [1], [0, 0, 1, 1], [], []>} : vector<4x96xbf16>, vector<96x64xbf16>, vector<4x64xf32> -> vector<4x64xf32>
    %561 = vector.broadcast %14 : vector<1x64xf32> to vector<4x64xf32>
    %562 = arith.addf %560, %561 : vector<4x64xf32>
    %cst_162 = arith.constant 2.000000e+01 : f32
    %563 = vector.broadcast %cst_162 : f32 to vector<4x64xf32>
    %564 = arith.cmpf ogt, %562, %563 : vector<4x64xf32>
    %cst_163 = arith.constant 2.000000e+01 : f32
    %565 = vector.broadcast %cst_163 : f32 to vector<4x64xf32>
    %566 = arith.minimumf %562, %565 : vector<4x64xf32>
    %567 = math.exp %566 : vector<4x64xf32>
    %568 = math.log1p %567 : vector<4x64xf32>
    %569 = arith.select %564, %562, %568 : vector<4x64xi1>, vector<4x64xf32>
    %570 = vector.extract_strided_slice %558 {offsets = [0, 64], sizes = [4, 32], strides = [1, 1]} : vector<4x96xf32> to vector<4x32xf32>
    %571 = tpu.concatenate %569, %570 in 1 : vector<4x64xf32>, vector<4x32xf32> -> vector<4x96xf32>
    %572 = arith.truncf %571 : vector<4x96xf32> to vector<4x96xbf16>
    %cst_164 = arith.constant dense<0.000000e+00> : vector<4x24xf32>
    %573 = tpu.matmul %572, %8, %cst_164 {dimension_numbers = #tpu.dot_dimension_numbers<[1], [0], [0], [1], [0, 0, 1, 1], [], []>} : vector<4x96xbf16>, vector<96x24xbf16>, vector<4x24xf32> -> vector<4x24xf32>
    %574 = vector.broadcast %15 : vector<1x24xf32> to vector<4x24xf32>
    %575 = arith.addf %573, %574 : vector<4x24xf32>
    %576 = vector.extract_strided_slice %575 {offsets = [0, 0], sizes = [4, 8], strides = [1, 1]} : vector<4x24xf32> to vector<4x8xf32>
    %577 = vector.extract_strided_slice %575 {offsets = [0, 8], sizes = [4, 8], strides = [1, 1]} : vector<4x24xf32> to vector<4x8xf32>
    %578 = vector.extract_strided_slice %575 {offsets = [0, 16], sizes = [4, 8], strides = [1, 1]} : vector<4x24xf32> to vector<4x8xf32>
    %579 = arith.negf %578 : vector<4x8xf32>
    %580 = math.exp %579 : vector<4x8xf32>
    %cst_165 = arith.constant 1.000000e+00 : f32
    %581 = vector.broadcast %cst_165 : f32 to vector<4x8xf32>
    %582 = arith.addf %581, %580 : vector<4x8xf32>
    %583 = arith.divf %581, %582 : vector<4x8xf32>
    %cst_166 = arith.constant 0.316227764 : f32
    %584 = vector.broadcast %cst_166 : f32 to vector<4x8xf32>
    %585 = arith.mulf %584, %583 : vector<4x8xf32>
    %586 = arith.subf %576, %577 : vector<4x8xf32>
    %cst_167 = arith.constant 1.000000e-01 : f32
    %587 = vector.broadcast %cst_167 : f32 to vector<4x8xf32>
    %588 = arith.mulf %587, %586 : vector<4x8xf32>
    %589 = arith.mulf %588, %588 : vector<4x8xf32>
    %cst_168 = arith.constant 2.000000e+00 : f32
    %590 = vector.broadcast %cst_168 : f32 to vector<4x8xf32>
    %591 = arith.mulf %590, %585 : vector<4x8xf32>
    %592 = arith.mulf %591, %585 : vector<4x8xf32>
    %593 = tpu.reciprocal %592 {approx = true} : vector<4x8xf32> -> vector<4x8xf32>
    %594 = arith.mulf %589, %593 : vector<4x8xf32>
    %595 = arith.addf %541, %594 : vector<4x8xf32>
    %cst_169 = arith.constant 1.000000e-01 : f32
    %596 = vector.broadcast %cst_169 : f32 to vector<4x8xf32>
    %597 = arith.mulf %596, %576 : vector<4x8xf32>
    %598 = arith.addf %547, %597 : vector<4x8xf32>
    %c8_170 = arith.constant 8 : index
    %c0_171 = arith.constant 0 : index
    %599 = vector.load %arg3[%c8_170, %c0_171] : memref<48x8xf32, #tpu.memory_space<vmem>>, vector<4x8xf32>
    %600 = arith.mulf %585, %599 : vector<4x8xf32>
    %601 = arith.addf %598, %600 : vector<4x8xf32>
    %602 = arith.truncf %601 : vector<4x8xf32> to vector<4x8xbf16>
    %cst_172 = arith.constant dense<0.000000e+00> : vector<4x96xf32>
    %603 = tpu.matmul %602, %6, %cst_172 {dimension_numbers = #tpu.dot_dimension_numbers<[1], [0], [0], [1], [0, 0, 1, 1], [], []>} : vector<4x8xbf16>, vector<8x96xbf16>, vector<4x96xf32> -> vector<4x96xf32>
    %604 = vector.extract_strided_slice %484 {offsets = [8, 0], sizes = [4, 96], strides = [1, 1]} : vector<44x96xf32> to vector<4x96xf32>
    %605 = arith.addf %603, %604 : vector<4x96xf32>
    %cst_173 = arith.constant 2.000000e+01 : f32
    %606 = vector.broadcast %cst_173 : f32 to vector<4x96xf32>
    %607 = arith.cmpf ogt, %605, %606 : vector<4x96xf32>
    %cst_174 = arith.constant 2.000000e+01 : f32
    %608 = vector.broadcast %cst_174 : f32 to vector<4x96xf32>
    %609 = arith.minimumf %605, %608 : vector<4x96xf32>
    %610 = math.exp %609 : vector<4x96xf32>
    %611 = math.log1p %610 : vector<4x96xf32>
    %612 = arith.select %607, %605, %611 : vector<4x96xi1>, vector<4x96xf32>
    %613 = arith.truncf %612 : vector<4x96xf32> to vector<4x96xbf16>
    %cst_175 = arith.constant dense<0.000000e+00> : vector<4x64xf32>
    %614 = tpu.matmul %613, %7, %cst_175 {dimension_numbers = #tpu.dot_dimension_numbers<[1], [0], [0], [1], [0, 0, 1, 1], [], []>} : vector<4x96xbf16>, vector<96x64xbf16>, vector<4x64xf32> -> vector<4x64xf32>
    %615 = vector.broadcast %14 : vector<1x64xf32> to vector<4x64xf32>
    %616 = arith.addf %614, %615 : vector<4x64xf32>
    %cst_176 = arith.constant 2.000000e+01 : f32
    %617 = vector.broadcast %cst_176 : f32 to vector<4x64xf32>
    %618 = arith.cmpf ogt, %616, %617 : vector<4x64xf32>
    %cst_177 = arith.constant 2.000000e+01 : f32
    %619 = vector.broadcast %cst_177 : f32 to vector<4x64xf32>
    %620 = arith.minimumf %616, %619 : vector<4x64xf32>
    %621 = math.exp %620 : vector<4x64xf32>
    %622 = math.log1p %621 : vector<4x64xf32>
    %623 = arith.select %618, %616, %622 : vector<4x64xi1>, vector<4x64xf32>
    %624 = vector.extract_strided_slice %612 {offsets = [0, 64], sizes = [4, 32], strides = [1, 1]} : vector<4x96xf32> to vector<4x32xf32>
    %625 = tpu.concatenate %623, %624 in 1 : vector<4x64xf32>, vector<4x32xf32> -> vector<4x96xf32>
    %626 = arith.truncf %625 : vector<4x96xf32> to vector<4x96xbf16>
    %cst_178 = arith.constant dense<0.000000e+00> : vector<4x24xf32>
    %627 = tpu.matmul %626, %8, %cst_178 {dimension_numbers = #tpu.dot_dimension_numbers<[1], [0], [0], [1], [0, 0, 1, 1], [], []>} : vector<4x96xbf16>, vector<96x24xbf16>, vector<4x24xf32> -> vector<4x24xf32>
    %628 = vector.broadcast %15 : vector<1x24xf32> to vector<4x24xf32>
    %629 = arith.addf %627, %628 : vector<4x24xf32>
    %630 = vector.extract_strided_slice %629 {offsets = [0, 0], sizes = [4, 8], strides = [1, 1]} : vector<4x24xf32> to vector<4x8xf32>
    %631 = vector.extract_strided_slice %629 {offsets = [0, 8], sizes = [4, 8], strides = [1, 1]} : vector<4x24xf32> to vector<4x8xf32>
    %632 = vector.extract_strided_slice %629 {offsets = [0, 16], sizes = [4, 8], strides = [1, 1]} : vector<4x24xf32> to vector<4x8xf32>
    %633 = arith.negf %632 : vector<4x8xf32>
    %634 = math.exp %633 : vector<4x8xf32>
    %cst_179 = arith.constant 1.000000e+00 : f32
    %635 = vector.broadcast %cst_179 : f32 to vector<4x8xf32>
    %636 = arith.addf %635, %634 : vector<4x8xf32>
    %637 = arith.divf %635, %636 : vector<4x8xf32>
    %cst_180 = arith.constant 0.316227764 : f32
    %638 = vector.broadcast %cst_180 : f32 to vector<4x8xf32>
    %639 = arith.mulf %638, %637 : vector<4x8xf32>
    %640 = arith.subf %630, %631 : vector<4x8xf32>
    %cst_181 = arith.constant 1.000000e-01 : f32
    %641 = vector.broadcast %cst_181 : f32 to vector<4x8xf32>
    %642 = arith.mulf %641, %640 : vector<4x8xf32>
    %643 = arith.mulf %642, %642 : vector<4x8xf32>
    %cst_182 = arith.constant 2.000000e+00 : f32
    %644 = vector.broadcast %cst_182 : f32 to vector<4x8xf32>
    %645 = arith.mulf %644, %639 : vector<4x8xf32>
    %646 = arith.mulf %645, %639 : vector<4x8xf32>
    %647 = tpu.reciprocal %646 {approx = true} : vector<4x8xf32> -> vector<4x8xf32>
    %648 = arith.mulf %643, %647 : vector<4x8xf32>
    %649 = arith.addf %595, %648 : vector<4x8xf32>
    %cst_183 = arith.constant 1.000000e-01 : f32
    %650 = vector.broadcast %cst_183 : f32 to vector<4x8xf32>
    %651 = arith.mulf %650, %630 : vector<4x8xf32>
    %652 = arith.addf %601, %651 : vector<4x8xf32>
    %c12 = arith.constant 12 : index
    %c0_184 = arith.constant 0 : index
    %653 = vector.load %arg3[%c12, %c0_184] : memref<48x8xf32, #tpu.memory_space<vmem>>, vector<4x8xf32>
    %654 = arith.mulf %639, %653 : vector<4x8xf32>
    %655 = arith.addf %652, %654 : vector<4x8xf32>
    %656 = arith.truncf %655 : vector<4x8xf32> to vector<4x8xbf16>
    %cst_185 = arith.constant dense<0.000000e+00> : vector<4x96xf32>
    %657 = tpu.matmul %656, %6, %cst_185 {dimension_numbers = #tpu.dot_dimension_numbers<[1], [0], [0], [1], [0, 0, 1, 1], [], []>} : vector<4x8xbf16>, vector<8x96xbf16>, vector<4x96xf32> -> vector<4x96xf32>
    %658 = vector.extract_strided_slice %484 {offsets = [12, 0], sizes = [4, 96], strides = [1, 1]} : vector<44x96xf32> to vector<4x96xf32>
    %659 = arith.addf %657, %658 : vector<4x96xf32>
    %cst_186 = arith.constant 2.000000e+01 : f32
    %660 = vector.broadcast %cst_186 : f32 to vector<4x96xf32>
    %661 = arith.cmpf ogt, %659, %660 : vector<4x96xf32>
    %cst_187 = arith.constant 2.000000e+01 : f32
    %662 = vector.broadcast %cst_187 : f32 to vector<4x96xf32>
    %663 = arith.minimumf %659, %662 : vector<4x96xf32>
    %664 = math.exp %663 : vector<4x96xf32>
    %665 = math.log1p %664 : vector<4x96xf32>
    %666 = arith.select %661, %659, %665 : vector<4x96xi1>, vector<4x96xf32>
    %667 = arith.truncf %666 : vector<4x96xf32> to vector<4x96xbf16>
    %cst_188 = arith.constant dense<0.000000e+00> : vector<4x64xf32>
    %668 = tpu.matmul %667, %7, %cst_188 {dimension_numbers = #tpu.dot_dimension_numbers<[1], [0], [0], [1], [0, 0, 1, 1], [], []>} : vector<4x96xbf16>, vector<96x64xbf16>, vector<4x64xf32> -> vector<4x64xf32>
    %669 = vector.broadcast %14 : vector<1x64xf32> to vector<4x64xf32>
    %670 = arith.addf %668, %669 : vector<4x64xf32>
    %cst_189 = arith.constant 2.000000e+01 : f32
    %671 = vector.broadcast %cst_189 : f32 to vector<4x64xf32>
    %672 = arith.cmpf ogt, %670, %671 : vector<4x64xf32>
    %cst_190 = arith.constant 2.000000e+01 : f32
    %673 = vector.broadcast %cst_190 : f32 to vector<4x64xf32>
    %674 = arith.minimumf %670, %673 : vector<4x64xf32>
    %675 = math.exp %674 : vector<4x64xf32>
    %676 = math.log1p %675 : vector<4x64xf32>
    %677 = arith.select %672, %670, %676 : vector<4x64xi1>, vector<4x64xf32>
    %678 = vector.extract_strided_slice %666 {offsets = [0, 64], sizes = [4, 32], strides = [1, 1]} : vector<4x96xf32> to vector<4x32xf32>
    %679 = tpu.concatenate %677, %678 in 1 : vector<4x64xf32>, vector<4x32xf32> -> vector<4x96xf32>
    %680 = arith.truncf %679 : vector<4x96xf32> to vector<4x96xbf16>
    %cst_191 = arith.constant dense<0.000000e+00> : vector<4x24xf32>
    %681 = tpu.matmul %680, %8, %cst_191 {dimension_numbers = #tpu.dot_dimension_numbers<[1], [0], [0], [1], [0, 0, 1, 1], [], []>} : vector<4x96xbf16>, vector<96x24xbf16>, vector<4x24xf32> -> vector<4x24xf32>
    %682 = vector.broadcast %15 : vector<1x24xf32> to vector<4x24xf32>
    %683 = arith.addf %681, %682 : vector<4x24xf32>
    %684 = vector.extract_strided_slice %683 {offsets = [0, 0], sizes = [4, 8], strides = [1, 1]} : vector<4x24xf32> to vector<4x8xf32>
    %685 = vector.extract_strided_slice %683 {offsets = [0, 8], sizes = [4, 8], strides = [1, 1]} : vector<4x24xf32> to vector<4x8xf32>
    %686 = vector.extract_strided_slice %683 {offsets = [0, 16], sizes = [4, 8], strides = [1, 1]} : vector<4x24xf32> to vector<4x8xf32>
    %687 = arith.negf %686 : vector<4x8xf32>
    %688 = math.exp %687 : vector<4x8xf32>
    %cst_192 = arith.constant 1.000000e+00 : f32
    %689 = vector.broadcast %cst_192 : f32 to vector<4x8xf32>
    %690 = arith.addf %689, %688 : vector<4x8xf32>
    %691 = arith.divf %689, %690 : vector<4x8xf32>
    %cst_193 = arith.constant 0.316227764 : f32
    %692 = vector.broadcast %cst_193 : f32 to vector<4x8xf32>
    %693 = arith.mulf %692, %691 : vector<4x8xf32>
    %694 = arith.subf %684, %685 : vector<4x8xf32>
    %cst_194 = arith.constant 1.000000e-01 : f32
    %695 = vector.broadcast %cst_194 : f32 to vector<4x8xf32>
    %696 = arith.mulf %695, %694 : vector<4x8xf32>
    %697 = arith.mulf %696, %696 : vector<4x8xf32>
    %cst_195 = arith.constant 2.000000e+00 : f32
    %698 = vector.broadcast %cst_195 : f32 to vector<4x8xf32>
    %699 = arith.mulf %698, %693 : vector<4x8xf32>
    %700 = arith.mulf %699, %693 : vector<4x8xf32>
    %701 = tpu.reciprocal %700 {approx = true} : vector<4x8xf32> -> vector<4x8xf32>
    %702 = arith.mulf %697, %701 : vector<4x8xf32>
    %703 = arith.addf %649, %702 : vector<4x8xf32>
    %cst_196 = arith.constant 1.000000e-01 : f32
    %704 = vector.broadcast %cst_196 : f32 to vector<4x8xf32>
    %705 = arith.mulf %704, %684 : vector<4x8xf32>
    %706 = arith.addf %655, %705 : vector<4x8xf32>
    %c16_197 = arith.constant 16 : index
    %c0_198 = arith.constant 0 : index
    %707 = vector.load %arg3[%c16_197, %c0_198] : memref<48x8xf32, #tpu.memory_space<vmem>>, vector<4x8xf32>
    %708 = arith.mulf %693, %707 : vector<4x8xf32>
    %709 = arith.addf %706, %708 : vector<4x8xf32>
    %710 = arith.truncf %709 : vector<4x8xf32> to vector<4x8xbf16>
    %cst_199 = arith.constant dense<0.000000e+00> : vector<4x96xf32>
    %711 = tpu.matmul %710, %6, %cst_199 {dimension_numbers = #tpu.dot_dimension_numbers<[1], [0], [0], [1], [0, 0, 1, 1], [], []>} : vector<4x8xbf16>, vector<8x96xbf16>, vector<4x96xf32> -> vector<4x96xf32>
    %712 = vector.extract_strided_slice %484 {offsets = [16, 0], sizes = [4, 96], strides = [1, 1]} : vector<44x96xf32> to vector<4x96xf32>
    %713 = arith.addf %711, %712 : vector<4x96xf32>
    %cst_200 = arith.constant 2.000000e+01 : f32
    %714 = vector.broadcast %cst_200 : f32 to vector<4x96xf32>
    %715 = arith.cmpf ogt, %713, %714 : vector<4x96xf32>
    %cst_201 = arith.constant 2.000000e+01 : f32
    %716 = vector.broadcast %cst_201 : f32 to vector<4x96xf32>
    %717 = arith.minimumf %713, %716 : vector<4x96xf32>
    %718 = math.exp %717 : vector<4x96xf32>
    %719 = math.log1p %718 : vector<4x96xf32>
    %720 = arith.select %715, %713, %719 : vector<4x96xi1>, vector<4x96xf32>
    %721 = arith.truncf %720 : vector<4x96xf32> to vector<4x96xbf16>
    %cst_202 = arith.constant dense<0.000000e+00> : vector<4x64xf32>
    %722 = tpu.matmul %721, %7, %cst_202 {dimension_numbers = #tpu.dot_dimension_numbers<[1], [0], [0], [1], [0, 0, 1, 1], [], []>} : vector<4x96xbf16>, vector<96x64xbf16>, vector<4x64xf32> -> vector<4x64xf32>
    %723 = vector.broadcast %14 : vector<1x64xf32> to vector<4x64xf32>
    %724 = arith.addf %722, %723 : vector<4x64xf32>
    %cst_203 = arith.constant 2.000000e+01 : f32
    %725 = vector.broadcast %cst_203 : f32 to vector<4x64xf32>
    %726 = arith.cmpf ogt, %724, %725 : vector<4x64xf32>
    %cst_204 = arith.constant 2.000000e+01 : f32
    %727 = vector.broadcast %cst_204 : f32 to vector<4x64xf32>
    %728 = arith.minimumf %724, %727 : vector<4x64xf32>
    %729 = math.exp %728 : vector<4x64xf32>
    %730 = math.log1p %729 : vector<4x64xf32>
    %731 = arith.select %726, %724, %730 : vector<4x64xi1>, vector<4x64xf32>
    %732 = vector.extract_strided_slice %720 {offsets = [0, 64], sizes = [4, 32], strides = [1, 1]} : vector<4x96xf32> to vector<4x32xf32>
    %733 = tpu.concatenate %731, %732 in 1 : vector<4x64xf32>, vector<4x32xf32> -> vector<4x96xf32>
    %734 = arith.truncf %733 : vector<4x96xf32> to vector<4x96xbf16>
    %cst_205 = arith.constant dense<0.000000e+00> : vector<4x24xf32>
    %735 = tpu.matmul %734, %8, %cst_205 {dimension_numbers = #tpu.dot_dimension_numbers<[1], [0], [0], [1], [0, 0, 1, 1], [], []>} : vector<4x96xbf16>, vector<96x24xbf16>, vector<4x24xf32> -> vector<4x24xf32>
    %736 = vector.broadcast %15 : vector<1x24xf32> to vector<4x24xf32>
    %737 = arith.addf %735, %736 : vector<4x24xf32>
    %738 = vector.extract_strided_slice %737 {offsets = [0, 0], sizes = [4, 8], strides = [1, 1]} : vector<4x24xf32> to vector<4x8xf32>
    %739 = vector.extract_strided_slice %737 {offsets = [0, 8], sizes = [4, 8], strides = [1, 1]} : vector<4x24xf32> to vector<4x8xf32>
    %740 = vector.extract_strided_slice %737 {offsets = [0, 16], sizes = [4, 8], strides = [1, 1]} : vector<4x24xf32> to vector<4x8xf32>
    %741 = arith.negf %740 : vector<4x8xf32>
    %742 = math.exp %741 : vector<4x8xf32>
    %cst_206 = arith.constant 1.000000e+00 : f32
    %743 = vector.broadcast %cst_206 : f32 to vector<4x8xf32>
    %744 = arith.addf %743, %742 : vector<4x8xf32>
    %745 = arith.divf %743, %744 : vector<4x8xf32>
    %cst_207 = arith.constant 0.316227764 : f32
    %746 = vector.broadcast %cst_207 : f32 to vector<4x8xf32>
    %747 = arith.mulf %746, %745 : vector<4x8xf32>
    %748 = arith.subf %738, %739 : vector<4x8xf32>
    %cst_208 = arith.constant 1.000000e-01 : f32
    %749 = vector.broadcast %cst_208 : f32 to vector<4x8xf32>
    %750 = arith.mulf %749, %748 : vector<4x8xf32>
    %751 = arith.mulf %750, %750 : vector<4x8xf32>
    %cst_209 = arith.constant 2.000000e+00 : f32
    %752 = vector.broadcast %cst_209 : f32 to vector<4x8xf32>
    %753 = arith.mulf %752, %747 : vector<4x8xf32>
    %754 = arith.mulf %753, %747 : vector<4x8xf32>
    %755 = tpu.reciprocal %754 {approx = true} : vector<4x8xf32> -> vector<4x8xf32>
    %756 = arith.mulf %751, %755 : vector<4x8xf32>
    %757 = arith.addf %703, %756 : vector<4x8xf32>
    %cst_210 = arith.constant 1.000000e-01 : f32
    %758 = vector.broadcast %cst_210 : f32 to vector<4x8xf32>
    %759 = arith.mulf %758, %738 : vector<4x8xf32>
    %760 = arith.addf %709, %759 : vector<4x8xf32>
    %c20 = arith.constant 20 : index
    %c0_211 = arith.constant 0 : index
    %761 = vector.load %arg3[%c20, %c0_211] : memref<48x8xf32, #tpu.memory_space<vmem>>, vector<4x8xf32>
    %762 = arith.mulf %747, %761 : vector<4x8xf32>
    %763 = arith.addf %760, %762 : vector<4x8xf32>
    %764 = arith.truncf %763 : vector<4x8xf32> to vector<4x8xbf16>
    %cst_212 = arith.constant dense<0.000000e+00> : vector<4x96xf32>
    %765 = tpu.matmul %764, %6, %cst_212 {dimension_numbers = #tpu.dot_dimension_numbers<[1], [0], [0], [1], [0, 0, 1, 1], [], []>} : vector<4x8xbf16>, vector<8x96xbf16>, vector<4x96xf32> -> vector<4x96xf32>
    %766 = vector.extract_strided_slice %484 {offsets = [20, 0], sizes = [4, 96], strides = [1, 1]} : vector<44x96xf32> to vector<4x96xf32>
    %767 = arith.addf %765, %766 : vector<4x96xf32>
    %cst_213 = arith.constant 2.000000e+01 : f32
    %768 = vector.broadcast %cst_213 : f32 to vector<4x96xf32>
    %769 = arith.cmpf ogt, %767, %768 : vector<4x96xf32>
    %cst_214 = arith.constant 2.000000e+01 : f32
    %770 = vector.broadcast %cst_214 : f32 to vector<4x96xf32>
    %771 = arith.minimumf %767, %770 : vector<4x96xf32>
    %772 = math.exp %771 : vector<4x96xf32>
    %773 = math.log1p %772 : vector<4x96xf32>
    %774 = arith.select %769, %767, %773 : vector<4x96xi1>, vector<4x96xf32>
    %775 = arith.truncf %774 : vector<4x96xf32> to vector<4x96xbf16>
    %cst_215 = arith.constant dense<0.000000e+00> : vector<4x64xf32>
    %776 = tpu.matmul %775, %7, %cst_215 {dimension_numbers = #tpu.dot_dimension_numbers<[1], [0], [0], [1], [0, 0, 1, 1], [], []>} : vector<4x96xbf16>, vector<96x64xbf16>, vector<4x64xf32> -> vector<4x64xf32>
    %777 = vector.broadcast %14 : vector<1x64xf32> to vector<4x64xf32>
    %778 = arith.addf %776, %777 : vector<4x64xf32>
    %cst_216 = arith.constant 2.000000e+01 : f32
    %779 = vector.broadcast %cst_216 : f32 to vector<4x64xf32>
    %780 = arith.cmpf ogt, %778, %779 : vector<4x64xf32>
    %cst_217 = arith.constant 2.000000e+01 : f32
    %781 = vector.broadcast %cst_217 : f32 to vector<4x64xf32>
    %782 = arith.minimumf %778, %781 : vector<4x64xf32>
    %783 = math.exp %782 : vector<4x64xf32>
    %784 = math.log1p %783 : vector<4x64xf32>
    %785 = arith.select %780, %778, %784 : vector<4x64xi1>, vector<4x64xf32>
    %786 = vector.extract_strided_slice %774 {offsets = [0, 64], sizes = [4, 32], strides = [1, 1]} : vector<4x96xf32> to vector<4x32xf32>
    %787 = tpu.concatenate %785, %786 in 1 : vector<4x64xf32>, vector<4x32xf32> -> vector<4x96xf32>
    %788 = arith.truncf %787 : vector<4x96xf32> to vector<4x96xbf16>
    %cst_218 = arith.constant dense<0.000000e+00> : vector<4x24xf32>
    %789 = tpu.matmul %788, %8, %cst_218 {dimension_numbers = #tpu.dot_dimension_numbers<[1], [0], [0], [1], [0, 0, 1, 1], [], []>} : vector<4x96xbf16>, vector<96x24xbf16>, vector<4x24xf32> -> vector<4x24xf32>
    %790 = vector.broadcast %15 : vector<1x24xf32> to vector<4x24xf32>
    %791 = arith.addf %789, %790 : vector<4x24xf32>
    %792 = vector.extract_strided_slice %791 {offsets = [0, 0], sizes = [4, 8], strides = [1, 1]} : vector<4x24xf32> to vector<4x8xf32>
    %793 = vector.extract_strided_slice %791 {offsets = [0, 8], sizes = [4, 8], strides = [1, 1]} : vector<4x24xf32> to vector<4x8xf32>
    %794 = vector.extract_strided_slice %791 {offsets = [0, 16], sizes = [4, 8], strides = [1, 1]} : vector<4x24xf32> to vector<4x8xf32>
    %795 = arith.negf %794 : vector<4x8xf32>
    %796 = math.exp %795 : vector<4x8xf32>
    %cst_219 = arith.constant 1.000000e+00 : f32
    %797 = vector.broadcast %cst_219 : f32 to vector<4x8xf32>
    %798 = arith.addf %797, %796 : vector<4x8xf32>
    %799 = arith.divf %797, %798 : vector<4x8xf32>
    %cst_220 = arith.constant 0.316227764 : f32
    %800 = vector.broadcast %cst_220 : f32 to vector<4x8xf32>
    %801 = arith.mulf %800, %799 : vector<4x8xf32>
    %802 = arith.subf %792, %793 : vector<4x8xf32>
    %cst_221 = arith.constant 1.000000e-01 : f32
    %803 = vector.broadcast %cst_221 : f32 to vector<4x8xf32>
    %804 = arith.mulf %803, %802 : vector<4x8xf32>
    %805 = arith.mulf %804, %804 : vector<4x8xf32>
    %cst_222 = arith.constant 2.000000e+00 : f32
    %806 = vector.broadcast %cst_222 : f32 to vector<4x8xf32>
    %807 = arith.mulf %806, %801 : vector<4x8xf32>
    %808 = arith.mulf %807, %801 : vector<4x8xf32>
    %809 = tpu.reciprocal %808 {approx = true} : vector<4x8xf32> -> vector<4x8xf32>
    %810 = arith.mulf %805, %809 : vector<4x8xf32>
    %811 = arith.addf %757, %810 : vector<4x8xf32>
    %cst_223 = arith.constant 1.000000e-01 : f32
    %812 = vector.broadcast %cst_223 : f32 to vector<4x8xf32>
    %813 = arith.mulf %812, %792 : vector<4x8xf32>
    %814 = arith.addf %763, %813 : vector<4x8xf32>
    %c24_224 = arith.constant 24 : index
    %c0_225 = arith.constant 0 : index
    %815 = vector.load %arg3[%c24_224, %c0_225] : memref<48x8xf32, #tpu.memory_space<vmem>>, vector<4x8xf32>
    %816 = arith.mulf %801, %815 : vector<4x8xf32>
    %817 = arith.addf %814, %816 : vector<4x8xf32>
    %818 = arith.truncf %817 : vector<4x8xf32> to vector<4x8xbf16>
    %cst_226 = arith.constant dense<0.000000e+00> : vector<4x96xf32>
    %819 = tpu.matmul %818, %6, %cst_226 {dimension_numbers = #tpu.dot_dimension_numbers<[1], [0], [0], [1], [0, 0, 1, 1], [], []>} : vector<4x8xbf16>, vector<8x96xbf16>, vector<4x96xf32> -> vector<4x96xf32>
    %820 = vector.extract_strided_slice %484 {offsets = [24, 0], sizes = [4, 96], strides = [1, 1]} : vector<44x96xf32> to vector<4x96xf32>
    %821 = arith.addf %819, %820 : vector<4x96xf32>
    %cst_227 = arith.constant 2.000000e+01 : f32
    %822 = vector.broadcast %cst_227 : f32 to vector<4x96xf32>
    %823 = arith.cmpf ogt, %821, %822 : vector<4x96xf32>
    %cst_228 = arith.constant 2.000000e+01 : f32
    %824 = vector.broadcast %cst_228 : f32 to vector<4x96xf32>
    %825 = arith.minimumf %821, %824 : vector<4x96xf32>
    %826 = math.exp %825 : vector<4x96xf32>
    %827 = math.log1p %826 : vector<4x96xf32>
    %828 = arith.select %823, %821, %827 : vector<4x96xi1>, vector<4x96xf32>
    %829 = arith.truncf %828 : vector<4x96xf32> to vector<4x96xbf16>
    %cst_229 = arith.constant dense<0.000000e+00> : vector<4x64xf32>
    %830 = tpu.matmul %829, %7, %cst_229 {dimension_numbers = #tpu.dot_dimension_numbers<[1], [0], [0], [1], [0, 0, 1, 1], [], []>} : vector<4x96xbf16>, vector<96x64xbf16>, vector<4x64xf32> -> vector<4x64xf32>
    %831 = vector.broadcast %14 : vector<1x64xf32> to vector<4x64xf32>
    %832 = arith.addf %830, %831 : vector<4x64xf32>
    %cst_230 = arith.constant 2.000000e+01 : f32
    %833 = vector.broadcast %cst_230 : f32 to vector<4x64xf32>
    %834 = arith.cmpf ogt, %832, %833 : vector<4x64xf32>
    %cst_231 = arith.constant 2.000000e+01 : f32
    %835 = vector.broadcast %cst_231 : f32 to vector<4x64xf32>
    %836 = arith.minimumf %832, %835 : vector<4x64xf32>
    %837 = math.exp %836 : vector<4x64xf32>
    %838 = math.log1p %837 : vector<4x64xf32>
    %839 = arith.select %834, %832, %838 : vector<4x64xi1>, vector<4x64xf32>
    %840 = vector.extract_strided_slice %828 {offsets = [0, 64], sizes = [4, 32], strides = [1, 1]} : vector<4x96xf32> to vector<4x32xf32>
    %841 = tpu.concatenate %839, %840 in 1 : vector<4x64xf32>, vector<4x32xf32> -> vector<4x96xf32>
    %842 = arith.truncf %841 : vector<4x96xf32> to vector<4x96xbf16>
    %cst_232 = arith.constant dense<0.000000e+00> : vector<4x24xf32>
    %843 = tpu.matmul %842, %8, %cst_232 {dimension_numbers = #tpu.dot_dimension_numbers<[1], [0], [0], [1], [0, 0, 1, 1], [], []>} : vector<4x96xbf16>, vector<96x24xbf16>, vector<4x24xf32> -> vector<4x24xf32>
    %844 = vector.broadcast %15 : vector<1x24xf32> to vector<4x24xf32>
    %845 = arith.addf %843, %844 : vector<4x24xf32>
    %846 = vector.extract_strided_slice %845 {offsets = [0, 0], sizes = [4, 8], strides = [1, 1]} : vector<4x24xf32> to vector<4x8xf32>
    %847 = vector.extract_strided_slice %845 {offsets = [0, 8], sizes = [4, 8], strides = [1, 1]} : vector<4x24xf32> to vector<4x8xf32>
    %848 = vector.extract_strided_slice %845 {offsets = [0, 16], sizes = [4, 8], strides = [1, 1]} : vector<4x24xf32> to vector<4x8xf32>
    %849 = arith.negf %848 : vector<4x8xf32>
    %850 = math.exp %849 : vector<4x8xf32>
    %cst_233 = arith.constant 1.000000e+00 : f32
    %851 = vector.broadcast %cst_233 : f32 to vector<4x8xf32>
    %852 = arith.addf %851, %850 : vector<4x8xf32>
    %853 = arith.divf %851, %852 : vector<4x8xf32>
    %cst_234 = arith.constant 0.316227764 : f32
    %854 = vector.broadcast %cst_234 : f32 to vector<4x8xf32>
    %855 = arith.mulf %854, %853 : vector<4x8xf32>
    %856 = arith.subf %846, %847 : vector<4x8xf32>
    %cst_235 = arith.constant 1.000000e-01 : f32
    %857 = vector.broadcast %cst_235 : f32 to vector<4x8xf32>
    %858 = arith.mulf %857, %856 : vector<4x8xf32>
    %859 = arith.mulf %858, %858 : vector<4x8xf32>
    %cst_236 = arith.constant 2.000000e+00 : f32
    %860 = vector.broadcast %cst_236 : f32 to vector<4x8xf32>
    %861 = arith.mulf %860, %855 : vector<4x8xf32>
    %862 = arith.mulf %861, %855 : vector<4x8xf32>
    %863 = tpu.reciprocal %862 {approx = true} : vector<4x8xf32> -> vector<4x8xf32>
    %864 = arith.mulf %859, %863 : vector<4x8xf32>
    %865 = arith.addf %811, %864 : vector<4x8xf32>
    %cst_237 = arith.constant 1.000000e-01 : f32
    %866 = vector.broadcast %cst_237 : f32 to vector<4x8xf32>
    %867 = arith.mulf %866, %846 : vector<4x8xf32>
    %868 = arith.addf %817, %867 : vector<4x8xf32>
    %c28 = arith.constant 28 : index
    %c0_238 = arith.constant 0 : index
    %869 = vector.load %arg3[%c28, %c0_238] : memref<48x8xf32, #tpu.memory_space<vmem>>, vector<4x8xf32>
    %870 = arith.mulf %855, %869 : vector<4x8xf32>
    %871 = arith.addf %868, %870 : vector<4x8xf32>
    %872 = arith.truncf %871 : vector<4x8xf32> to vector<4x8xbf16>
    %cst_239 = arith.constant dense<0.000000e+00> : vector<4x96xf32>
    %873 = tpu.matmul %872, %6, %cst_239 {dimension_numbers = #tpu.dot_dimension_numbers<[1], [0], [0], [1], [0, 0, 1, 1], [], []>} : vector<4x8xbf16>, vector<8x96xbf16>, vector<4x96xf32> -> vector<4x96xf32>
    %874 = vector.extract_strided_slice %484 {offsets = [28, 0], sizes = [4, 96], strides = [1, 1]} : vector<44x96xf32> to vector<4x96xf32>
    %875 = arith.addf %873, %874 : vector<4x96xf32>
    %cst_240 = arith.constant 2.000000e+01 : f32
    %876 = vector.broadcast %cst_240 : f32 to vector<4x96xf32>
    %877 = arith.cmpf ogt, %875, %876 : vector<4x96xf32>
    %cst_241 = arith.constant 2.000000e+01 : f32
    %878 = vector.broadcast %cst_241 : f32 to vector<4x96xf32>
    %879 = arith.minimumf %875, %878 : vector<4x96xf32>
    %880 = math.exp %879 : vector<4x96xf32>
    %881 = math.log1p %880 : vector<4x96xf32>
    %882 = arith.select %877, %875, %881 : vector<4x96xi1>, vector<4x96xf32>
    %883 = arith.truncf %882 : vector<4x96xf32> to vector<4x96xbf16>
    %cst_242 = arith.constant dense<0.000000e+00> : vector<4x64xf32>
    %884 = tpu.matmul %883, %7, %cst_242 {dimension_numbers = #tpu.dot_dimension_numbers<[1], [0], [0], [1], [0, 0, 1, 1], [], []>} : vector<4x96xbf16>, vector<96x64xbf16>, vector<4x64xf32> -> vector<4x64xf32>
    %885 = vector.broadcast %14 : vector<1x64xf32> to vector<4x64xf32>
    %886 = arith.addf %884, %885 : vector<4x64xf32>
    %cst_243 = arith.constant 2.000000e+01 : f32
    %887 = vector.broadcast %cst_243 : f32 to vector<4x64xf32>
    %888 = arith.cmpf ogt, %886, %887 : vector<4x64xf32>
    %cst_244 = arith.constant 2.000000e+01 : f32
    %889 = vector.broadcast %cst_244 : f32 to vector<4x64xf32>
    %890 = arith.minimumf %886, %889 : vector<4x64xf32>
    %891 = math.exp %890 : vector<4x64xf32>
    %892 = math.log1p %891 : vector<4x64xf32>
    %893 = arith.select %888, %886, %892 : vector<4x64xi1>, vector<4x64xf32>
    %894 = vector.extract_strided_slice %882 {offsets = [0, 64], sizes = [4, 32], strides = [1, 1]} : vector<4x96xf32> to vector<4x32xf32>
    %895 = tpu.concatenate %893, %894 in 1 : vector<4x64xf32>, vector<4x32xf32> -> vector<4x96xf32>
    %896 = arith.truncf %895 : vector<4x96xf32> to vector<4x96xbf16>
    %cst_245 = arith.constant dense<0.000000e+00> : vector<4x24xf32>
    %897 = tpu.matmul %896, %8, %cst_245 {dimension_numbers = #tpu.dot_dimension_numbers<[1], [0], [0], [1], [0, 0, 1, 1], [], []>} : vector<4x96xbf16>, vector<96x24xbf16>, vector<4x24xf32> -> vector<4x24xf32>
    %898 = vector.broadcast %15 : vector<1x24xf32> to vector<4x24xf32>
    %899 = arith.addf %897, %898 : vector<4x24xf32>
    %900 = vector.extract_strided_slice %899 {offsets = [0, 0], sizes = [4, 8], strides = [1, 1]} : vector<4x24xf32> to vector<4x8xf32>
    %901 = vector.extract_strided_slice %899 {offsets = [0, 8], sizes = [4, 8], strides = [1, 1]} : vector<4x24xf32> to vector<4x8xf32>
    %902 = vector.extract_strided_slice %899 {offsets = [0, 16], sizes = [4, 8], strides = [1, 1]} : vector<4x24xf32> to vector<4x8xf32>
    %903 = arith.negf %902 : vector<4x8xf32>
    %904 = math.exp %903 : vector<4x8xf32>
    %cst_246 = arith.constant 1.000000e+00 : f32
    %905 = vector.broadcast %cst_246 : f32 to vector<4x8xf32>
    %906 = arith.addf %905, %904 : vector<4x8xf32>
    %907 = arith.divf %905, %906 : vector<4x8xf32>
    %cst_247 = arith.constant 0.316227764 : f32
    %908 = vector.broadcast %cst_247 : f32 to vector<4x8xf32>
    %909 = arith.mulf %908, %907 : vector<4x8xf32>
    %910 = arith.subf %900, %901 : vector<4x8xf32>
    %cst_248 = arith.constant 1.000000e-01 : f32
    %911 = vector.broadcast %cst_248 : f32 to vector<4x8xf32>
    %912 = arith.mulf %911, %910 : vector<4x8xf32>
    %913 = arith.mulf %912, %912 : vector<4x8xf32>
    %cst_249 = arith.constant 2.000000e+00 : f32
    %914 = vector.broadcast %cst_249 : f32 to vector<4x8xf32>
    %915 = arith.mulf %914, %909 : vector<4x8xf32>
    %916 = arith.mulf %915, %909 : vector<4x8xf32>
    %917 = tpu.reciprocal %916 {approx = true} : vector<4x8xf32> -> vector<4x8xf32>
    %918 = arith.mulf %913, %917 : vector<4x8xf32>
    %919 = arith.addf %865, %918 : vector<4x8xf32>
    %cst_250 = arith.constant 1.000000e-01 : f32
    %920 = vector.broadcast %cst_250 : f32 to vector<4x8xf32>
    %921 = arith.mulf %920, %900 : vector<4x8xf32>
    %922 = arith.addf %871, %921 : vector<4x8xf32>
    %c32_251 = arith.constant 32 : index
    %c0_252 = arith.constant 0 : index
    %923 = vector.load %arg3[%c32_251, %c0_252] : memref<48x8xf32, #tpu.memory_space<vmem>>, vector<4x8xf32>
    %924 = arith.mulf %909, %923 : vector<4x8xf32>
    %925 = arith.addf %922, %924 : vector<4x8xf32>
    %926 = arith.truncf %925 : vector<4x8xf32> to vector<4x8xbf16>
    %cst_253 = arith.constant dense<0.000000e+00> : vector<4x96xf32>
    %927 = tpu.matmul %926, %6, %cst_253 {dimension_numbers = #tpu.dot_dimension_numbers<[1], [0], [0], [1], [0, 0, 1, 1], [], []>} : vector<4x8xbf16>, vector<8x96xbf16>, vector<4x96xf32> -> vector<4x96xf32>
    %928 = vector.extract_strided_slice %484 {offsets = [32, 0], sizes = [4, 96], strides = [1, 1]} : vector<44x96xf32> to vector<4x96xf32>
    %929 = arith.addf %927, %928 : vector<4x96xf32>
    %cst_254 = arith.constant 2.000000e+01 : f32
    %930 = vector.broadcast %cst_254 : f32 to vector<4x96xf32>
    %931 = arith.cmpf ogt, %929, %930 : vector<4x96xf32>
    %cst_255 = arith.constant 2.000000e+01 : f32
    %932 = vector.broadcast %cst_255 : f32 to vector<4x96xf32>
    %933 = arith.minimumf %929, %932 : vector<4x96xf32>
    %934 = math.exp %933 : vector<4x96xf32>
    %935 = math.log1p %934 : vector<4x96xf32>
    %936 = arith.select %931, %929, %935 : vector<4x96xi1>, vector<4x96xf32>
    %937 = arith.truncf %936 : vector<4x96xf32> to vector<4x96xbf16>
    %cst_256 = arith.constant dense<0.000000e+00> : vector<4x64xf32>
    %938 = tpu.matmul %937, %7, %cst_256 {dimension_numbers = #tpu.dot_dimension_numbers<[1], [0], [0], [1], [0, 0, 1, 1], [], []>} : vector<4x96xbf16>, vector<96x64xbf16>, vector<4x64xf32> -> vector<4x64xf32>
    %939 = vector.broadcast %14 : vector<1x64xf32> to vector<4x64xf32>
    %940 = arith.addf %938, %939 : vector<4x64xf32>
    %cst_257 = arith.constant 2.000000e+01 : f32
    %941 = vector.broadcast %cst_257 : f32 to vector<4x64xf32>
    %942 = arith.cmpf ogt, %940, %941 : vector<4x64xf32>
    %cst_258 = arith.constant 2.000000e+01 : f32
    %943 = vector.broadcast %cst_258 : f32 to vector<4x64xf32>
    %944 = arith.minimumf %940, %943 : vector<4x64xf32>
    %945 = math.exp %944 : vector<4x64xf32>
    %946 = math.log1p %945 : vector<4x64xf32>
    %947 = arith.select %942, %940, %946 : vector<4x64xi1>, vector<4x64xf32>
    %948 = vector.extract_strided_slice %936 {offsets = [0, 64], sizes = [4, 32], strides = [1, 1]} : vector<4x96xf32> to vector<4x32xf32>
    %949 = tpu.concatenate %947, %948 in 1 : vector<4x64xf32>, vector<4x32xf32> -> vector<4x96xf32>
    %950 = arith.truncf %949 : vector<4x96xf32> to vector<4x96xbf16>
    %cst_259 = arith.constant dense<0.000000e+00> : vector<4x24xf32>
    %951 = tpu.matmul %950, %8, %cst_259 {dimension_numbers = #tpu.dot_dimension_numbers<[1], [0], [0], [1], [0, 0, 1, 1], [], []>} : vector<4x96xbf16>, vector<96x24xbf16>, vector<4x24xf32> -> vector<4x24xf32>
    %952 = vector.broadcast %15 : vector<1x24xf32> to vector<4x24xf32>
    %953 = arith.addf %951, %952 : vector<4x24xf32>
    %954 = vector.extract_strided_slice %953 {offsets = [0, 0], sizes = [4, 8], strides = [1, 1]} : vector<4x24xf32> to vector<4x8xf32>
    %955 = vector.extract_strided_slice %953 {offsets = [0, 8], sizes = [4, 8], strides = [1, 1]} : vector<4x24xf32> to vector<4x8xf32>
    %956 = vector.extract_strided_slice %953 {offsets = [0, 16], sizes = [4, 8], strides = [1, 1]} : vector<4x24xf32> to vector<4x8xf32>
    %957 = arith.negf %956 : vector<4x8xf32>
    %958 = math.exp %957 : vector<4x8xf32>
    %cst_260 = arith.constant 1.000000e+00 : f32
    %959 = vector.broadcast %cst_260 : f32 to vector<4x8xf32>
    %960 = arith.addf %959, %958 : vector<4x8xf32>
    %961 = arith.divf %959, %960 : vector<4x8xf32>
    %cst_261 = arith.constant 0.316227764 : f32
    %962 = vector.broadcast %cst_261 : f32 to vector<4x8xf32>
    %963 = arith.mulf %962, %961 : vector<4x8xf32>
    %964 = arith.subf %954, %955 : vector<4x8xf32>
    %cst_262 = arith.constant 1.000000e-01 : f32
    %965 = vector.broadcast %cst_262 : f32 to vector<4x8xf32>
    %966 = arith.mulf %965, %964 : vector<4x8xf32>
    %967 = arith.mulf %966, %966 : vector<4x8xf32>
    %cst_263 = arith.constant 2.000000e+00 : f32
    %968 = vector.broadcast %cst_263 : f32 to vector<4x8xf32>
    %969 = arith.mulf %968, %963 : vector<4x8xf32>
    %970 = arith.mulf %969, %963 : vector<4x8xf32>
    %971 = tpu.reciprocal %970 {approx = true} : vector<4x8xf32> -> vector<4x8xf32>
    %972 = arith.mulf %967, %971 : vector<4x8xf32>
    %973 = arith.addf %919, %972 : vector<4x8xf32>
    %cst_264 = arith.constant 1.000000e-01 : f32
    %974 = vector.broadcast %cst_264 : f32 to vector<4x8xf32>
    %975 = arith.mulf %974, %954 : vector<4x8xf32>
    %976 = arith.addf %925, %975 : vector<4x8xf32>
    %c36 = arith.constant 36 : index
    %c0_265 = arith.constant 0 : index
    %977 = vector.load %arg3[%c36, %c0_265] : memref<48x8xf32, #tpu.memory_space<vmem>>, vector<4x8xf32>
    %978 = arith.mulf %963, %977 : vector<4x8xf32>
    %979 = arith.addf %976, %978 : vector<4x8xf32>
    %980 = arith.truncf %979 : vector<4x8xf32> to vector<4x8xbf16>
    %cst_266 = arith.constant dense<0.000000e+00> : vector<4x96xf32>
    %981 = tpu.matmul %980, %6, %cst_266 {dimension_numbers = #tpu.dot_dimension_numbers<[1], [0], [0], [1], [0, 0, 1, 1], [], []>} : vector<4x8xbf16>, vector<8x96xbf16>, vector<4x96xf32> -> vector<4x96xf32>
    %982 = vector.extract_strided_slice %484 {offsets = [36, 0], sizes = [4, 96], strides = [1, 1]} : vector<44x96xf32> to vector<4x96xf32>
    %983 = arith.addf %981, %982 : vector<4x96xf32>
    %cst_267 = arith.constant 2.000000e+01 : f32
    %984 = vector.broadcast %cst_267 : f32 to vector<4x96xf32>
    %985 = arith.cmpf ogt, %983, %984 : vector<4x96xf32>
    %cst_268 = arith.constant 2.000000e+01 : f32
    %986 = vector.broadcast %cst_268 : f32 to vector<4x96xf32>
    %987 = arith.minimumf %983, %986 : vector<4x96xf32>
    %988 = math.exp %987 : vector<4x96xf32>
    %989 = math.log1p %988 : vector<4x96xf32>
    %990 = arith.select %985, %983, %989 : vector<4x96xi1>, vector<4x96xf32>
    %991 = arith.truncf %990 : vector<4x96xf32> to vector<4x96xbf16>
    %cst_269 = arith.constant dense<0.000000e+00> : vector<4x64xf32>
    %992 = tpu.matmul %991, %7, %cst_269 {dimension_numbers = #tpu.dot_dimension_numbers<[1], [0], [0], [1], [0, 0, 1, 1], [], []>} : vector<4x96xbf16>, vector<96x64xbf16>, vector<4x64xf32> -> vector<4x64xf32>
    %993 = vector.broadcast %14 : vector<1x64xf32> to vector<4x64xf32>
    %994 = arith.addf %992, %993 : vector<4x64xf32>
    %cst_270 = arith.constant 2.000000e+01 : f32
    %995 = vector.broadcast %cst_270 : f32 to vector<4x64xf32>
    %996 = arith.cmpf ogt, %994, %995 : vector<4x64xf32>
    %cst_271 = arith.constant 2.000000e+01 : f32
    %997 = vector.broadcast %cst_271 : f32 to vector<4x64xf32>
    %998 = arith.minimumf %994, %997 : vector<4x64xf32>
    %999 = math.exp %998 : vector<4x64xf32>
    %1000 = math.log1p %999 : vector<4x64xf32>
    %1001 = arith.select %996, %994, %1000 : vector<4x64xi1>, vector<4x64xf32>
    %1002 = vector.extract_strided_slice %990 {offsets = [0, 64], sizes = [4, 32], strides = [1, 1]} : vector<4x96xf32> to vector<4x32xf32>
    %1003 = tpu.concatenate %1001, %1002 in 1 : vector<4x64xf32>, vector<4x32xf32> -> vector<4x96xf32>
    %1004 = arith.truncf %1003 : vector<4x96xf32> to vector<4x96xbf16>
    %cst_272 = arith.constant dense<0.000000e+00> : vector<4x24xf32>
    %1005 = tpu.matmul %1004, %8, %cst_272 {dimension_numbers = #tpu.dot_dimension_numbers<[1], [0], [0], [1], [0, 0, 1, 1], [], []>} : vector<4x96xbf16>, vector<96x24xbf16>, vector<4x24xf32> -> vector<4x24xf32>
    %1006 = vector.broadcast %15 : vector<1x24xf32> to vector<4x24xf32>
    %1007 = arith.addf %1005, %1006 : vector<4x24xf32>
    %1008 = vector.extract_strided_slice %1007 {offsets = [0, 0], sizes = [4, 8], strides = [1, 1]} : vector<4x24xf32> to vector<4x8xf32>
    %1009 = vector.extract_strided_slice %1007 {offsets = [0, 8], sizes = [4, 8], strides = [1, 1]} : vector<4x24xf32> to vector<4x8xf32>
    %1010 = vector.extract_strided_slice %1007 {offsets = [0, 16], sizes = [4, 8], strides = [1, 1]} : vector<4x24xf32> to vector<4x8xf32>
    %1011 = arith.negf %1010 : vector<4x8xf32>
    %1012 = math.exp %1011 : vector<4x8xf32>
    %cst_273 = arith.constant 1.000000e+00 : f32
    %1013 = vector.broadcast %cst_273 : f32 to vector<4x8xf32>
    %1014 = arith.addf %1013, %1012 : vector<4x8xf32>
    %1015 = arith.divf %1013, %1014 : vector<4x8xf32>
    %cst_274 = arith.constant 0.316227764 : f32
    %1016 = vector.broadcast %cst_274 : f32 to vector<4x8xf32>
    %1017 = arith.mulf %1016, %1015 : vector<4x8xf32>
    %1018 = arith.subf %1008, %1009 : vector<4x8xf32>
    %cst_275 = arith.constant 1.000000e-01 : f32
    %1019 = vector.broadcast %cst_275 : f32 to vector<4x8xf32>
    %1020 = arith.mulf %1019, %1018 : vector<4x8xf32>
    %1021 = arith.mulf %1020, %1020 : vector<4x8xf32>
    %cst_276 = arith.constant 2.000000e+00 : f32
    %1022 = vector.broadcast %cst_276 : f32 to vector<4x8xf32>
    %1023 = arith.mulf %1022, %1017 : vector<4x8xf32>
    %1024 = arith.mulf %1023, %1017 : vector<4x8xf32>
    %1025 = tpu.reciprocal %1024 {approx = true} : vector<4x8xf32> -> vector<4x8xf32>
    %1026 = arith.mulf %1021, %1025 : vector<4x8xf32>
    %1027 = arith.addf %973, %1026 : vector<4x8xf32>
    %cst_277 = arith.constant 1.000000e-01 : f32
    %1028 = vector.broadcast %cst_277 : f32 to vector<4x8xf32>
    %1029 = arith.mulf %1028, %1008 : vector<4x8xf32>
    %1030 = arith.addf %979, %1029 : vector<4x8xf32>
    %c40_278 = arith.constant 40 : index
    %c0_279 = arith.constant 0 : index
    %1031 = vector.load %arg3[%c40_278, %c0_279] : memref<48x8xf32, #tpu.memory_space<vmem>>, vector<4x8xf32>
    %1032 = arith.mulf %1017, %1031 : vector<4x8xf32>
    %1033 = arith.addf %1030, %1032 : vector<4x8xf32>
    %1034 = arith.truncf %1033 : vector<4x8xf32> to vector<4x8xbf16>
    %cst_280 = arith.constant dense<0.000000e+00> : vector<4x96xf32>
    %1035 = tpu.matmul %1034, %6, %cst_280 {dimension_numbers = #tpu.dot_dimension_numbers<[1], [0], [0], [1], [0, 0, 1, 1], [], []>} : vector<4x8xbf16>, vector<8x96xbf16>, vector<4x96xf32> -> vector<4x96xf32>
    %1036 = vector.extract_strided_slice %484 {offsets = [40, 0], sizes = [4, 96], strides = [1, 1]} : vector<44x96xf32> to vector<4x96xf32>
    %1037 = arith.addf %1035, %1036 : vector<4x96xf32>
    %cst_281 = arith.constant 2.000000e+01 : f32
    %1038 = vector.broadcast %cst_281 : f32 to vector<4x96xf32>
    %1039 = arith.cmpf ogt, %1037, %1038 : vector<4x96xf32>
    %cst_282 = arith.constant 2.000000e+01 : f32
    %1040 = vector.broadcast %cst_282 : f32 to vector<4x96xf32>
    %1041 = arith.minimumf %1037, %1040 : vector<4x96xf32>
    %1042 = math.exp %1041 : vector<4x96xf32>
    %1043 = math.log1p %1042 : vector<4x96xf32>
    %1044 = arith.select %1039, %1037, %1043 : vector<4x96xi1>, vector<4x96xf32>
    %1045 = arith.truncf %1044 : vector<4x96xf32> to vector<4x96xbf16>
    %cst_283 = arith.constant dense<0.000000e+00> : vector<4x64xf32>
    %1046 = tpu.matmul %1045, %7, %cst_283 {dimension_numbers = #tpu.dot_dimension_numbers<[1], [0], [0], [1], [0, 0, 1, 1], [], []>} : vector<4x96xbf16>, vector<96x64xbf16>, vector<4x64xf32> -> vector<4x64xf32>
    %1047 = vector.broadcast %14 : vector<1x64xf32> to vector<4x64xf32>
    %1048 = arith.addf %1046, %1047 : vector<4x64xf32>
    %cst_284 = arith.constant 2.000000e+01 : f32
    %1049 = vector.broadcast %cst_284 : f32 to vector<4x64xf32>
    %1050 = arith.cmpf ogt, %1048, %1049 : vector<4x64xf32>
    %cst_285 = arith.constant 2.000000e+01 : f32
    %1051 = vector.broadcast %cst_285 : f32 to vector<4x64xf32>
    %1052 = arith.minimumf %1048, %1051 : vector<4x64xf32>
    %1053 = math.exp %1052 : vector<4x64xf32>
    %1054 = math.log1p %1053 : vector<4x64xf32>
    %1055 = arith.select %1050, %1048, %1054 : vector<4x64xi1>, vector<4x64xf32>
    %1056 = vector.extract_strided_slice %1044 {offsets = [0, 64], sizes = [4, 32], strides = [1, 1]} : vector<4x96xf32> to vector<4x32xf32>
    %1057 = tpu.concatenate %1055, %1056 in 1 : vector<4x64xf32>, vector<4x32xf32> -> vector<4x96xf32>
    %1058 = arith.truncf %1057 : vector<4x96xf32> to vector<4x96xbf16>
    %cst_286 = arith.constant dense<0.000000e+00> : vector<4x24xf32>
    %1059 = tpu.matmul %1058, %8, %cst_286 {dimension_numbers = #tpu.dot_dimension_numbers<[1], [0], [0], [1], [0, 0, 1, 1], [], []>} : vector<4x96xbf16>, vector<96x24xbf16>, vector<4x24xf32> -> vector<4x24xf32>
    %1060 = vector.broadcast %15 : vector<1x24xf32> to vector<4x24xf32>
    %1061 = arith.addf %1059, %1060 : vector<4x24xf32>
    %1062 = vector.extract_strided_slice %1061 {offsets = [0, 0], sizes = [4, 8], strides = [1, 1]} : vector<4x24xf32> to vector<4x8xf32>
    %1063 = vector.extract_strided_slice %1061 {offsets = [0, 8], sizes = [4, 8], strides = [1, 1]} : vector<4x24xf32> to vector<4x8xf32>
    %1064 = vector.extract_strided_slice %1061 {offsets = [0, 16], sizes = [4, 8], strides = [1, 1]} : vector<4x24xf32> to vector<4x8xf32>
    %1065 = arith.negf %1064 : vector<4x8xf32>
    %1066 = math.exp %1065 : vector<4x8xf32>
    %cst_287 = arith.constant 1.000000e+00 : f32
    %1067 = vector.broadcast %cst_287 : f32 to vector<4x8xf32>
    %1068 = arith.addf %1067, %1066 : vector<4x8xf32>
    %1069 = arith.divf %1067, %1068 : vector<4x8xf32>
    %cst_288 = arith.constant 0.316227764 : f32
    %1070 = vector.broadcast %cst_288 : f32 to vector<4x8xf32>
    %1071 = arith.mulf %1070, %1069 : vector<4x8xf32>
    %1072 = arith.subf %1062, %1063 : vector<4x8xf32>
    %cst_289 = arith.constant 1.000000e-01 : f32
    %1073 = vector.broadcast %cst_289 : f32 to vector<4x8xf32>
    %1074 = arith.mulf %1073, %1072 : vector<4x8xf32>
    %1075 = arith.mulf %1074, %1074 : vector<4x8xf32>
    %cst_290 = arith.constant 2.000000e+00 : f32
    %1076 = vector.broadcast %cst_290 : f32 to vector<4x8xf32>
    %1077 = arith.mulf %1076, %1071 : vector<4x8xf32>
    %1078 = arith.mulf %1077, %1071 : vector<4x8xf32>
    %1079 = tpu.reciprocal %1078 {approx = true} : vector<4x8xf32> -> vector<4x8xf32>
    %1080 = arith.mulf %1075, %1079 : vector<4x8xf32>
    %1081 = arith.addf %1027, %1080 : vector<4x8xf32>
    %cst_291 = arith.constant 1.000000e-01 : f32
    %1082 = vector.broadcast %cst_291 : f32 to vector<4x8xf32>
    %1083 = arith.mulf %1082, %1062 : vector<4x8xf32>
    %1084 = arith.addf %1033, %1083 : vector<4x8xf32>
    %c44 = arith.constant 44 : index
    %c0_292 = arith.constant 0 : index
    %1085 = vector.load %arg3[%c44, %c0_292] : memref<48x8xf32, #tpu.memory_space<vmem>>, vector<4x8xf32>
    %1086 = arith.mulf %1071, %1085 : vector<4x8xf32>
    %1087 = arith.addf %1084, %1086 : vector<4x8xf32>
    %1088 = tpu.concatenate %492, %547, %601, %655, %709, %763, %817, %871, %925, %979, %1033, %1087 in 1 : vector<4x8xf32>, vector<4x8xf32>, vector<4x8xf32>, vector<4x8xf32>, vector<4x8xf32>, vector<4x8xf32>, vector<4x8xf32>, vector<4x8xf32>, vector<4x8xf32>, vector<4x8xf32>, vector<4x8xf32>, vector<4x8xf32> -> vector<4x96xf32>
    %1089 = tpu.concatenate %1088, %1081 in 1 : vector<4x96xf32>, vector<4x8xf32> -> vector<4x104xf32>
    %cst_293 = arith.constant 0.000000e+00 : f32
    %1090 = vector.broadcast %cst_293 : f32 to vector<4x104xf32>
    %1091 = tpu.concatenate %1089, %1090 in 0 : vector<4x104xf32>, vector<4x104xf32> -> vector<8x104xf32>
    %1092 = tpu.concatenate %1091, %477 in 1 : vector<8x104xf32>, vector<8x16xf32> -> vector<8x120xf32>
    %cst_294 = arith.constant 0.000000e+00 : f32
    %1093 = vector.broadcast %cst_294 : f32 to vector<8x8xf32>
    %1094 = tpu.concatenate %1092, %1093 in 1 : vector<8x120xf32>, vector<8x8xf32> -> vector<8x128xf32>
    %c0_295 = arith.constant 0 : index
    %c0_296 = arith.constant 0 : index
    %1095 = vector.load %arg7[%c0_295, %c0_296] : memref<8x128xf32, #tpu.memory_space<vmem>>, vector<8x128xf32>
    tpu.vector_store %arg7[%c0_295, %c0_296], %1094 {strides = array<i32>} : memref<8x128xf32, #tpu.memory_space<vmem>>, vector<8x128xf32>,
    return
  }
}

</mosaic_0001>

<bundles_post_ra>
// kernel: custom-call
= control target key start
LH: loop header
LB: loop body
LE: loop exit
PB: predicated region body
PF: predicated region fallthrough
CT: control target
= control target key end

     0   :  { %s6_s0 = inlined_call_operand.vmem [shape: u32[11], index: 0, kind: output, shape index: {}]  }

// kernel: discrete_latent_sde_forward.3
= control target key start
LH: loop header
LB: loop body
LE: loop exit
PB: predicated region body
PF: predicated region fallthrough
CT: control target
= control target key end

     0   :  { %vm180_vm0 = vcmask 1043456   ;;  %vm181_vm1 = vcmask 1044480   ;;  %v5664_v1 = vmov 65535   ;;  %v5665_v3 = vmov 0   ;;  %s5666_s29 = smov 64   ;;  %s5669_s20 = smov 8   ;;  %s7296_s4 = inlined_call_operand.vmem [shape: bf16[480,192], index: 4, kind: input, shape index: {}]   ;;  %s7297_s0 = inlined_call_operand.vmem [shape: bf16[64,25], index: 0, kind: input, shape index: {}]   ;;  %s7298_s5 = inlined_call_operand.vmem [shape: bf16[208,96], index: 5, kind: input, shape index: {}]   ;;  %s7299_s6 = inlined_call_operand.vmem [shape: f32[7,192], index: 6, kind: input, shape index: {}]   ;;  %s7300_s3 = inlined_call_operand.vmem [shape: f32[48,8], index: 3, kind: input, shape index: {}]   ;;  %s7301_s2 = inlined_call_operand.vmem [shape: f32[4,8], index: 2, kind: input, shape index: {}]   ;;  %s7302_s1 = inlined_call_operand.vmem [shape: f32[44,64], index: 1, kind: input, shape index: {}]   ;;  %s7303_s7 = inlined_call_operand.vmem [shape: f32[8,128], index: 7, kind: output, shape index: {}]  }
   0x1   :  { %v5726_v0 = vld [vmem:[%s7296_s4 + $0xd4] ss:$8 sps:$4 sm:$0xff]   ;;  %v182_v2 = vsel %vm180_vm0, 4294967295, %v5664_v1  ;;  %222 = vmatprep.mubr.bf16.mxu0 %v5665_v3  ;;  %350 = vmatprep.mubr.bf16.mxu1 %v5665_v3  ;;  %v5734_v4 = vld [vmem:[%s7296_s4 + $0xd0] ss:$8 sps:$4 sm:$0xff]   ;;  %v5318_v17 = vld [vmem:[%s7297_s0] sm:$0xff]   ;;  %v264_v19 = vlaneseq }
   0x2   :  { %v183_v5 = vsel %vm181_vm1, %v182_v2, 0  ;;  %326 = vmatprep.subr.bf16.mxu1 %v5726_v0  ;;  %v5306_v6 = vld [vmem:[%s7296_s4 + $0x14] ss:$8 sps:$4 sm:$0x1f]   ;;  %v5744_v7 = vld [vmem:[%s7296_s4 + $0xc4] ss:$8 sps:$4 sm:$0xff]  }
   0x3   :  { %327 = vmatpush1.bf16.msra.mxu1 %v5734_v4  ;;  %v5749_v8 = vld [vmem:[%s7296_s4 + $0xc0] ss:$8 sps:$4 sm:$0xff]   ;;  %v188_v9 = vand.u32 %v5306_v6, %v183_v5  ;;  %v5310_v10 = vld [vmem:[%s7296_s4 + $0x10] ss:$8 sps:$4 sm:$0x1f]   ;;  %vm167_vm2 = vcmask 203776  }
   0x4   :  { %328 = vmatprep.subr.bf16.mxu1 %v5744_v7  ;;  %v5312_v11 = vld [vmem:[%s7296_s4 + $0x4] ss:$8 sps:$4 sm:$0xff]   ;;  %v185_v12 = vand.u32 %v5310_v10, %v183_v5  ;;  %v5761_v13 = vld [vmem:[%s7296_s4 + $0xb4] ss:$8 sps:$4 sm:$0xff]   ;;  %v5316_v14 = vld [vmem:[%s7296_s4] ss:$8 sps:$4 sm:$0xff]  }
   0x5   :  { %202 = vmatprep.subr.bf16.mxu0 %v188_v9  ;;  %v5770_v15 = vld [vmem:[%s7296_s4 + $0xb0] ss:$8 sps:$4 sm:$0xff]   ;;  %v5776_v16 = vld [vmem:[%s7296_s4 + $0xa4] ss:$8 sps:$4 sm:$0xff]   ;;  %v5784_v18 = vld [vmem:[%s7296_s4 + $0xa0] ss:$8 sps:$4 sm:$0xff]  }
   0x6   :  { %203 = vmatpush1.bf16.msra.mxu0 %v185_v12  ;;  %v265_v20 = vshrl.u32 %v264_v19, 7  ;;  %v112_v22 = vld [vmem:[%s7299_s6] ss:$8 sm:$0x3]  ;;  %vm382_vm3 = vcmask 1048064   ;;  %vm314_vm4 = vcmask 523264  }
   0x7   :  { %329 = vmatpush1.bf16.msra.mxu1 %v5749_v8  ;;  %204 = vmatprep.subr.bf16.mxu0 %v5312_v11  ;;  %v5322_v1 = vld [vmem:[%s7297_s0 + $0x8] sm:$0xff]   ;;  %v5323_v5 = vld [vmem:[%s7297_s0 + $0x10] sm:$0xff]   ;;  %v5324_v6 = vld [vmem:[%s7297_s0 + $0x18] sm:$0xff]   ;;  %vm1178_vm5 = vcmask 261120   ;;  %vm1180_vm6 = vcmask 523520   ;;  %vm5668_vm7 = vmmov 0  }
   0x8   :  { %330 = vmatprep.subr.bf16.mxu1 %v5761_v13  ;;  %v5811_v21 = vsub.s32 0, %v265_v20  ;;  %v5820_v34 = vsub.s32 1, %v265_v20  ;;  %vm2009_vm8 = vcmask 64512   ;;  %s5670_s10 = smov 120   ;;  %vm2194_vm11 = vcmask 785408   ;;  %s5671_s19 = smov 16  }
   0x9   :  { %s5672_s25 = smov 112   ;;  %s5676_s30 = smov 24  }
   0xa   :  { %205 = vmatpush1.bf16.msra.mxu0 %v5316_v14  ;;  %v5817_v23 = vrot.slane %v112_v22, %v5811_v21  ;;  %v5823_v35 = vrot.slane %v112_v22, %v5820_v34  ;;  %s5678_s8 = smov 56   ;;  %s5679_s9 = smov 72  }
   0xb   :  { %331 = vmatpush1.bf16.msra.mxu1 %v5770_v15  ;;  %471 = vmatprep.subr.bf16.mxu0 %v5726_v0 }
   0xc   :  { %332 = vmatprep.subr.bf16.mxu1 %v5776_v16 }
   0xd   :  { %4446 = vmatmul.mubr.msk.bf16.vlgmr.msra.gmra.mxu0 %vm167_vm2, %v5318_v17 }
   0xe   :  { %232 = vmatprep.mubr.bf16.mxu0 %v5665_v3  ;;  %472 = vmatpush1.bf16.msra.mxu0 %v5734_v4 }
   0xf   :  { %333 = vmatpush1.bf16.msra.mxu1 %v5784_v18  ;;  %473 = vmatprep.subr.bf16.mxu0 %v5744_v7 }
  0x10   :  { %399 = vmatprep.subr.bf16.mxu1 %v5726_v0 }
  0x12   :  { %351 = vmatmul.mubr.bf16.vlgmr.msra.gmra.mxu1 %v5665_v3  ;;  %474 = vmatpush1.bf16.msra.mxu0 %v5749_v8 }
  0x13   :  { %400 = vmatpush1.bf16.msra.mxu1 %v5734_v4  ;;  %423 = vmatprep.mubr.bf16.mxu1 %v5665_v3 }
  0x14   :  { %401 = vmatprep.subr.bf16.mxu1 %v5744_v7  ;;  %475 = vmatprep.subr.bf16.mxu0 %v5761_v13 }
  0x15   :  { %4447 = vmatmul.mubr.msk.bf16.gmra.mxu0 %vm167_vm2, %v5322_v1 }
  0x16   :  { %476 = vmatpush1.bf16.msra.mxu0 %v5770_v15  ;;  %242 = vmatprep.mubr.bf16.mxu0 %v5665_v3 }
  0x17   :  { %402 = vmatpush1.bf16.msra.mxu1 %v5749_v8  ;;  %477 = vmatprep.subr.bf16.mxu0 %v5776_v16 }
  0x18   :  { %403 = vmatprep.subr.bf16.mxu1 %v5761_v13 }
  0x1a   :  { %478 = vmatpush1.bf16.msra.mxu0 %v5784_v18 }
  0x1b   :  { %404 = vmatpush1.bf16.msra.mxu1 %v5770_v15  ;;  %615 = vmatprep.subr.bf16.mxu0 %v5726_v0 }
  0x1c   :  { %405 = vmatprep.subr.bf16.mxu1 %v5776_v16 }
  0x1d   :  { %4448 = vmatmul.mubr.msk.bf16.gmra.mxu0 %vm167_vm2, %v5323_v5 }
  0x1e   :  { %252 = vmatprep.mubr.bf16.mxu0 %v5665_v3 }
  0x1f   :  { %406 = vmatpush1.bf16.msra.mxu1 %v5784_v18 }
  0x20   :  { %543 = vmatprep.subr.bf16.mxu1 %v5726_v0 }
  0x25   :  { %4449 = vmatmul.mubr.msk.bf16.gmra.mxu0 %vm167_vm2, %v5324_v6 }
  0x26   :  { %495 = vmatprep.mubr.bf16.mxu0 %v5665_v3 }
  0xcd   :  { %v224_v26 = vpop.f32.mrf.mxu0 }
  0xcf   :  { %v226_v39 = vpop.f32.mrf.mxu0 }
  0xd1   :  { %v228_v51 = vpop.f32.mrf.mxu0 }
  0xd2   :  { %v352_v24 = vpop.f32.mrf.mxu1 }
  0xd3   :  { %v353_v25 = vadd.f32 %v352_v24, %v5817_v23  ;;  %v230_v62 = vpop.f32.mrf.mxu0 }
  0xd4   :  { %v354_v27 = vpop.f32.mrf.mxu1 }
  0xd5   :  { %v359_v28 = vadd.f32 %v353_v25, %v224_v26  ;;  %v355_v36 = vadd.f32 %v354_v27, %v5823_v35  ;;  %v234_v20 = vpop.f32.mrf.mxu0 }
  0xd6   :  { %v356_v29 = vpop.f32.mrf.mxu1 }
  0xd7   :  { %v4458_v30 = vmul.f32 -1.442695, %v359_v28  ;;  %v236_v22 = vpop.f32.mrf.mxu0 }
  0xd8   :  { %v357_v31 = vpop.f32.mrf.mxu1 }
  0xd9   :  { %5385 = vpow2.f32 %v4458_v30  ;;  %v238_v24 = vpop.f32.mrf.mxu0 }
  0xdb   :  { %v240_v25 = vpop.f32.mrf.mxu0 }
  0xdd   :  { %v5880_v26 = vpop.f32.mrf.mxu0 }
  0xdf   :  { %v5882_v27 = vpop.f32.mrf.mxu0 }
  0xe1   :  { %v5884_v28 = vpop.f32.mrf.mxu0 }
  0xe3   :  { %v5886_v29 = vpop.f32.mrf.mxu0 }
  0xe5   :  { %v5888_v30 = vpop.f32.mrf.mxu0 }
  0xe6   :  { %v5386_v32 = vpop.eup %5385 }
  0xe7   :  { %v363_v33 = vadd.f32 1.0, %v5386_v32  ;;  %v5890_v31 = vpop.f32.mrf.mxu0 }
  0xe9   :  { %5387 = vrcp.f32 %v363_v33  ;;  %v5892_v32 = vpop.f32.mrf.mxu0 }
  0xeb   :  { %v5894_v33 = vpop.f32.mrf.mxu0 }
  0xf6   :  { %v5388_v37 = vpop.eup %5387 }
  0xf7   :  { %v366_v38 = vmul.f32 %v5388_v37, %v355_v36  ;;  %v369_v42 = vsub.f32 1.0, %v5388_v37  ;;  %v375_v44 = vmul.f32 0.0, %v5388_v37 }
  0xf9   :  { %v367_v40 = vadd.f32 %v366_v38, %v226_v39 }
  0xfb   :  { %5389 = vtanh.f32 %v367_v40 }
 0x108   :  { %v5390_v41 = vpop.eup %5389 }
 0x109   :  { %371 = vrot.lane.b32.xlu0 %v5390_v41, %s5666_s29 }
 0x17b   :  { %v372_v43 = vpop.permute.xlu0 %371 }
 0x17c   :  { %v374_v45 = vmul.f32 %v372_v43, %v369_v42 }
 0x17e   :  { %v5827_v46 = vadd.f32 %v375_v44, %v374_v45 }
 0x180   :  { %v384_v47 = vpack.c.bf16 %v5827_v46, %v5827_v46  ;;  %383 = vst.msk [vmem:[#allocation2 + $0x38] sm:$0xff] %vm382_vm3, %v5827_v46 }
 0x182   :  { %386 = vrot.lane.b32.xlu0 %v384_v47, %s5666_s29 }
 0x1f4   :  { %v387_v48 = vpop.permute.xlu0 %386 }
 0x1f5   :  { %4459 = vmatmul.mubr.msk.bf16.vlgmr.msra.gmra.mxu1 %vm314_vm4, %v387_v48 }
 0x1f6   :  { %544 = vmatpush1.bf16.msra.mxu1 %v5734_v4  ;;  %567 = vmatprep.mubr.bf16.mxu1 %v5665_v3 }
 0x1f7   :  { %545 = vmatprep.subr.bf16.mxu1 %v5744_v7 }
 0x1fa   :  { %546 = vmatpush1.bf16.msra.mxu1 %v5749_v8 }
 0x1fb   :  { %547 = vmatprep.subr.bf16.mxu1 %v5761_v13 }
 0x1fe   :  { %548 = vmatpush1.bf16.msra.mxu1 %v5770_v15 }
 0x1ff   :  { %549 = vmatprep.subr.bf16.mxu1 %v5776_v16 }
 0x202   :  { %550 = vmatpush1.bf16.msra.mxu1 %v5784_v18 }
 0x203   :  { %687 = vmatprep.subr.bf16.mxu1 %v5726_v0 }
 0x2b5   :  { %v425_v49 = vpop.f32.mrf.mxu1 }
 0x2b6   :  { %v426_v50 = vadd.f32 %v425_v49, %v5817_v23 }
 0x2b7   :  { %v427_v52 = vpop.f32.mrf.mxu1 }
 0x2b8   :  { %v432_v53 = vadd.f32 %v426_v50, %v228_v51  ;;  %v428_v59 = vadd.f32 %v427_v52, %v5823_v35 }
 0x2b9   :  { %v429_v54 = vpop.f32.mrf.mxu1 }
 0x2ba   :  { %v4460_v55 = vmul.f32 -1.442695, %v432_v53 }
 0x2bb   :  { %v430_v56 = vpop.f32.mrf.mxu1 }
 0x2bc   :  { %5391 = vpow2.f32 %v4460_v55 }
 0x2c9   :  { %v5392_v57 = vpop.eup %5391 }
 0x2ca   :  { %v436_v58 = vadd.f32 1.0, %v5392_v57 }
 0x2cc   :  { %5393 = vrcp.f32 %v436_v58 }
 0x2d9   :  { %v5394_v60 = vpop.eup %5393 }
 0x2da   :  { %v439_v61 = vmul.f32 %v5394_v60, %v428_v59  ;;  %v442_v9 = vsub.f32 1.0, %v5394_v60  ;;  %v448_v11 = vmul.f32 %v5394_v60, %v5827_v46 }
 0x2dc   :  { %v440_v63 = vadd.f32 %v439_v61, %v230_v62 }
 0x2de   :  { %5395 = vtanh.f32 %v440_v63 }
 0x2eb   :  { %v5396_v2 = vpop.eup %5395 }
 0x2ec   :  { %444 = vrot.lane.b32.xlu1 %v5396_v2, %s5666_s29 }
 0x35e   :  { %v445_v10 = vpop.permute.xlu1 %444 }
 0x35f   :  { %v447_v12 = vmul.f32 %v445_v10, %v442_v9 }
 0x361   :  { %v5863_v14 = vadd.f32 %v448_v11, %v447_v12 }
 0x363   :  { %v456_v17 = vpack.c.bf16 %v5863_v14, %v5863_v14  ;;  %455 = vst.msk [vmem:[#allocation2 + $0x30] sm:$0xff] %vm382_vm3, %v5863_v14 }
 0x365   :  { %458 = vrot.lane.b32.xlu1 %v456_v17, %s5666_s29 }
 0x3d7   :  { %v459_v19 = vpop.permute.xlu1 %458 }
 0x3d8   :  { %4461 = vmatmul.mubr.msk.bf16.vlgmr.msra.gmra.mxu0 %vm314_vm4, %v459_v19 }
 0x3d9   :  { %616 = vmatpush1.bf16.msra.mxu0 %v5734_v4  ;;  %639 = vmatprep.mubr.bf16.mxu0 %v5665_v3 }
 0x3da   :  { %617 = vmatprep.subr.bf16.mxu0 %v5744_v7 }
 0x3dd   :  { %618 = vmatpush1.bf16.msra.mxu0 %v5749_v8 }
 0x3de   :  { %619 = vmatprep.subr.bf16.mxu0 %v5761_v13 }
 0x3e1   :  { %620 = vmatpush1.bf16.msra.mxu0 %v5770_v15 }
 0x3e2   :  { %621 = vmatprep.subr.bf16.mxu0 %v5776_v16 }
 0x3e5   :  { %622 = vmatpush1.bf16.msra.mxu0 %v5784_v18 }
 0x3e6   :  { %759 = vmatprep.subr.bf16.mxu0 %v5726_v0 }
 0x498   :  { %v497_v36 = vpop.f32.mrf.mxu0 }
 0x499   :  { %v498_v37 = vadd.f32 %v497_v36, %v5817_v23 }
 0x49a   :  { %v499_v38 = vpop.f32.mrf.mxu0 }
 0x49b   :  { %v504_v39 = vadd.f32 %v498_v37, %v234_v20  ;;  %v500_v45 = vadd.f32 %v499_v38, %v5823_v35 }
 0x49c   :  { %v501_v40 = vpop.f32.mrf.mxu0 }
 0x49d   :  { %v4462_v41 = vmul.f32 -1.442695, %v504_v39 }
 0x49e   :  { %v502_v42 = vpop.f32.mrf.mxu0 }
 0x49f   :  { %5397 = vpow2.f32 %v4462_v41 }
 0x4ac   :  { %v5398_v43 = vpop.eup %5397 }
 0x4ad   :  { %v508_v44 = vadd.f32 1.0, %v5398_v43 }
 0x4af   :  { %5399 = vrcp.f32 %v508_v44 }
 0x4bc   :  { %v5400_v47 = vpop.eup %5399 }
 0x4bd   :  { %v511_v48 = vmul.f32 %v5400_v47, %v500_v45  ;;  %v514_v51 = vsub.f32 1.0, %v5400_v47  ;;  %v520_v53 = vmul.f32 %v5400_v47, %v5863_v14 }
 0x4bf   :  { %v512_v49 = vadd.f32 %v511_v48, %v236_v22 }
 0x4c1   :  { %5401 = vtanh.f32 %v512_v49 }
 0x4ce   :  { %v5402_v50 = vpop.eup %5401 }
 0x4cf   :  { %516 = vrot.lane.b32.xlu0 %v5402_v50, %s5666_s29 }
 0x541   :  { %v517_v52 = vpop.permute.xlu0 %516 }
 0x542   :  { %v519_v54 = vmul.f32 %v517_v52, %v514_v51 }
 0x544   :  { %v5900_v55 = vadd.f32 %v520_v53, %v519_v54 }
 0x546   :  { %v528_v56 = vpack.c.bf16 %v5900_v55, %v5900_v55  ;;  %527 = vst.msk [vmem:[#allocation2 + $0x28] sm:$0xff] %vm382_vm3, %v5900_v55 }
 0x548   :  { %530 = vrot.lane.b32.xlu1 %v528_v56, %s5666_s29 }
 0x5ba   :  { %v531_v57 = vpop.permute.xlu1 %530 }
 0x5bb   :  { %4463 = vmatmul.mubr.msk.bf16.vlgmr.msra.gmra.mxu1 %vm314_vm4, %v531_v57 }
 0x5bc   :  { %688 = vmatpush1.bf16.msra.mxu1 %v5734_v4  ;;  %711 = vmatprep.mubr.bf16.mxu1 %v5665_v3 }
 0x5bd   :  { %689 = vmatprep.subr.bf16.mxu1 %v5744_v7 }
 0x5c0   :  { %690 = vmatpush1.bf16.msra.mxu1 %v5749_v8 }
 0x5c1   :  { %691 = vmatprep.subr.bf16.mxu1 %v5761_v13 }
 0x5c4   :  { %692 = vmatpush1.bf16.msra.mxu1 %v5770_v15 }
 0x5c5   :  { %693 = vmatprep.subr.bf16.mxu1 %v5776_v16 }
 0x5c8   :  { %694 = vmatpush1.bf16.msra.mxu1 %v5784_v18 }
 0x5c9   :  { %831 = vmatprep.subr.bf16.mxu1 %v5726_v0 }
 0x67b   :  { %v569_v58 = vpop.f32.mrf.mxu1 }
 0x67c   :  { %v570_v59 = vadd.f32 %v569_v58, %v5817_v23 }
 0x67d   :  { %v571_v60 = vpop.f32.mrf.mxu1 }
 0x67e   :  { %v576_v61 = vadd.f32 %v570_v59, %v238_v24  ;;  %v572_v6 = vadd.f32 %v571_v60, %v5823_v35 }
 0x67f   :  { %v573_v62 = vpop.f32.mrf.mxu1 }
 0x680   :  { %v4464_v63 = vmul.f32 -1.442695, %v576_v61 }
 0x681   :  { %v574_v1 = vpop.f32.mrf.mxu1 }
 0x682   :  { %5403 = vpow2.f32 %v4464_v63 }
 0x68f   :  { %v5404_v2 = vpop.eup %5403 }
 0x690   :  { %v580_v5 = vadd.f32 1.0, %v5404_v2 }
 0x692   :  { %5405 = vrcp.f32 %v580_v5 }
 0x69f   :  { %v5406_v9 = vpop.eup %5405 }
 0x6a0   :  { %v583_v10 = vmul.f32 %v5406_v9, %v572_v6  ;;  %v586_v0 = vsub.f32 1.0, %v5406_v9  ;;  %v592_v19 = vmul.f32 %v5406_v9, %v5900_v55 }
 0x6a2   :  { %v584_v11 = vadd.f32 %v583_v10, %v240_v25 }
 0x6a4   :  { %5407 = vtanh.f32 %v584_v11 }
 0x6b1   :  { %v5408_v12 = vpop.eup %5407 }
 0x6b2   :  { %588 = vrot.lane.b32.xlu0 %v5408_v12, %s5666_s29 }
 0x724   :  { %v589_v17 = vpop.permute.xlu0 %588 }
 0x725   :  { %v591_v20 = vmul.f32 %v589_v17, %v586_v0 }
 0x727   :  { %v5921_v22 = vadd.f32 %v592_v19, %v591_v20 }
 0x729   :  { %v600_v24 = vpack.c.bf16 %v5921_v22, %v5921_v22  ;;  %599 = vst.msk [vmem:[#allocation2 + $0x20] sm:$0xff] %vm382_vm3, %v5921_v22 }
 0x72b   :  { %602 = vrot.lane.b32.xlu1 %v600_v24, %s5666_s29 }
 0x79d   :  { %v603_v25 = vpop.permute.xlu1 %602 }
 0x79e   :  { %4465 = vmatmul.mubr.msk.bf16.vlgmr.msra.gmra.mxu0 %vm314_vm4, %v603_v25 }
 0x79f   :  { %760 = vmatpush1.bf16.msra.mxu0 %v5734_v4  ;;  %783 = vmatprep.mubr.bf16.mxu0 %v5665_v3 }
 0x7a0   :  { %761 = vmatprep.subr.bf16.mxu0 %v5744_v7 }
 0x7a3   :  { %762 = vmatpush1.bf16.msra.mxu0 %v5749_v8 }
 0x7a4   :  { %763 = vmatprep.subr.bf16.mxu0 %v5761_v13 }
 0x7a7   :  { %764 = vmatpush1.bf16.msra.mxu0 %v5770_v15 }
 0x7a8   :  { %765 = vmatprep.subr.bf16.mxu0 %v5776_v16 }
 0x7ab   :  { %766 = vmatpush1.bf16.msra.mxu0 %v5784_v18 }
 0x85e   :  { %v641_v36 = vpop.f32.mrf.mxu0 }
 0x85f   :  { %v642_v37 = vadd.f32 %v641_v36, %v5817_v23 }
 0x860   :  { %v643_v38 = vpop.f32.mrf.mxu0 }
 0x861   :  { %v648_v39 = vadd.f32 %v642_v37, %v5880_v26  ;;  %v644_v45 = vadd.f32 %v643_v38, %v5823_v35 }
 0x862   :  { %v645_v40 = vpop.f32.mrf.mxu0 }
 0x863   :  { %v4466_v41 = vmul.f32 -1.442695, %v648_v39 }
 0x864   :  { %v646_v42 = vpop.f32.mrf.mxu0 }
 0x865   :  { %5409 = vpow2.f32 %v4466_v41 }
 0x872   :  { %v5410_v43 = vpop.eup %5409 }
 0x873   :  { %v652_v44 = vadd.f32 1.0, %v5410_v43 }
 0x875   :  { %5411 = vrcp.f32 %v652_v44 }
 0x882   :  { %v5412_v47 = vpop.eup %5411 }
 0x883   :  { %v655_v48 = vmul.f32 %v5412_v47, %v644_v45  ;;  %v658_v51 = vsub.f32 1.0, %v5412_v47  ;;  %v664_v26 = vmul.f32 %v5412_v47, %v5921_v22 }
 0x885   :  { %v656_v49 = vadd.f32 %v655_v48, %v5882_v27  ;;  %v5325_v48 = vld [vmem:[%s7296_s4 + $0x90] ss:$8 sps:$4 sm:$0xff]  }
 0x887   :  { %5413 = vtanh.f32 %v656_v49  ;;  %v5327_v49 = vld [vmem:[%s7296_s4 + $0x94] ss:$8 sps:$4 sm:$0xff]  }
 0x888   :  { %991 = vmatprep.subr.bf16.mxu0 %v5327_v49 }
 0x894   :  { %v5414_v50 = vpop.eup %5413 }
 0x895   :  { %660 = vrot.lane.b32.xlu0 %v5414_v50, %s5666_s29  ;;  %v5998_v50 = vld [vmem:[%s7296_s4 + $0x114] ss:$8 sps:$4 sm:$0xff]  }
 0x907   :  { %v661_v52 = vpop.permute.xlu0 %660 }
 0x908   :  { %v663_v53 = vmul.f32 %v661_v52, %v658_v51  ;;  %v6003_v51 = vld [vmem:[%s7296_s4 + $0x110] ss:$8 sps:$4 sm:$0xff]   ;;  %v5328_v52 = vld [vmem:[%s7296_s4 + $0x80] ss:$8 sps:$4 sm:$0xff]  }
 0x90a   :  { %v5943_v54 = vadd.f32 %v664_v26, %v663_v53  ;;  %v6011_v26 = vld [vmem:[%s7296_s4 + $0x104] ss:$8 sps:$4 sm:$0xff]   ;;  %v5333_v53 = vld [vmem:[%s7296_s4 + $0x74] ss:$8 sps:$4 sm:$0xff]  }
 0x90c   :  { %v672_v56 = vpack.c.bf16 %v5943_v54, %v5943_v54 }
 0x90e   :  { %674 = vrot.lane.b32.xlu1 %v672_v56, %s5666_s29  ;;  %v6021_v56 = vld [vmem:[%s7296_s4 + $0x100] ss:$8 sps:$4 sm:$0xff]  }
 0x980   :  { %v675_v57 = vpop.permute.xlu1 %674 }
 0x981   :  { %4467 = vmatmul.mubr.msk.bf16.vlgmr.msra.gmra.mxu1 %vm314_vm4, %v675_v57  ;;  %v5331_v57 = vld [vmem:[%s7296_s4 + $0x70] ss:$8 sps:$4 sm:$0xff]  }
 0x982   :  { %832 = vmatpush1.bf16.msra.mxu1 %v5734_v4  ;;  %855 = vmatprep.mubr.bf16.mxu1 %v5665_v3 }
 0x983   :  { %833 = vmatprep.subr.bf16.mxu1 %v5744_v7 }
 0x986   :  { %834 = vmatpush1.bf16.msra.mxu1 %v5749_v8 }
 0x987   :  { %835 = vmatprep.subr.bf16.mxu1 %v5761_v13 }
 0x98a   :  { %836 = vmatpush1.bf16.msra.mxu1 %v5770_v15 }
 0x98b   :  { %837 = vmatprep.subr.bf16.mxu1 %v5776_v16 }
 0x98e   :  { %838 = vmatpush1.bf16.msra.mxu1 %v5784_v18 }
 0x98f   :  { %1123 = vmatprep.subr.bf16.mxu1 %v5998_v50 }
 0xa41   :  { %v713_v27 = vpop.f32.mrf.mxu1 }
 0xa42   :  { %v714_v58 = vadd.f32 %v713_v27, %v5817_v23  ;;  %v5339_v27 = vld [vmem:[%s7296_s4 + $0x64] ss:$8 sps:$4 sm:$0xff]  }
 0xa43   :  { %v715_v59 = vpop.f32.mrf.mxu1 }
 0xa44   :  { %v720_v4 = vadd.f32 %v714_v58, %v5884_v28  ;;  %v716_v13 = vadd.f32 %v715_v59, %v5823_v35  ;;  %v5337_v58 = vld [vmem:[%s7296_s4 + $0x60] ss:$8 sps:$4 sm:$0xff]   ;;  %v5345_v59 = vld [vmem:[%s7296_s4 + $0x54] ss:$8 sps:$4 sm:$0xff]  }
 0xa45   :  { %v717_v60 = vpop.f32.mrf.mxu1 }
 0xa46   :  { %v4468_v61 = vmul.f32 -1.442695, %v720_v4  ;;  %v5343_v4 = vld [vmem:[%s7296_s4 + $0x50] ss:$8 sps:$4 sm:$0xff]  }
 0xa47   :  { %v718_v62 = vpop.f32.mrf.mxu1 }
 0xa48   :  { %5415 = vpow2.f32 %v4468_v61 }
 0xa55   :  { %v5416_v7 = vpop.eup %5415 }
 0xa56   :  { %v724_v8 = vadd.f32 1.0, %v5416_v7 }
 0xa58   :  { %5417 = vrcp.f32 %v724_v8 }
 0xa65   :  { %v5418_v15 = vpop.eup %5417 }
 0xa66   :  { %v727_v63 = vmul.f32 %v5418_v15, %v716_v13  ;;  %v730_v1 = vsub.f32 1.0, %v5418_v15  ;;  %v736_v28 = vmul.f32 %v5418_v15, %v5943_v54 }
 0xa68   :  { %v728_v16 = vadd.f32 %v727_v63, %v5886_v29 }
 0xa6a   :  { %5419 = vtanh.f32 %v728_v16 }
 0xa77   :  { %v5420_v18 = vpop.eup %5419 }
 0xa78   :  { %732 = vrot.lane.b32.xlu0 %v5420_v18, %s5666_s29 }
 0xaea   :  { %v733_v2 = vpop.permute.xlu0 %732 }
 0xaeb   :  { %v735_v5 = vmul.f32 %v733_v2, %v730_v1 }
 0xaed   :  { %v5963_v6 = vadd.f32 %v736_v28, %v735_v5  ;;  %v6065_v5 = vld [vmem:[%s7296_s4 + $0xe4] ss:$8 sps:$4 sm:$0xff]  }
 0xaef   :  { %v744_v9 = vpack.c.bf16 %v5963_v6, %v5963_v6 }
 0xaf1   :  { %746 = vrot.lane.b32.xlu1 %v744_v9, %s5666_s29  ;;  %v6070_v9 = vld [vmem:[%s7296_s4 + $0xe0] ss:$8 sps:$4 sm:$0xff]  }
 0xb63   :  { %v747_v10 = vpop.permute.xlu1 %746 }
 0xb64   :  { %4469 = vmatmul.mubr.msk.bf16.vlgmr.msra.gmra.mxu0 %vm314_vm4, %v747_v10  ;;  %v5355_v10 = vld [vmem:[%s7296_s4 + $0x30] ss:$8 sps:$4 sm:$0xff]  }
 0xb65   :  { %1023 = vmatprep.mubr.bf16.mxu0 %v5665_v3  ;;  %992 = vmatpush1.bf16.msra.mxu0 %v5325_v48 }
 0xc24   :  { %v785_v29 = vpop.f32.mrf.mxu0 }
 0xc25   :  { %v786_v11 = vadd.f32 %v785_v29, %v5817_v23  ;;  %v5357_v29 = vld [vmem:[%s7296_s4 + $0x34] ss:$8 sps:$4 sm:$0xff]  }
 0xc26   :  { %v787_v12 = vpop.f32.mrf.mxu0 }
 0xc27   :  { %v792_v0 = vadd.f32 %v786_v11, %v5888_v30  ;;  %v788_v36 = vadd.f32 %v787_v12, %v5823_v35  ;;  %v5360_v11 = vld [vmem:[%s7296_s4 + $0x24] ss:$8 sps:$4 sm:$0xff]   ;;  %v5358_v12 = vld [vmem:[%s7296_s4 + $0x20] ss:$8 sps:$4 sm:$0xff]  }
 0xc28   :  { %v789_v17 = vpop.f32.mrf.mxu0 }
 0xc29   :  { %v4470_v19 = vmul.f32 -1.442695, %v792_v0 }
 0xc2a   :  { %v790_v20 = vpop.f32.mrf.mxu0 }
 0xc2b   :  { %5421 = vpow2.f32 %v4470_v19 }
 0xc38   :  { %v5422_v24 = vpop.eup %5421 }
 0xc39   :  { %v796_v25 = vadd.f32 1.0, %v5422_v24 }
 0xc3b   :  { %5423 = vrcp.f32 %v796_v25 }
 0xc48   :  { %v5424_v37 = vpop.eup %5423 }
 0xc49   :  { %v799_v38 = vmul.f32 %v5424_v37, %v788_v36  ;;  %v802_v41 = vsub.f32 1.0, %v5424_v37  ;;  %v808_v30 = vmul.f32 %v5424_v37, %v5963_v6 }
 0xc4b   :  { %v800_v39 = vadd.f32 %v799_v38, %v5890_v31 }
 0xc4d   :  { %5425 = vtanh.f32 %v800_v39 }
 0xc5a   :  { %v5426_v40 = vpop.eup %5425 }
 0xc5b   :  { %804 = vrot.lane.b32.xlu0 %v5426_v40, %s5666_s29 }
 0xccd   :  { %v805_v42 = vpop.permute.xlu0 %804 }
 0xcce   :  { %v807_v43 = vmul.f32 %v805_v42, %v802_v41 }
 0xcd0   :  { %v5976_v44 = vadd.f32 %v808_v30, %v807_v43  ;;  %v4436_v30 = vld [vmem:[%s7299_s6 + $0x1] ss:$8 sm:$0x3]  ;;  %v4437_v43 = vld [vmem:[%s7299_s6 + $0x2] ss:$8 sm:$0x3] }
 0xcd2   :  { %v816_v45 = vpack.c.bf16 %v5976_v44, %v5976_v44 }
 0xcd4   :  { %818 = vrot.lane.b32.xlu1 %v816_v45, %s5666_s29  ;;  %v6125_v45 = vrot.slane %v4436_v30, %v5811_v21 }
 0xcd8   :  { %378 = vrot.lane.b32.xlu1 %v5827_v46, %s5666_s29  ;;  %v5330_v46 = vld [vmem:[%s7296_s4 + $0x84] ss:$8 sps:$4 sm:$0xff]  }
 0xcd9   :  { %993 = vmatprep.subr.bf16.mxu0 %v5330_v46 }
 0xcda   :  { %994 = vmatpush1.bf16.msra.mxu0 %v5328_v52 }
 0xcdb   :  { %995 = vmatprep.subr.bf16.mxu0 %v5333_v53 }
 0xcde   :  { %996 = vmatpush1.bf16.msra.mxu0 %v5331_v57 }
 0xcdf   :  { %997 = vmatprep.subr.bf16.mxu0 %v5339_v27  ;;  %v6133_v27 = vrot.slane %v4436_v30, %v5820_v34 }
 0xce2   :  { %998 = vmatpush1.bf16.msra.mxu0 %v5337_v58  ;;  %v6136_v58 = vrot.slane %v4437_v43, %v5820_v34 }
 0xce3   :  { %999 = vmatprep.subr.bf16.mxu0 %v5345_v59 }
 0xce6   :  { %1000 = vmatpush1.bf16.msra.mxu0 %v5343_v4 }
 0xd46   :  { %v819_v31 = vpop.permute.xlu1 %818 }
 0xd47   :  { %4471 = vmatmul.mubr.msk.bf16.vlgmr.msra.gmra.mxu1 %vm314_vm4, %v819_v31  ;;  %v6128_v31 = vrot.slane %v4437_v43, %v5811_v21 }
 0xd48   :  { %1147 = vmatprep.mubr.bf16.mxu1 %v5665_v3  ;;  %1124 = vmatpush1.bf16.msra.mxu1 %v6003_v51 }
 0xd49   :  { %1125 = vmatprep.subr.bf16.mxu1 %v6011_v26 }
 0xd4a   :  { %v379_v47 = vpop.permute.xlu1 %378 }
 0xd4b   :  { %381 = vst.msk [vmem:[#allocation2] sm:$0xff] %vm314_vm4, %v379_v47 }
 0xd4c   :  { %1126 = vmatpush1.bf16.msra.mxu1 %v6021_v56 }
 0xe07   :  { %v857_v60 = vpop.f32.mrf.mxu1 }
 0xe08   :  { %v858_v61 = vadd.f32 %v857_v60, %v5817_v23  ;;  %v6047_v23 = vld [vmem:[%s7296_s4 + $0xf4] ss:$8 sps:$4 sm:$0xff]  }
 0xe09   :  { %v859_v62 = vpop.f32.mrf.mxu1  ;;  %1127 = vmatprep.subr.bf16.mxu1 %v6047_v23 }
 0xe0a   :  { %v864_v7 = vadd.f32 %v858_v61, %v5892_v32  ;;  %v860_v18 = vadd.f32 %v859_v62, %v5823_v35  ;;  %v6052_v32 = vld [vmem:[%s7296_s4 + $0xf0] ss:$8 sps:$4 sm:$0xff]   ;;  %v5351_v35 = vld [vmem:[%s7296_s4 + $0x44] ss:$8 sps:$4 sm:$0xff]  }
 0xe0b   :  { %v861_v8 = vpop.f32.mrf.mxu1  ;;  %1128 = vmatpush1.bf16.msra.mxu1 %v6052_v32  ;;  %1001 = vmatprep.subr.bf16.mxu0 %v5351_v35 }
 0xe0c   :  { %v4472_v13 = vmul.f32 -1.442695, %v864_v7  ;;  %1129 = vmatprep.subr.bf16.mxu1 %v6065_v5 }
 0xe0d   :  { %v862_v15 = vpop.f32.mrf.mxu1 }
 0xe0e   :  { %5427 = vpow2.f32 %v4472_v13 }
 0xe0f   :  { %1130 = vmatpush1.bf16.msra.mxu1 %v6070_v9 }
 0xe10   :  { %1197 = vmatprep.subr.bf16.mxu1 %v5998_v50 }
 0xe12   :  { %1148 = vmatmul.mubr.bf16.vlgmr.msra.gmra.mxu1 %v5665_v3 }
 0xe13   :  { %1198 = vmatpush1.bf16.msra.mxu1 %v6003_v51  ;;  %1221 = vmatprep.mubr.bf16.mxu1 %v5665_v3 }
 0xe14   :  { %1199 = vmatprep.subr.bf16.mxu1 %v6011_v26 }
 0xe17   :  { %1200 = vmatpush1.bf16.msra.mxu1 %v6021_v56 }
 0xe18   :  { %1201 = vmatprep.subr.bf16.mxu1 %v6047_v23 }
 0xe1b   :  { %v5428_v63 = vpop.eup %5427  ;;  %1202 = vmatpush1.bf16.msra.mxu1 %v6052_v32 }
 0xe1c   :  { %v868_v16 = vadd.f32 1.0, %v5428_v63  ;;  %1203 = vmatprep.subr.bf16.mxu1 %v6065_v5 }
 0xe1e   :  { %5429 = vrcp.f32 %v868_v16 }
 0xe1f   :  { %1204 = vmatpush1.bf16.msra.mxu1 %v6070_v9 }
 0xe20   :  { %1269 = vmatprep.subr.bf16.mxu1 %v5998_v50 }
 0xe2b   :  { %v5430_v1 = vpop.eup %5429 }
 0xe2c   :  { %v871_v2 = vmul.f32 %v5430_v1, %v860_v18  ;;  %v874_v17 = vsub.f32 1.0, %v5430_v1  ;;  %v880_v20 = vmul.f32 %v5430_v1, %v5976_v44 }
 0xe2e   :  { %v872_v28 = vadd.f32 %v871_v2, %v5894_v33  ;;  %v5349_v33 = vld [vmem:[%s7296_s4 + $0x40] ss:$8 sps:$4 sm:$0xff]  }
 0xe2f   :  { %1002 = vmatpush1.bf16.msra.mxu0 %v5349_v33 }
 0xe30   :  { %5431 = vtanh.f32 %v872_v28  ;;  %1003 = vmatprep.subr.bf16.mxu0 %v5357_v29 }
 0xe33   :  { %1004 = vmatpush1.bf16.msra.mxu0 %v5355_v10 }
 0xe34   :  { %1005 = vmatprep.subr.bf16.mxu0 %v5360_v11 }
 0xe37   :  { %1006 = vmatpush1.bf16.msra.mxu0 %v5358_v12 }
 0xe38   :  { %1341 = vmatprep.subr.bf16.mxu0 %v5998_v50 }
 0xe3d   :  { %v5432_v0 = vpop.eup %5431 }
 0xe3e   :  { %876 = vrot.lane.b32.xlu0 %v5432_v0, %s5666_s29 }
 0xe42   :  { %451 = vrot.lane.b32.xlu0 %v5863_v14, %s5666_s29 }
 0xeb0   :  { %v877_v19 = vpop.permute.xlu0 %876 }
 0xeb1   :  { %v879_v24 = vmul.f32 %v877_v19, %v874_v17 }
 0xeb3   :  { %v6102_v25 = vadd.f32 %v880_v20, %v879_v24 }
 0xeb4   :  { %v452_v36 = vpop.permute.xlu0 %451 }
 0xeb5   :  { %887 = vst.msk [vmem:[#allocation2] sm:$0xff] %vm382_vm3, %v6102_v25 }
 0xeb6   :  { %454 = vst.msk [vmem:[#allocation2 + $0x8] sm:$0xff] %vm314_vm4, %v452_v36 }
 0xeb7   :  { %815 = vst.msk [vmem:[#allocation2 + $0x8] sm:$0xff] %vm382_vm3, %v5976_v44 }
 0xebc   :  { %v888_v14 = vld [vmem:[#allocation2] sm:$0xff] }
 0xebe   :  { %v889_v37 = vld [vmem:[#allocation2 + $0x8] sm:$0xff] }
 0xebf   :  { %v896_v38 = vpack.c.bf16 %v889_v37, %v888_v14 }
 0xec1   :  { %1024 = vmatmul.mubr.bf16.vlgmr.msra.gmra.mxu0 %v896_v38 }
 0xec2   :  { %1033 = vmatprep.mubr.bf16.mxu0 %v5665_v3  ;;  %1342 = vmatpush1.bf16.msra.mxu0 %v6003_v51 }
 0xec3   :  { %1343 = vmatprep.subr.bf16.mxu0 %v6011_v26 }
 0xec6   :  { %1344 = vmatpush1.bf16.msra.mxu0 %v6021_v56 }
 0xec7   :  { %1345 = vmatprep.subr.bf16.mxu0 %v6047_v23 }
 0xeca   :  { %1346 = vmatpush1.bf16.msra.mxu0 %v6052_v32 }
 0xecb   :  { %1347 = vmatprep.subr.bf16.mxu0 %v6065_v5 }
 0xece   :  { %1348 = vmatpush1.bf16.msra.mxu0 %v6070_v9 }
 0xecf   :  { %1485 = vmatprep.subr.bf16.mxu0 %v5998_v50 }
 0xed2   :  { %v1149_v39 = vpop.f32.mrf.mxu1 }
 0xed3   :  { %v1150_v47 = vadd.f32 %v1149_v39, %v6125_v45 }
 0xed4   :  { %v1151_v40 = vpop.f32.mrf.mxu1 }
 0xed5   :  { %v1152_v21 = vadd.f32 %v1151_v40, %v6133_v27 }
 0xed6   :  { %v1153_v41 = vpop.f32.mrf.mxu1 }
 0xed8   :  { %v1154_v42 = vpop.f32.mrf.mxu1 }
 0xf81   :  { %v1025_v48 = vpop.f32.mrf.mxu0 }
 0xf82   :  { %v1026_v49 = vadd.f32 %v1025_v48, %v6128_v31 }
 0xf83   :  { %v1027_v59 = vpop.f32.mrf.mxu0 }
 0xf84   :  { %v1156_v46 = vadd.f32 %v1150_v47, %v1026_v49  ;;  %v1028_v60 = vadd.f32 %v1027_v59, %v6136_v58 }
 0xf86   :  { %v4497_v52 = vmul.f32 -1.442695, %v1156_v46 }
 0xf88   :  { %5433 = vpow2.f32 %v4497_v52 }
 0xf95   :  { %v5434_v53 = vpop.eup %5433 }
 0xf96   :  { %v1160_v57 = vadd.f32 1.0, %v5434_v53 }
 0xf98   :  { %5435 = vrcp.f32 %v1160_v57 }
 0xfa5   :  { %v5436_v4 = vpop.eup %5435 }
 0xfa6   :  { %v1163_v61 = vmul.f32 %v5436_v4, %v1152_v21  ;;  %v1166_v8 = vsub.f32 1.0, %v5436_v4  ;;  %v1172_v15 = vmul.f32 0.0, %v5436_v4 }
 0xfa8   :  { %v1164_v62 = vadd.f32 %v1163_v61, %v1028_v60 }
 0xfaa   :  { %5437 = vtanh.f32 %v1164_v62 }
 0xfb7   :  { %v5438_v7 = vpop.eup %5437 }
 0xfb8   :  { %1168 = vrot.lane.b32.xlu1 %v5438_v7, %s5666_s29 }
0x102a   :  { %v1169_v13 = vpop.permute.xlu1 %1168 }
0x102b   :  { %v1171_v63 = vmul.f32 %v1169_v13, %v1166_v8 }
0x102d   :  { %v6141_v16 = vadd.f32 %v1172_v15, %v1171_v63 }
0x102f   :  { %v1182_v34 = vpack.c.bf16 %v6141_v16, %v6141_v16 }
0x1031   :  { %1184 = vrot.lane.b32.xlu0 %v1182_v34, %s5666_s29 }
0x1035   :  { %523 = vrot.lane.b32.xlu0 %v5900_v55, %s5666_s29  ;;  %v1029_v55 = vpop.f32.mrf.mxu0 }
0x1036   :  { %v1030_v28 = vadd.f32 %v1029_v55, %v6128_v31 }
0x1037   :  { %v1031_v19 = vpop.f32.mrf.mxu0 }
0x1038   :  { %v1032_v36 = vadd.f32 %v1031_v19, %v6136_v58 }
0x10a3   :  { %v1185_v18 = vpop.permute.xlu0 %1184 }
0x10a4   :  { %4498 = vmatmul.mubr.msk.bf16.vlgmr.msra.gmra.mxu1 %vm314_vm4, %v1185_v18 }
0x10a5   :  { %1270 = vmatpush1.bf16.msra.mxu1 %v6003_v51  ;;  %1293 = vmatprep.mubr.bf16.mxu1 %v5665_v3 }
0x10a6   :  { %1271 = vmatprep.subr.bf16.mxu1 %v6011_v26 }
0x10a7   :  { %v524_v1 = vpop.permute.xlu0 %523 }
0x10a8   :  { %526 = vst.msk [vmem:[#allocation2 + $0x10] sm:$0xff] %vm314_vm4, %v524_v1 }
0x10a9   :  { %743 = vst.msk [vmem:[#allocation2 + $0x10] sm:$0xff] %vm382_vm3, %v5963_v6  ;;  %1272 = vmatpush1.bf16.msra.mxu1 %v6021_v56 }
0x10aa   :  { %1273 = vmatprep.subr.bf16.mxu1 %v6047_v23 }
0x10ad   :  { %1274 = vmatpush1.bf16.msra.mxu1 %v6052_v32 }
0x10ae   :  { %1275 = vmatprep.subr.bf16.mxu1 %v6065_v5 }
0x10b1   :  { %1276 = vmatpush1.bf16.msra.mxu1 %v6070_v9 }
0x10b2   :  { %1413 = vmatprep.subr.bf16.mxu1 %v5998_v50 }
0x1164   :  { %v1223_v2 = vpop.f32.mrf.mxu1 }
0x1165   :  { %v1224_v35 = vadd.f32 %v1223_v2, %v6125_v45 }
0x1166   :  { %v1225_v33 = vpop.f32.mrf.mxu1 }
0x1167   :  { %v1230_v10 = vadd.f32 %v1224_v35, %v1030_v28  ;;  %v1226_v20 = vadd.f32 %v1225_v33, %v6133_v27 }
0x1168   :  { %v1227_v29 = vpop.f32.mrf.mxu1 }
0x1169   :  { %v4499_v11 = vmul.f32 -1.442695, %v1230_v10 }
0x116a   :  { %v1228_v12 = vpop.f32.mrf.mxu1 }
0x116b   :  { %5439 = vpow2.f32 %v4499_v11 }
0x1178   :  { %v5440_v0 = vpop.eup %5439 }
0x1179   :  { %v1234_v17 = vadd.f32 1.0, %v5440_v0 }
0x117b   :  { %5441 = vrcp.f32 %v1234_v17 }
0x1188   :  { %v5442_v24 = vpop.eup %5441 }
0x1189   :  { %v1237_v14 = vmul.f32 %v5442_v24, %v1226_v20  ;;  %v1240_v39 = vsub.f32 1.0, %v5442_v24  ;;  %v1246_v41 = vmul.f32 %v5442_v24, %v6141_v16 }
0x118b   :  { %v1238_v37 = vadd.f32 %v1237_v14, %v1032_v36 }
0x118d   :  { %5443 = vtanh.f32 %v1238_v37 }
0x119a   :  { %v5444_v38 = vpop.eup %5443 }
0x119b   :  { %1242 = vrot.lane.b32.xlu1 %v5444_v38, %s5666_s29 }
0x119f   :  { %595 = vrot.lane.b32.xlu1 %v5921_v22, %s5666_s29  ;;  %v890_v22 = vld [vmem:[#allocation2 + $0x10] sm:$0xff] }
0x120d   :  { %v1243_v40 = vpop.permute.xlu1 %1242 }
0x120e   :  { %v1245_v42 = vmul.f32 %v1243_v40, %v1240_v39 }
0x1210   :  { %v6169_v30 = vadd.f32 %v1246_v41, %v1245_v42 }
0x1211   :  { %v596_v43 = vpop.permute.xlu1 %595 }
0x1212   :  { %598 = vst.msk [vmem:[#allocation2 + $0x18] sm:$0xff] %vm314_vm4, %v596_v43  ;;  %v1254_v47 = vpack.c.bf16 %v6169_v30, %v6169_v30 }
0x1213   :  { %671 = vst.msk [vmem:[#allocation2 + $0x18] sm:$0xff] %vm382_vm3, %v5943_v54 }
0x1214   :  { %1256 = vrot.lane.b32.xlu0 %v1254_v47, %s5666_s29 }
0x1218   :  { %667 = vrot.lane.b32.xlu0 %v5943_v54, %s5666_s29 }
0x121a   :  { %v891_v48 = vld [vmem:[#allocation2 + $0x18] sm:$0xff] }
0x121b   :  { %v897_v49 = vpack.c.bf16 %v891_v48, %v890_v22 }
0x121c   :  { %811 = vrot.lane.b32.xlu0 %v5976_v44, %s5666_s29 }
0x121d   :  { %1034 = vmatmul.mubr.bf16.gmra.mxu0 %v897_v49 }
0x121e   :  { %1043 = vmatprep.mubr.bf16.mxu0 %v5665_v3 }
0x1286   :  { %v1257_v46 = vpop.permute.xlu0 %1256 }
0x1287   :  { %4500 = vmatmul.mubr.msk.bf16.vlgmr.msra.gmra.mxu1 %vm314_vm4, %v1257_v46 }
0x1288   :  { %1414 = vmatpush1.bf16.msra.mxu1 %v6003_v51  ;;  %1437 = vmatprep.mubr.bf16.mxu1 %v5665_v3 }
0x1289   :  { %1415 = vmatprep.subr.bf16.mxu1 %v6011_v26 }
0x128a   :  { %v668_v52 = vpop.permute.xlu0 %667 }
0x128b   :  { %670 = vst.msk [vmem:[#allocation2 + $0x20] sm:$0xff] %vm314_vm4, %v668_v52 }
0x128c   :  { %1416 = vmatpush1.bf16.msra.mxu1 %v6021_v56 }
0x128d   :  { %1417 = vmatprep.subr.bf16.mxu1 %v6047_v23 }
0x128e   :  { %v812_v54 = vpop.permute.xlu0 %811 }
0x128f   :  { %814 = vst.msk [vmem:[#allocation2 + $0x30] sm:$0xff] %vm314_vm4, %v812_v54 }
0x1290   :  { %1418 = vmatpush1.bf16.msra.mxu1 %v6052_v32 }
0x1291   :  { %1419 = vmatprep.subr.bf16.mxu1 %v6065_v5 }
0x1294   :  { %1420 = vmatpush1.bf16.msra.mxu1 %v6070_v9 }
0x1295   :  { %1557 = vmatprep.subr.bf16.mxu1 %v5998_v50 }
0x1296   :  { %v894_v19 = vld [vmem:[#allocation2 + $0x30] sm:$0xff] }
0x12dd   :  { %v1035_v44 = vpop.f32.mrf.mxu0 }
0x12de   :  { %v1036_v57 = vadd.f32 %v1035_v44, %v6128_v31 }
0x12df   :  { %v1037_v13 = vpop.f32.mrf.mxu0 }
0x12e0   :  { %v1038_v34 = vadd.f32 %v1037_v13, %v6136_v58 }
0x12e1   :  { %v1039_v36 = vpop.f32.mrf.mxu0 }
0x12e2   :  { %v1040_v48 = vadd.f32 %v1039_v36, %v6128_v31 }
0x12e3   :  { %v1041_v14 = vpop.f32.mrf.mxu0 }
0x1347   :  { %v1295_v53 = vpop.f32.mrf.mxu1 }
0x1348   :  { %v1296_v59 = vadd.f32 %v1295_v53, %v6125_v45 }
0x1349   :  { %v1297_v21 = vpop.f32.mrf.mxu1 }
0x134a   :  { %v1302_v4 = vadd.f32 %v1296_v59, %v1036_v57  ;;  %v1298_v15 = vadd.f32 %v1297_v21, %v6133_v27 }
0x134b   :  { %v1299_v60 = vpop.f32.mrf.mxu1 }
0x134c   :  { %v4501_v61 = vmul.f32 -1.442695, %v1302_v4  ;;  %v1042_v4 = vadd.f32 %v1041_v14, %v6136_v58 }
0x134d   :  { %v1300_v62 = vpop.f32.mrf.mxu1 }
0x134e   :  { %5445 = vpow2.f32 %v4501_v61 }
0x135b   :  { %v5446_v7 = vpop.eup %5445 }
0x135c   :  { %v1306_v8 = vadd.f32 1.0, %v5446_v7 }
0x135e   :  { %5447 = vrcp.f32 %v1306_v8 }
0x136b   :  { %v5448_v63 = vpop.eup %5447 }
0x136c   :  { %v1309_v18 = vmul.f32 %v5448_v63, %v1298_v15  ;;  %v1312_v2 = vsub.f32 1.0, %v5448_v63  ;;  %v1318_v35 = vmul.f32 %v5448_v63, %v6169_v30 }
0x136e   :  { %v1310_v1 = vadd.f32 %v1309_v18, %v1038_v34 }
0x1370   :  { %5449 = vtanh.f32 %v1310_v1 }
0x137d   :  { %v5450_v55 = vpop.eup %5449 }
0x137e   :  { %1314 = vrot.lane.b32.xlu1 %v5450_v55, %s5666_s29 }
0x1382   :  { %739 = vrot.lane.b32.xlu1 %v5963_v6, %s5666_s29  ;;  %v892_v6 = vld [vmem:[#allocation2 + $0x20] sm:$0xff] }
0x1386   :  { %883 = vrot.lane.b32.xlu1 %v6102_v25, %s5666_s29 }
0x13f0   :  { %v1315_v28 = vpop.permute.xlu1 %1314 }
0x13f1   :  { %v1317_v33 = vmul.f32 %v1315_v28, %v1312_v2 }
0x13f3   :  { %v6204_v10 = vadd.f32 %v1318_v35, %v1317_v33 }
0x13f4   :  { %v740_v29 = vpop.permute.xlu1 %739 }
0x13f5   :  { %742 = vst.msk [vmem:[#allocation2 + $0x28] sm:$0xff] %vm314_vm4, %v740_v29  ;;  %v1326_v11 = vpack.c.bf16 %v6204_v10, %v6204_v10 }
0x13f7   :  { %1328 = vrot.lane.b32.xlu0 %v1326_v11, %s5666_s29 }
0x13f8   :  { %v6210_v12 = vpop.permute.xlu1 %883 }
0x13f9   :  { %886 = vst.msk [vmem:[#allocation2 + $0x38] sm:$0xff] %vm314_vm4, %v6210_v12 }
0x13fc   :  { %v893_v25 = vld [vmem:[#allocation2 + $0x28] sm:$0xff] }
0x13fd   :  { %v898_v0 = vpack.c.bf16 %v893_v25, %v892_v6 }
0x13ff   :  { %1044 = vmatmul.mubr.bf16.gmra.mxu0 %v898_v0 }
0x1400   :  { %1053 = vmatprep.mubr.bf16.mxu0 %v5665_v3  ;;  %v895_v17 = vld [vmem:[#allocation2 + $0x38] sm:$0xff] }
0x1401   :  { %v899_v20 = vpack.c.bf16 %v895_v17, %v894_v19 }
0x1407   :  { %1054 = vmatmul.mubr.bf16.gmra.mxu0 %v899_v20 }
0x1408   :  { %1365 = vmatprep.mubr.bf16.mxu0 %v5665_v3 }
0x1469   :  { %v1329_v24 = vpop.permute.xlu0 %1328 }
0x146a   :  { %4502 = vmatmul.mubr.msk.bf16.vlgmr.msra.gmra.mxu0 %vm314_vm4, %v1329_v24 }
0x146b   :  { %1486 = vmatpush1.bf16.msra.mxu0 %v6003_v51  ;;  %1509 = vmatprep.mubr.bf16.mxu0 %v5665_v3 }
0x146c   :  { %1487 = vmatprep.subr.bf16.mxu0 %v6011_v26 }
0x146f   :  { %1488 = vmatpush1.bf16.msra.mxu0 %v6021_v56 }
0x1470   :  { %1489 = vmatprep.subr.bf16.mxu0 %v6047_v23 }
0x1473   :  { %1490 = vmatpush1.bf16.msra.mxu0 %v6052_v32 }
0x1474   :  { %1491 = vmatprep.subr.bf16.mxu0 %v6065_v5 }
0x1477   :  { %1492 = vmatpush1.bf16.msra.mxu0 %v6070_v9 }
0x1478   :  { %1629 = vmatprep.subr.bf16.mxu0 %v5998_v50 }
0x14bf   :  { %v1045_v37 = vpop.f32.mrf.mxu0 }
0x14c0   :  { %v1046_v55 = vadd.f32 %v1045_v37, %v6128_v31 }
0x14c1   :  { %v1047_v38 = vpop.f32.mrf.mxu0 }
0x14c2   :  { %v1048_v19 = vadd.f32 %v1047_v38, %v6136_v58 }
0x14c3   :  { %v6226_v39 = vpop.f32.mrf.mxu0 }
0x14c5   :  { %v6228_v40 = vpop.f32.mrf.mxu0 }
0x14c7   :  { %v6230_v41 = vpop.f32.mrf.mxu0 }
0x14c9   :  { %v6232_v42 = vpop.f32.mrf.mxu0 }
0x14cb   :  { %v6234_v43 = vpop.f32.mrf.mxu0 }
0x14cd   :  { %v6236_v47 = vpop.f32.mrf.mxu0 }
0x152a   :  { %v1367_v22 = vpop.f32.mrf.mxu0 }
0x152b   :  { %v1368_v50 = vadd.f32 %v1367_v22, %v6125_v45 }
0x152c   :  { %v1369_v49 = vpop.f32.mrf.mxu0 }
0x152d   :  { %v1374_v46 = vadd.f32 %v1368_v50, %v1040_v48  ;;  %v1370_v59 = vadd.f32 %v1369_v49, %v6133_v27 }
0x152e   :  { %v1371_v52 = vpop.f32.mrf.mxu0 }
0x152f   :  { %v4503_v54 = vmul.f32 -1.442695, %v1374_v46  ;;  %v1050_v52 = vadd.f32 %v6226_v39, %v6128_v31 }
0x1530   :  { %v1372_v44 = vpop.f32.mrf.mxu0 }
0x1531   :  { %5451 = vpow2.f32 %v4503_v54 }
0x153e   :  { %v5452_v53 = vpop.eup %5451 }
0x153f   :  { %v1378_v57 = vadd.f32 1.0, %v5452_v53 }
0x1541   :  { %5453 = vrcp.f32 %v1378_v57 }
0x154e   :  { %v5454_v21 = vpop.eup %5453 }
0x154f   :  { %v1381_v60 = vmul.f32 %v5454_v21, %v1370_v59  ;;  %v1384_v7 = vsub.f32 1.0, %v5454_v21  ;;  %v1390_v13 = vmul.f32 %v5454_v21, %v6204_v10 }
0x1551   :  { %v1382_v61 = vadd.f32 %v1381_v60, %v1042_v4 }
0x1553   :  { %5455 = vtanh.f32 %v1382_v61 }
0x1560   :  { %v5456_v62 = vpop.eup %5455 }
0x1561   :  { %1386 = vrot.lane.b32.xlu1 %v5456_v62, %s5666_s29 }
0x15d3   :  { %v1387_v8 = vpop.permute.xlu1 %1386 }
0x15d4   :  { %v1389_v15 = vmul.f32 %v1387_v8, %v1384_v7 }
0x15d6   :  { %v6244_v63 = vadd.f32 %v1390_v13, %v1389_v15  ;;  %v1056_v13 = vadd.f32 %v6230_v41, %v6128_v31 }
0x15d8   :  { %v1398_v34 = vpack.c.bf16 %v6244_v63, %v6244_v63 }
0x15da   :  { %1400 = vrot.lane.b32.xlu0 %v1398_v34, %s5666_s29 }
0x164c   :  { %v1401_v18 = vpop.permute.xlu0 %1400 }
0x164d   :  { %4504 = vmatmul.mubr.msk.bf16.vlgmr.msra.gmra.mxu1 %vm314_vm4, %v1401_v18 }
0x164e   :  { %1558 = vmatpush1.bf16.msra.mxu1 %v6003_v51  ;;  %1581 = vmatprep.mubr.bf16.mxu1 %v5665_v3 }
0x164f   :  { %1559 = vmatprep.subr.bf16.mxu1 %v6011_v26 }
0x1652   :  { %1560 = vmatpush1.bf16.msra.mxu1 %v6021_v56 }
0x1653   :  { %1561 = vmatprep.subr.bf16.mxu1 %v6047_v23 }
0x1656   :  { %1562 = vmatpush1.bf16.msra.mxu1 %v6052_v32 }
0x1657   :  { %1563 = vmatprep.subr.bf16.mxu1 %v6065_v5 }
0x165a   :  { %1564 = vmatpush1.bf16.msra.mxu1 %v6070_v9 }
0x170d   :  { %v1439_v1 = vpop.f32.mrf.mxu1 }
0x170e   :  { %v1440_v2 = vadd.f32 %v1439_v1, %v6125_v45 }
0x170f   :  { %v1441_v28 = vpop.f32.mrf.mxu1 }
0x1710   :  { %v1446_v35 = vadd.f32 %v1440_v2, %v1046_v55  ;;  %v1442_v0 = vadd.f32 %v1441_v28, %v6133_v27 }
0x1711   :  { %v1443_v33 = vpop.f32.mrf.mxu1 }
0x1712   :  { %v4505_v29 = vmul.f32 -1.442695, %v1446_v35 }
0x1713   :  { %v1444_v11 = vpop.f32.mrf.mxu1 }
0x1714   :  { %5457 = vpow2.f32 %v4505_v29  ;;  %v1058_v11 = vadd.f32 %v6232_v42, %v6136_v58 }
0x1721   :  { %v5458_v6 = vpop.eup %5457 }
0x1722   :  { %v1450_v25 = vadd.f32 1.0, %v5458_v6 }
0x1724   :  { %5459 = vrcp.f32 %v1450_v25 }
0x1731   :  { %v5460_v17 = vpop.eup %5459 }
0x1732   :  { %v1453_v20 = vmul.f32 %v5460_v17, %v1442_v0  ;;  %v1456_v14 = vsub.f32 1.0, %v5460_v17  ;;  %v1462_v22 = vmul.f32 %v5460_v17, %v6244_v63 }
0x1734   :  { %v1454_v24 = vadd.f32 %v1453_v20, %v1048_v19 }
0x1736   :  { %5461 = vtanh.f32 %v1454_v24 }
0x1743   :  { %v5462_v36 = vpop.eup %5461 }
0x1744   :  { %1458 = vrot.lane.b32.xlu1 %v5462_v36, %s5666_s29 }
0x17b6   :  { %v1459_v37 = vpop.permute.xlu1 %1458 }
0x17b7   :  { %v1461_v48 = vmul.f32 %v1459_v37, %v1456_v14  ;;  %v5667_v37 = vmov 0.0  }
0x17b8   :  { %4800 = vmatprep.subr.bf16.mxu1 %v5667_v37 }
0x17b9   :  { %v6264_v50 = vadd.f32 %v1462_v22, %v1461_v48  ;;  %v5362_v22 = vld [vmem:[%s7296_s4 + $0x1c0] ss:$8 sps:$4 sm:$0xff]   ;;  %v5363_v48 = vld [vmem:[%s7296_s4 + $0x1b0] ss:$8 sps:$4 sm:$0xff]  }
0x17bb   :  { %v1470_v49 = vpack.c.bf16 %v6264_v50, %v6264_v50 }
0x17bd   :  { %1472 = vrot.lane.b32.xlu0 %v1470_v49, %s5666_s29  ;;  %v5365_v49 = vld [vmem:[%s7296_s4 + $0x190] ss:$8 sps:$4 sm:$0xff]  }
0x182f   :  { %v1473_v46 = vpop.permute.xlu0 %1472 }
0x1830   :  { %4506 = vmatmul.mubr.msk.bf16.vlgmr.msra.gmra.mxu0 %vm314_vm4, %v1473_v46  ;;  %v5366_v46 = vld [vmem:[%s7296_s4 + $0x180] ss:$8 sps:$4 sm:$0xff]  }
0x1831   :  { %1630 = vmatpush1.bf16.msra.mxu0 %v6003_v51  ;;  %1653 = vmatprep.mubr.bf16.mxu0 %v5665_v3 }
0x1832   :  { %1631 = vmatprep.subr.bf16.mxu0 %v6011_v26 }
0x1835   :  { %1632 = vmatpush1.bf16.msra.mxu0 %v6021_v56 }
0x1836   :  { %1633 = vmatprep.subr.bf16.mxu0 %v6047_v23 }
0x1839   :  { %1634 = vmatpush1.bf16.msra.mxu0 %v6052_v32 }
0x183a   :  { %1635 = vmatprep.subr.bf16.mxu0 %v6065_v5 }
0x183d   :  { %1636 = vmatpush1.bf16.msra.mxu0 %v6070_v9  ;;  %v1052_v9 = vadd.f32 %v6228_v40, %v6136_v58 }
0x18f0   :  { %v1511_v38 = vpop.f32.mrf.mxu0 }
0x18f1   :  { %v1512_v51 = vadd.f32 %v1511_v38, %v6125_v45 }
0x18f2   :  { %v1513_v54 = vpop.f32.mrf.mxu0 }
0x18f3   :  { %v1518_v3 = vadd.f32 %v1512_v51, %v1050_v52  ;;  %v1514_v32 = vadd.f32 %v1513_v54, %v6133_v27  ;;  %v1060_v52 = vadd.f32 %v6234_v43, %v6128_v31  ;;  %v5368_v31 = vld [vmem:[%s7296_s4 + $0x160] ss:$8 sps:$4 sm:$0xff]  }
0x18f4   :  { %v1515_v44 = vpop.f32.mrf.mxu0  ;;  %v5370_v43 = vld [vmem:[%s7296_s4 + $0x140] ss:$8 sps:$4 sm:$0xff]  }
0x18f5   :  { %v4507_v26 = vmul.f32 -1.442695, %v1518_v3 }
0x18f6   :  { %v1516_v53 = vpop.f32.mrf.mxu0 }
0x18f7   :  { %5463 = vpow2.f32 %v4507_v26 }
0x1904   :  { %v5464_v56 = vpop.eup %5463 }
0x1905   :  { %v1522_v23 = vadd.f32 1.0, %v5464_v56 }
0x1907   :  { %5465 = vrcp.f32 %v1522_v23 }
0x1914   :  { %v5466_v5 = vpop.eup %5465 }
0x1915   :  { %v1525_v57 = vmul.f32 %v5466_v5, %v1514_v32  ;;  %v1528_v21 = vsub.f32 1.0, %v5466_v5  ;;  %v1534_v60 = vmul.f32 %v5466_v5, %v6264_v50 }
0x1917   :  { %v1526_v59 = vadd.f32 %v1525_v57, %v1052_v9  ;;  %v1062_v9 = vadd.f32 %v6236_v47, %v6136_v58  ;;  %v5371_v47 = vld [vmem:[%s7296_s4 + $0x130] ss:$8 sps:$4 sm:$0xff]  }
0x1919   :  { %5467 = vtanh.f32 %v1526_v59 }
0x1926   :  { %v5468_v39 = vpop.eup %5467 }
0x1927   :  { %1530 = vrot.lane.b32.xlu1 %v5468_v39, %s5666_s29  ;;  %v5372_v39 = vld [vmem:[%s7296_s4 + $0x120] ss:$8 sps:$4 sm:$0xff]  }
0x1999   :  { %v1531_v4 = vpop.permute.xlu1 %1530 }
0x199a   :  { %v1533_v61 = vmul.f32 %v1531_v4, %v1528_v21 }
0x199c   :  { %v6286_v62 = vadd.f32 %v1534_v60, %v1533_v61 }
0x199e   :  { %v1542_v7 = vpack.c.bf16 %v6286_v62, %v6286_v62 }
0x19a0   :  { %1544 = vrot.lane.b32.xlu0 %v1542_v7, %s5666_s29 }
0x1a12   :  { %v1545_v8 = vpop.permute.xlu0 %1544 }
0x1a13   :  { %4508 = vmatmul.mubr.msk.bf16.vlgmr.msra.gmra.mxu1 %vm314_vm4, %v1545_v8 }
0x1a14   :  { %4816 = vmatprep.mubr.msk.bf16.mxu1 %vm5668_vm7, %v5667_v37 }
0x1ad3   :  { %v1583_v40 = vpop.f32.mrf.mxu1 }
0x1ad4   :  { %v1584_v15 = vadd.f32 %v1583_v40, %v6125_v45 }
0x1ad5   :  { %v1585_v34 = vpop.f32.mrf.mxu1 }
0x1ad6   :  { %v1590_v18 = vadd.f32 %v1584_v15, %v1056_v13  ;;  %v1586_v33 = vadd.f32 %v1585_v34, %v6133_v27 }
0x1ad7   :  { %v1587_v1 = vpop.f32.mrf.mxu1 }
0x1ad8   :  { %v4509_v55 = vmul.f32 -1.442695, %v1590_v18 }
0x1ad9   :  { %v1588_v2 = vpop.f32.mrf.mxu1 }
0x1ada   :  { %5469 = vpow2.f32 %v4509_v55 }
0x1ae7   :  { %v5470_v28 = vpop.eup %5469 }
0x1ae8   :  { %v1594_v35 = vadd.f32 1.0, %v5470_v28 }
0x1aea   :  { %5471 = vrcp.f32 %v1594_v35 }
0x1af7   :  { %v5472_v29 = vpop.eup %5471 }
0x1af8   :  { %v1597_v6 = vmul.f32 %v5472_v29, %v1586_v33  ;;  %v1600_v0 = vsub.f32 1.0, %v5472_v29  ;;  %v1606_v19 = vmul.f32 %v5472_v29, %v6286_v62 }
0x1afa   :  { %v1598_v25 = vadd.f32 %v1597_v6, %v1058_v11 }
0x1afc   :  { %5473 = vtanh.f32 %v1598_v25 }
0x1b09   :  { %v5474_v41 = vpop.eup %5473 }
0x1b0a   :  { %1602 = vrot.lane.b32.xlu1 %v5474_v41, %s5666_s29 }
0x1b7c   :  { %v1603_v17 = vpop.permute.xlu1 %1602 }
0x1b7d   :  { %v1605_v20 = vmul.f32 %v1603_v17, %v1600_v0  ;;  %v118_v0 = vld [vmem:[%s7299_s6 + $0x4] ss:$0 sm:$0xff]  ;;  %v87_v17 = vld [vmem:[%s7298_s5] sm:$0xf] }
0x1b7f   :  { %v6300_v24 = vadd.f32 %v1606_v19, %v1605_v20 }
0x1b81   :  { %v1614_v36 = vpack.c.bf16 %v6300_v24, %v6300_v24 }
0x1b83   :  { %1616 = vrot.lane.b32.xlu0 %v1614_v36, %s5666_s29  ;;  %v6416_v36 = vsel %vm180_vm0, %v87_v17, 0 }
0x1b87   :  { %1175 = vrot.lane.b32.xlu0 %v6141_v16, %s5666_s29 }
0x1b8b   :  { %1321 = vrot.lane.b32.xlu0 %v6204_v10, %s5666_s29  ;;  %v5361_v10 = vld [vmem:[%s7296_s4 + $0x1d0] ss:$8 sps:$4 sm:$0xff]  }
0x1b8c   :  { %4801 = vmatpush3.bf16.msra.mxu1 %v5361_v10 }
0x1b8d   :  { %4802 = vmatprep.subr.bf16.mxu1 %v5667_v37 }
0x1b8f   :  { %1609 = vrot.lane.b32.xlu0 %v6300_v24, %s5666_s29 }
0x1b90   :  { %4803 = vmatpush3.bf16.msra.mxu1 %v5362_v22 }
0x1b91   :  { %4804 = vmatprep.subr.bf16.mxu1 %v5667_v37 }
0x1b93   :  { %1465 = vrot.lane.b32.xlu0 %v6264_v50, %s5666_s29  ;;  %v5364_v50 = vld [vmem:[%s7296_s4 + $0x1a0] ss:$8 sps:$4 sm:$0xff]  }
0x1b94   :  { %4805 = vmatpush3.bf16.msra.mxu1 %v5363_v48 }
0x1b95   :  { %4806 = vmatprep.subr.bf16.mxu1 %v5667_v37 }
0x1b98   :  { %4807 = vmatpush3.bf16.msra.mxu1 %v5364_v50 }
0x1b99   :  { %4808 = vmatprep.subr.bf16.mxu1 %v5667_v37 }
0x1b9c   :  { %4809 = vmatpush3.bf16.msra.mxu1 %v5365_v49 }
0x1b9d   :  { %4810 = vmatprep.subr.bf16.mxu1 %v5667_v37 }
0x1ba0   :  { %4811 = vmatpush3.bf16.msra.mxu1 %v5366_v46 }
0x1ba1   :  { %4812 = vmatprep.subr.bf16.mxu1 %v5667_v37 }
0x1bf5   :  { %v1617_v42 = vpop.permute.xlu0 %1616 }
0x1bf6   :  { %4510 = vmatmul.mubr.msk.bf16.vlgmr.msra.gmra.mxu0 %vm314_vm4, %v1617_v42 }
0x1bf9   :  { %v1176_v14 = vpop.permute.xlu0 %1175 }
0x1bfa   :  { %1179 = vst.msk [vmem:[#allocation3] sm:$0xff] %vm1178_vm5, %v1176_v14 }
0x1bfb   :  { %1181 = vst.msk [vmem:[#allocation3 + $0x38] sm:$0xff] %vm1180_vm6, %v1176_v14 }
0x1bfd   :  { %v1322_v16 = vpop.permute.xlu0 %1321 }
0x1bfe   :  { %1324 = vst.msk [vmem:[#allocation3 + $0x10] sm:$0xff] %vm1178_vm5, %v1322_v16 }
0x1bff   :  { %1325 = vst.msk [vmem:[#allocation3 + $0x28] sm:$0xff] %vm1180_vm6, %v1322_v16 }
0x1c01   :  { %v1610_v60 = vpop.permute.xlu0 %1609 }
0x1c05   :  { %v1466_v15 = vpop.permute.xlu0 %1465 }
0x1cb6   :  { %v1655_v38 = vpop.f32.mrf.mxu0 }
0x1cb7   :  { %v1656_v51 = vadd.f32 %v1655_v38, %v6125_v45  ;;  %v5367_v45 = vld [vmem:[%s7296_s4 + $0x170] ss:$8 sps:$4 sm:$0xff]   ;;  %v117_v38 = vld [vmem:[%s7299_s6 + $0x3] ss:$0 sm:$0xff] }
0x1cb8   :  { %v1657_v54 = vpop.f32.mrf.mxu0  ;;  %4813 = vmatpush3.bf16.msra.mxu1 %v5367_v45  ;;  %v1890_v45 = vld [vmem:[%s7302_s1 + $0x8] sm:$0xff] }
0x1cb9   :  { %v1662_v3 = vadd.f32 %v1656_v51, %v1060_v52  ;;  %v1658_v32 = vadd.f32 %v1657_v54, %v6133_v27  ;;  %4814 = vmatprep.subr.bf16.mxu1 %v5667_v37  ;;  %v5369_v27 = vld [vmem:[%s7296_s4 + $0x150] ss:$8 sps:$4 sm:$0xff]  }
0x1cba   :  { %v1659_v44 = vpop.f32.mrf.mxu0  ;;  %4820 = vmatprep.subr.bf16.mxu0 %v5369_v27 }
0x1cbb   :  { %v4511_v26 = vmul.f32 -1.442695, %v1662_v3  ;;  %4821 = vmatpush3.bf16.msra.mxu0 %v5369_v27 }
0x1cbc   :  { %v1660_v53 = vpop.f32.mrf.mxu0  ;;  %4815 = vmatpush3.bf16.msra.mxu1 %v5368_v31  ;;  %4822 = vmatprep.subr.bf16.mxu0 %v5370_v43 }
0x1cbd   :  { %5475 = vpow2.f32 %v4511_v26  ;;  %4861 = vmatprep.subr.mxu1 %v5667_v37 }
0x1cbf   :  { %4823 = vmatpush3.bf16.msra.mxu0 %v5370_v43 }
0x1cc0   :  { %4824 = vmatprep.subr.bf16.mxu0 %v5371_v47 }
0x1cc3   :  { %4825 = vmatpush3.bf16.msra.mxu0 %v5371_v47 }
0x1cc4   :  { %4826 = vmatprep.subr.bf16.mxu0 %v5372_v39 }
0x1cc7   :  { %4827 = vmatpush3.bf16.msra.mxu0 %v5372_v39 }
0x1cca   :  { %v5476_v56 = vpop.eup %5475 }
0x1ccb   :  { %v1666_v23 = vadd.f32 1.0, %v5476_v56 }
0x1ccd   :  { %5477 = vrcp.f32 %v1666_v23 }
0x1cda   :  { %v5478_v5 = vpop.eup %5477 }
0x1cdb   :  { %v1669_v57 = vmul.f32 %v5478_v5, %v1658_v32  ;;  %v1672_v21 = vsub.f32 1.0, %v5478_v5 }
0x1cdd   :  { %v1670_v59 = vadd.f32 %v1669_v57, %v1062_v9 }
0x1cdf   :  { %5479 = vtanh.f32 %v1670_v59  ;;  %v1889_v59 = vld [vmem:[%s7302_s1] sm:$0xff] }
0x1cec   :  { %v5480_v58 = vpop.eup %5479 }
0x1ced   :  { %1674 = vrot.lane.b32.xlu1 %v5480_v58, %s5666_s29 }
0x1cf1   :  { %1249 = vrot.lane.b32.xlu1 %v6169_v30, %s5666_s29 }
0x1cf5   :  { %1393 = vrot.lane.b32.xlu1 %v6244_v63, %s5666_s29  ;;  %v1678_v63 = vmul.f32 %v5478_v5, %v6300_v24  ;;  %v2008_v24 = vld [vmem:[%s7301_s2] sm:$0xf] }
0x1d5f   :  { %v1675_v30 = vpop.permute.xlu1 %1674 }
0x1d60   :  { %v1677_v4 = vmul.f32 %v1675_v30, %v1672_v21  ;;  %v6448_v21 = vld [vmem:[%s7298_s5 + $0x30] sm:$0xff]   ;;  %v6455_v30 = vld [vmem:[%s7298_s5 + $0x28] sm:$0xff]  }
0x1d62   :  { %v1679_v61 = vadd.f32 %v1678_v63, %v1677_v4  ;;  %v6462_v63 = vld [vmem:[%s7298_s5 + $0x20] sm:$0xff]   ;;  %v6469_v4 = vld [vmem:[%s7298_s5 + $0x18] sm:$0xff]  }
0x1d63   :  { %v1250_v7 = vpop.permute.xlu1 %1249 }
0x1d64   :  { %v1686_v8 = vsel %vm314_vm4, %v6210_v12, %v1679_v61  ;;  %1252 = vst.msk [vmem:[#allocation3 + $0x8] sm:$0xff] %vm1178_vm5, %v1250_v7  ;;  %1681 = vrot.lane.b32.xlu1 %v1679_v61, %s5666_s29  ;;  %v2085_v12 = vld [vmem:[%s7300_s3] sm:$0xf]  ;;  %v1892_v61 = vld [vmem:[%s7302_s1 + $0x18] sm:$0xff] }
0x1d65   :  { %1253 = vst.msk [vmem:[#allocation3 + $0x30] sm:$0xff] %vm1180_vm6, %v1250_v7  ;;  %v1687_v40 = vpack.c.bf16 %v1686_v8, %v1686_v8  ;;  %1613 = vst.msk [vmem:[#allocation3 + $0x8] sm:$0xff] %vm1180_vm6, %v1610_v60  ;;  %2087 = vrot.lane.b32.xlu0 %v2085_v12, %s5669_s20  ;;  %v6484_v7 = vld [vmem:[%s7298_s5 + $0x10] sm:$0xff]   ;;  %v1893_v8 = vld [vmem:[%s7302_s1 + $0x20] sm:$0xff] }
0x1d66   :  { %1612 = vst.msk [vmem:[#allocation3 + $0x30] sm:$0xff] %vm1178_vm5, %v1610_v60  ;;  %v1891_v60 = vld [vmem:[%s7302_s1 + $0x10] sm:$0xff] }
0x1d67   :  { %4817 = vmatmul.mubr.bf16.vlgmr.msra.gmra.mxu1 %v1687_v40  ;;  %v1394_v13 = vpop.permute.xlu1 %1393  ;;  %v1894_v40 = vld [vmem:[%s7302_s1 + $0x28] sm:$0xf]  ;;  %s5675_s1 = smov 80  }
0x1d68   :  { %1396 = vst.msk [vmem:[#allocation3 + $0x18] sm:$0xff] %vm1178_vm5, %v1394_v13  ;;  %1537 = vrot.lane.b32.xlu1 %v6286_v62, %s5666_s29  ;;  %4863 = vmatprep.mubr.msk.f32.mxu1 %vm5668_vm7, %v5667_v37 }
0x1d69   :  { %1397 = vst.msk [vmem:[#allocation3 + $0x20] sm:$0xff] %vm1180_vm6, %v1394_v13  ;;  %1469 = vst.msk [vmem:[#allocation3 + $0x18] sm:$0xff] %vm1180_vm6, %v1466_v15  ;;  %v6499_v13 = vld [vmem:[%s7298_s5 + $0x8] sm:$0xff]  }
0x1d6a   :  { %1468 = vst.msk [vmem:[#allocation3 + $0x20] sm:$0xff] %vm1178_vm5, %v1466_v15 }
0x1d6c   :  { %v1777_v1 = vld [vmem:[#allocation3 + $0x8] sm:$0xff] }
0x1d6d   :  { %v1782_v25 = vld [vmem:[#allocation3 + $0x30] sm:$0xff] }
0x1d70   :  { %v1779_v2 = vld [vmem:[#allocation3 + $0x18] sm:$0xff] }
0x1d71   :  { %v1780_v35 = vld [vmem:[#allocation3 + $0x20] sm:$0xff] }
0x1dd6   :  { %v1682_v34 = vpop.permute.xlu1 %1681 }
0x1dd7   :  { %1684 = vst.msk [vmem:[#allocation3 + $0x38] sm:$0xff] %vm1178_vm5, %v1682_v34  ;;  %v2088_v31 = vpop.permute.xlu0 %2087 }
0x1dd8   :  { %1685 = vst.msk [vmem:[#allocation3] sm:$0xff] %vm1180_vm6, %v1682_v34 }
0x1dda   :  { %v1538_v62 = vpop.permute.xlu1 %1537 }
0x1ddb   :  { %1540 = vst.msk [vmem:[#allocation3 + $0x28] sm:$0xff] %vm1178_vm5, %v1538_v62 }
0x1ddc   :  { %1541 = vst.msk [vmem:[#allocation3 + $0x10] sm:$0xff] %vm1180_vm6, %v1538_v62 }
0x1dde   :  { %v1783_v6 = vld [vmem:[#allocation3 + $0x38] sm:$0xff] }
0x1ddf   :  { %v1776_v18 = vld [vmem:[#allocation3] sm:$0xff]  ;;  %v1787_v41 = vpack.c.bf16 %v1783_v6, %v1782_v25 }
0x1de0   :  { %v1784_v55 = vpack.c.bf16 %v1777_v1, %v1776_v18 }
0x1de2   :  { %4828 = vmatprep.mubr.msk.bf16.mxu0 %vm314_vm4, %v1784_v55  ;;  %v1781_v33 = vld [vmem:[#allocation3 + $0x28] sm:$0xff] }
0x1de3   :  { %v1778_v28 = vld [vmem:[#allocation3 + $0x10] sm:$0xff]  ;;  %v1786_v11 = vpack.c.bf16 %v1781_v33, %v1780_v35 }
0x1de4   :  { %v1785_v29 = vpack.c.bf16 %v1779_v2, %v1778_v28 }
0x1de6   :  { %4829 = vmatmul.mubr.msk.bf16.vlgmr.msra.gmra.mxu0 %vm314_vm4, %v1785_v29 }
0x1de7   :  { %4832 = vmatprep.mubr.msk.bf16.mxu0 %vm314_vm4, %v1786_v11 }
0x1dee   :  { %4833 = vmatmul.mubr.msk.bf16.gmra.mxu0 %vm314_vm4, %v1787_v41 }
0x1def   :  { %4852 = vmatprep.mubr.msk.f32.mxu0 %vm314_vm4, %v1889_v59 }
0x1e27   :  { %v1770_v19 = vpop.f32.mrf.mxu1 }
0x1e28   :  { %v6410_v20 = vadd.f32 %v1770_v19, %v118_v0 }
0x1e29   :  { %v4818_v42 = vpop.f32.mrf.mxu1 }
0x1e2a   :  { %4862 = vmatpush3.msra.mxu1 %v6410_v20  ;;  %v6518_v42 = vld [vmem:[%s7298_s5 + $0x60] sm:$0xff]  }
0x1e2b   :  { %v1773_v14 = vpop.f32.mrf.mxu1  ;;  %4864 = vmatmul.mubr.msk.f32.vlgmr.msra.gmra.mxu1 %vm2009_vm8, %v2008_v24  ;;  %4866 = vmatprep.subr.bf16.mxu1 %v5667_v37 }
0x1e2c   :  { %4867 = vmatpush3.bf16.msra.mxu1 %v6416_v36  ;;  %4868 = vmatprep.mubr.msk.bf16.mxu1 %vm5668_vm7, %v5667_v37  ;;  %v6525_v14 = vld [vmem:[%s7298_s5 + $0x58] sm:$0xff]  }
0x1e2d   :  { %v4819_v16 = vpop.f32.mrf.mxu1  ;;  %4888 = vmatprep.subr.bf16.mxu1 %v5667_v37 }
0x1e2e   :  { %v6532_v16 = vld [vmem:[%s7298_s5 + $0x50] sm:$0xff]  }
0x1ea6   :  { %v4830_v10 = vpop.f32.mrf.mxu0 }
0x1ea7   :  { %v1867_v56 = vadd.f32 %v4830_v10, %v117_v38  ;;  %v6539_v10 = vld [vmem:[%s7298_s5 + $0x48] sm:$0xff]  }
0x1ea8   :  { %v1858_v22 = vpop.f32.mrf.mxu0 }
0x1ea9   :  { %v1859_v32 = vadd.f32 %v1858_v22, %v117_v38  ;;  %v6546_v22 = vld [vmem:[%s7298_s5 + $0x40] sm:$0xff]  }
0x1eaa   :  { %v4831_v48 = vpop.f32.mrf.mxu0 }
0x1eab   :  { %v1870_v53 = vadd.f32 %v4831_v48, %v117_v38  ;;  %v6553_v48 = vld [vmem:[%s7298_s5 + $0x38] sm:$0xff]  }
0x1eac   :  { %v1861_v50 = vpop.f32.mrf.mxu0 }
0x1ead   :  { %v1862_v23 = vadd.f32 %v1861_v50, %v117_v38  ;;  %v2358_v50 = vld [vmem:[%s7300_s3 + $0x4] sm:$0xf] }
0x1eae   :  { %v4834_v49 = vpop.f32.mrf.mxu0  ;;  %2360 = vrot.lane.b32.xlu0 %v2358_v50, %s5671_s19 }
0x1eaf   :  { %v1883_v3 = vadd.f32 %v4834_v49, %v117_v38 }
0x1eb0   :  { %v1874_v46 = vpop.f32.mrf.mxu0 }
0x1eb1   :  { %v1875_v26 = vadd.f32 %v1874_v46, %v117_v38 }
0x1eb2   :  { %v4835_v52 = vpop.f32.mrf.mxu0 }
0x1eb3   :  { %v1886_v51 = vadd.f32 %v4835_v52, %v117_v38 }
0x1eb4   :  { %v1877_v54 = vpop.f32.mrf.mxu0 }
0x1eb5   :  { %4836 = vmatprep.subr.mxu0 %v1886_v51  ;;  %v1878_v44 = vadd.f32 %v1877_v54, %v117_v38 }
0x1eb6   :  { %4837 = vmatpush3.msra.mxu0 %v1886_v51  ;;  %v6572_v51 = vld [vmem:[%s7299_s6 + $0x5] ss:$0 sm:$0xff] }
0x1eb7   :  { %4838 = vmatprep.subr.mxu0 %v1883_v3 }
0x1eb8   :  { %4839 = vmatpush3.msra.mxu0 %v1883_v3 }
0x1eb9   :  { %4840 = vmatprep.subr.mxu0 %v1878_v44 }
0x1eba   :  { %4841 = vmatpush3.msra.mxu0 %v1878_v44 }
0x1ebb   :  { %4842 = vmatprep.subr.mxu0 %v1875_v26 }
0x1ebc   :  { %4843 = vmatpush3.msra.mxu0 %v1875_v26 }
0x1ebd   :  { %4844 = vmatprep.subr.mxu0 %v1870_v53 }
0x1ebe   :  { %4845 = vmatpush3.msra.mxu0 %v1870_v53 }
0x1ebf   :  { %4846 = vmatprep.subr.mxu0 %v1867_v56 }
0x1ec0   :  { %4847 = vmatpush3.msra.mxu0 %v1867_v56 }
0x1ec1   :  { %4848 = vmatprep.subr.mxu0 %v1862_v23 }
0x1ec2   :  { %4849 = vmatpush3.msra.mxu0 %v1862_v23 }
0x1ec3   :  { %4850 = vmatprep.subr.mxu0 %v1859_v32 }
0x1ec4   :  { %4851 = vmatpush3.msra.mxu0 %v1859_v32 }
0x1ec5   :  { %4872 = vmatprep.subr.bf16.mxu0 %v5667_v37  ;;  %4853 = vmatmul.mubr.msk.f32.vlgmr.msra.gmra.mxu0 %vm314_vm4, %v1890_v45 }
0x1ec6   :  { %4873 = vmatpush3.bf16.msra.mxu0 %v6448_v21  ;;  %4855 = vmatprep.mubr.msk.f32.mxu0 %vm314_vm4, %v1891_v60 }
0x1ec7   :  { %4874 = vmatprep.subr.bf16.mxu0 %v5667_v37 }
0x1ec9   :  { %4856 = vmatmul.mubr.msk.f32.gmra.mxu0 %vm314_vm4, %v1892_v61  ;;  %v6594_v61 = vld [vmem:[%s7299_s6 + $0x6] ss:$0 sm:$0xff] }
0x1eca   :  { %4875 = vmatpush3.bf16.msra.mxu0 %v6455_v30  ;;  %4858 = vmatprep.mubr.msk.f32.mxu0 %vm314_vm4, %v1893_v8 }
0x1ecb   :  { %4876 = vmatprep.subr.bf16.mxu0 %v5667_v37 }
0x1ecd   :  { %4859 = vmatmul.mubr.msk.f32.gmra.mxu0 %vm314_vm4, %v1894_v40 }
0x1ece   :  { %4877 = vmatpush3.bf16.msra.mxu0 %v6462_v63  ;;  %4884 = vmatprep.mubr.msk.bf16.mxu0 %vm5668_vm7, %v5667_v37 }
0x1ecf   :  { %4878 = vmatprep.subr.bf16.mxu0 %v5667_v37 }
0x1ed2   :  { %4879 = vmatpush3.bf16.msra.mxu0 %v6469_v4 }
0x1ed3   :  { %4880 = vmatprep.subr.bf16.mxu0 %v5667_v37 }
0x1ed6   :  { %4881 = vmatpush3.bf16.msra.mxu0 %v6484_v7 }
0x1ed7   :  { %4882 = vmatprep.subr.bf16.mxu0 %v5667_v37 }
0x1eda   :  { %4883 = vmatpush3.bf16.msra.mxu0 %v6499_v13 }
0x1edb   :  { %4904 = vmatprep.subr.bf16.mxu0 %v5667_v37 }
0x1eeb   :  { %v2079_v5 = vpop.f32.mrf.mxu1 }
0x1eec   :  { %v2083_v9 = vmul.f32 1.442695, %v2079_v5 }
0x1eed   :  { %v4865_v57 = vpop.f32.mrf.mxu1 }
0x1eee   :  { %5481 = vpow2.f32 %v2083_v9 }
0x1efb   :  { %v5482_v27 = vpop.eup %5481 }
0x1efc   :  { %v2090_v58 = vmul.f32 %v5482_v27, %v2088_v31 }
0x1efe   :  { %2092 = vrot.lane.b32.xlu1 %v2090_v58, %s5670_s10 }
0x1f70   :  { %v2093_v43 = vpop.permute.xlu1 %2092 }
0x1f71   :  { %v6438_v47 = vadd.f32 %v2093_v43, %v2079_v5 }
0x1f73   :  { %v2096_v39 = vpack.c.bf16 %v6438_v47, %v6438_v47 }
0x1f75   :  { %4869 = vmatmul.mubr.msk.bf16.vlgmr.msra.gmra.mxu1 %vm2009_vm8, %v2096_v39 }
0x1f76   :  { %4900 = vmatprep.mubr.msk.bf16.mxu1 %vm5668_vm7, %v5667_v37  ;;  %4889 = vmatpush3.bf16.msra.mxu1 %v6518_v42 }
0x1f77   :  { %4890 = vmatprep.subr.bf16.mxu1 %v5667_v37 }
0x1f7a   :  { %4891 = vmatpush3.bf16.msra.mxu1 %v6525_v14 }
0x1f7b   :  { %4892 = vmatprep.subr.bf16.mxu1 %v5667_v37 }
0x1f7e   :  { %4893 = vmatpush3.bf16.msra.mxu1 %v6532_v16 }
0x1f7f   :  { %4894 = vmatprep.subr.bf16.mxu1 %v5667_v37 }
0x1f82   :  { %4895 = vmatpush3.bf16.msra.mxu1 %v6539_v10 }
0x1f83   :  { %4896 = vmatprep.subr.bf16.mxu1 %v5667_v37 }
0x1f85   :  { %v6505_v15 = vpop.f32.mrf.mxu0 }
0x1f86   :  { %4897 = vmatpush3.bf16.msra.mxu1 %v6546_v22 }
0x1f87   :  { %v6507_v12 = vpop.f32.mrf.mxu0  ;;  %4898 = vmatprep.subr.bf16.mxu1 %v5667_v37 }
0x1f89   :  { %v6561_v49 = vpop.f32.mrf.mxu0 }
0x1f8a   :  { %4899 = vmatpush3.bf16.msra.mxu1 %v6553_v48 }
0x1f8b   :  { %4910 = vmatprep.subr.bf16.mxu1 %v5667_v37  ;;  %v6563_v46 = vpop.f32.mrf.mxu0 }
0x1f8d   :  { %v6565_v38 = vpop.f32.mrf.mxu0 }
0x1f8f   :  { %v6567_v52 = vpop.f32.mrf.mxu0 }
0x2035   :  { %v2137_v34 = vpop.f32.mrf.mxu1 }
0x2036   :  { %v2138_v62 = vadd.f32 %v2137_v34, %v6507_v12 }
0x2037   :  { %v4870_v18 = vpop.f32.mrf.mxu1 }
0x2038   :  { %v2144_v1 = vmin.f32 %v2138_v62, 20.0  ;;  %vm2143_vm10 = vcmp.gt.f32.partialorder %v2138_v62, 20.0 }
0x2039   :  { %v2140_v55 = vpop.f32.mrf.mxu1 }
0x203a   :  { %v2145_v2 = vmul.f32 1.442695, %v2144_v1 }
0x203b   :  { %v4871_v28 = vpop.f32.mrf.mxu1 }
0x203c   :  { %5483 = vpow2.f32 %v2145_v2 }
0x2049   :  { %v5484_v35 = vpop.eup %5483 }
0x204a   :  { %v2147_v33 = vadd.f32 1.0, %v5484_v35  ;;  %v2150_v29 = vmul.f32 -0.5, %v5484_v35  ;;  %v2153_v6 = vand.u32 2147483647, %v5484_v35 }
0x204c   :  { %5485 = vlog2.f32 %v2147_v33  ;;  %v2151_v11 = vadd.f32 1.0, %v2150_v29  ;;  %vm2154_vm9 = vcmp.lt.f32.partialorder %v2153_v6, 0.0004427343 }
0x204e   :  { %v2152_v0 = vmul.f32 %v5484_v35, %v2151_v11  ;;  %v2361_v35 = vpop.permute.xlu0 %2360 }
0x2059   :  { %v5486_v25 = vpop.eup %5485 }
0x205a   :  { %v2149_v41 = vmul.f32 0.6931472, %v5486_v25 }
0x205c   :  { %v2155_v17 = vsel %vm2154_vm9, %v2152_v0, %v2149_v41 }
0x205d   :  { %v2156_v19 = vsel %vm2143_vm10, %v2138_v62, %v2155_v17  ;;  %v2371_v17 = vrot.slane %v6507_v12, 4 }
0x205e   :  { %v2157_v24 = vpack.c.bf16 %v2156_v19, %v2156_v19 }
0x2060   :  { %4885 = vmatmul.mubr.msk.bf16.vlgmr.msra.gmra.mxu0 %vm2194_vm11, %v2157_v24 }
0x2061   :  { %4905 = vmatpush3.bf16.msra.mxu0 %v6416_v36  ;;  %4906 = vmatprep.mubr.msk.bf16.mxu0 %vm5668_vm7, %v5667_v37 }
0x2062   :  { %4926 = vmatprep.subr.bf16.mxu0 %v5667_v37 }
0x2120   :  { %v2232_v54 = vpop.f32.mrf.mxu0 }
0x2121   :  { %v2233_v3 = vadd.f32 %v2232_v54, %v6572_v51 }
0x2122   :  { %v4886_v44 = vpop.f32.mrf.mxu0 }
0x2123   :  { %v2239_v26 = vmin.f32 %v2233_v3, 20.0  ;;  %vm2238_vm13 = vcmp.gt.f32.partialorder %v2233_v3, 20.0 }
0x2124   :  { %v2235_v53 = vpop.f32.mrf.mxu0 }
0x2125   :  { %v2240_v56 = vmul.f32 1.442695, %v2239_v26 }
0x2126   :  { %v4887_v23 = vpop.f32.mrf.mxu0 }
0x2127   :  { %5487 = vpow2.f32 %v2240_v56 }
0x2134   :  { %v5488_v32 = vpop.eup %5487 }
0x2135   :  { %v2242_v5 = vadd.f32 1.0, %v5488_v32  ;;  %v2245_v9 = vmul.f32 -0.5, %v5488_v32  ;;  %v2248_v59 = vand.u32 2147483647, %v5488_v32 }
0x2137   :  { %5489 = vlog2.f32 %v2242_v5  ;;  %v2246_v57 = vadd.f32 1.0, %v2245_v9  ;;  %vm2249_vm12 = vcmp.lt.f32.partialorder %v2248_v59, 0.0004427343 }
0x2139   :  { %v2247_v27 = vmul.f32 %v5488_v32, %v2246_v57 }
0x2144   :  { %v5490_v45 = vpop.eup %5489 }
0x2145   :  { %v2244_v31 = vmul.f32 0.6931472, %v5490_v45 }
0x2147   :  { %v2250_v58 = vsel %vm2249_vm12, %v2247_v27, %v2244_v31  ;;  %v2558_v27 = vld [vmem:[%s7300_s3 + $0x8] sm:$0xf] }
0x2148   :  { %v2251_v43 = vsel %vm2238_vm13, %v2233_v3, %v2250_v58  ;;  %2560 = vrot.lane.b32.xlu0 %v2558_v27, %s5671_s19  ;;  %v2755_v58 = vld [vmem:[%s7300_s3 + $0xc] sm:$0xf] }
0x2149   :  { %v2252_v39 = vsel %vm314_vm4, %v2251_v43, %v2156_v19  ;;  %v2955_v43 = vld [vmem:[%s7300_s3 + $0x10] sm:$0xf] }
0x214a   :  { %v2253_v60 = vpack.c.bf16 %v2252_v39, %v2252_v39  ;;  %v3152_v39 = vld [vmem:[%s7300_s3 + $0x14] sm:$0xf] }
0x214c   :  { %4901 = vmatmul.mubr.msk.bf16.vlgmr.msra.gmra.mxu1 %vm2194_vm11, %v2253_v60  ;;  %2757 = vrot.lane.b32.xlu0 %v2755_v58, %s5671_s19  ;;  %v3352_v60 = vld [vmem:[%s7300_s3 + $0x18] sm:$0xf] }
0x214d   :  { %4911 = vmatpush3.bf16.msra.mxu1 %v6448_v21  ;;  %4922 = vmatprep.mubr.msk.bf16.mxu1 %vm5668_vm7, %v5667_v37 }
0x214e   :  { %4912 = vmatprep.subr.bf16.mxu1 %v5667_v37 }
0x2150   :  { %2957 = vrot.lane.b32.xlu0 %v2955_v43, %s5671_s19 }
0x2151   :  { %4913 = vmatpush3.bf16.msra.mxu1 %v6455_v30 }
0x2152   :  { %4914 = vmatprep.subr.bf16.mxu1 %v5667_v37 }
0x2154   :  { %3154 = vrot.lane.b32.xlu0 %v3152_v39, %s5671_s19 }
0x2155   :  { %4915 = vmatpush3.bf16.msra.mxu1 %v6462_v63 }
0x2156   :  { %4916 = vmatprep.subr.bf16.mxu1 %v5667_v37 }
0x2158   :  { %3354 = vrot.lane.b32.xlu0 %v3352_v60, %s5671_s19 }
0x2159   :  { %4917 = vmatpush3.bf16.msra.mxu1 %v6469_v4 }
0x215a   :  { %4918 = vmatprep.subr.bf16.mxu1 %v5667_v37 }
0x215d   :  { %4919 = vmatpush3.bf16.msra.mxu1 %v6484_v7 }
0x215e   :  { %4920 = vmatprep.subr.bf16.mxu1 %v5667_v37 }
0x2161   :  { %4921 = vmatpush3.bf16.msra.mxu1 %v6499_v13 }
0x2162   :  { %4942 = vmatprep.subr.bf16.mxu1 %v5667_v37 }
0x21ba   :  { %v2561_v27 = vpop.permute.xlu0 %2560 }
0x220c   :  { %v2327_v8 = vpop.f32.mrf.mxu1 }
0x220d   :  { %v6597_v40 = vadd.f32 %v2327_v8, %v6594_v61  ;;  %v3549_v8 = vld [vmem:[%s7300_s3 + $0x1c] sm:$0xf] }
0x220e   :  { %v4902_v34 = vpop.f32.mrf.mxu1  ;;  %3551 = vrot.lane.b32.xlu0 %v3549_v8, %s5671_s19 }
0x220f   :  { %v4550_v62 = vmul.f32 -1.442695, %v6597_v40  ;;  %v2356_v11 = vmul.f32 0.1, %v6597_v40  ;;  %v3749_v34 = vld [vmem:[%s7300_s3 + $0x20] sm:$0xf] }
0x2210   :  { %v2330_v18 = vpop.f32.mrf.mxu1 }
0x2211   :  { %5491 = vpow2.f32 %v4550_v62  ;;  %v2357_v6 = vadd.f32 %v2356_v11, %v6438_v47  ;;  %v3946_v62 = vld [vmem:[%s7300_s3 + $0x24] sm:$0xf]  ;;  %v4146_v18 = vld [vmem:[%s7300_s3 + $0x28] sm:$0xf] }
0x2212   :  { %v4903_v1 = vpop.f32.mrf.mxu1  ;;  %3751 = vrot.lane.b32.xlu0 %v3749_v34, %s5671_s19 }
0x2213   :  { %v4343_v1 = vld [vmem:[%s7300_s3 + $0x2c] sm:$0xf] }
0x2216   :  { %3948 = vrot.lane.b32.xlu0 %v3946_v62, %s5671_s19 }
0x221a   :  { %4148 = vrot.lane.b32.xlu0 %v4146_v18, %s5671_s19 }
0x221e   :  { %v5492_v55 = vpop.eup %5491  ;;  %4345 = vrot.lane.b32.xlu0 %v4343_v1, %s5671_s19 }
0x221f   :  { %v2336_v2 = vadd.f32 1.0, %v5492_v55 }
0x2221   :  { %5493 = vrcp.f32 %v2336_v2 }
0x222e   :  { %v5494_v28 = vpop.eup %5493 }
0x222f   :  { %v6600_v33 = vmul.f32 0.31622776, %v5494_v28 }
0x2231   :  { %v2363_v29 = vmul.f32 %v2361_v35, %v6600_v33 }
0x2233   :  { %2365 = vrot.lane.b32.xlu1 %v2363_v29, %s5672_s25 }
0x22a5   :  { %v2366_v25 = vpop.permute.xlu1 %2365 }
0x22a6   :  { %v6606_v41 = vadd.f32 %v2366_v25, %v2357_v6 }
0x22a8   :  { %v2369_v0 = vpack.c.bf16 %v6606_v41, %v6606_v41 }
0x22aa   :  { %4907 = vmatmul.mubr.msk.bf16.vlgmr.msra.gmra.mxu0 %vm2009_vm8, %v2369_v0 }
0x22ab   :  { %4927 = vmatpush3.bf16.msra.mxu0 %v6518_v42  ;;  %4938 = vmatprep.mubr.msk.bf16.mxu0 %vm5668_vm7, %v5667_v37 }
0x22ac   :  { %4928 = vmatprep.subr.bf16.mxu0 %v5667_v37 }
0x22af   :  { %4929 = vmatpush3.bf16.msra.mxu0 %v6525_v14 }
0x22b0   :  { %4930 = vmatprep.subr.bf16.mxu0 %v5667_v37 }
0x22b3   :  { %4931 = vmatpush3.bf16.msra.mxu0 %v6532_v16 }
0x22b4   :  { %4932 = vmatprep.subr.bf16.mxu0 %v5667_v37 }
0x22b7   :  { %4933 = vmatpush3.bf16.msra.mxu0 %v6539_v10 }
0x22b8   :  { %4934 = vmatprep.subr.bf16.mxu0 %v5667_v37 }
0x22bb   :  { %4935 = vmatpush3.bf16.msra.mxu0 %v6546_v22 }
0x22bc   :  { %4936 = vmatprep.subr.bf16.mxu0 %v5667_v37 }
0x22bf   :  { %4937 = vmatpush3.bf16.msra.mxu0 %v6553_v48 }
0x22c0   :  { %4948 = vmatprep.subr.bf16.mxu0 %v5667_v37 }
0x236a   :  { %v2410_v19 = vpop.f32.mrf.mxu0 }
0x236b   :  { %v2411_v24 = vadd.f32 %v2410_v19, %v2371_v17 }
0x236c   :  { %v4908_v50 = vpop.f32.mrf.mxu0 }
0x236d   :  { %v2417_v54 = vmin.f32 %v2411_v24, 20.0  ;;  %vm2416_vm15 = vcmp.gt.f32.partialorder %v2411_v24, 20.0 }
0x236e   :  { %v2413_v3 = vpop.f32.mrf.mxu0 }
0x236f   :  { %v2418_v44 = vmul.f32 1.442695, %v2417_v54 }
0x2370   :  { %v4909_v26 = vpop.f32.mrf.mxu0 }
0x2371   :  { %5495 = vpow2.f32 %v2418_v44 }
0x237e   :  { %v5496_v53 = vpop.eup %5495 }
0x237f   :  { %v2420_v56 = vadd.f32 1.0, %v5496_v53  ;;  %v2423_v23 = vmul.f32 -0.5, %v5496_v53  ;;  %v2426_v5 = vand.u32 2147483647, %v5496_v53 }
0x2381   :  { %5497 = vlog2.f32 %v2420_v56  ;;  %v2424_v32 = vadd.f32 1.0, %v2423_v23  ;;  %vm2427_vm14 = vcmp.lt.f32.partialorder %v2426_v5, 0.0004427343 }
0x2383   :  { %v2425_v59 = vmul.f32 %v5496_v53, %v2424_v32 }
0x238e   :  { %v5498_v9 = vpop.eup %5497 }
0x238f   :  { %v2422_v57 = vmul.f32 0.6931472, %v5498_v9 }
0x2391   :  { %v2428_v12 = vsel %vm2427_vm14, %v2425_v59, %v2422_v57 }
0x2392   :  { %v2429_v45 = vsel %vm2416_vm15, %v2411_v24, %v2428_v12 }
0x2393   :  { %v2430_v31 = vpack.c.bf16 %v2429_v45, %v2429_v45 }
0x2395   :  { %4923 = vmatmul.mubr.msk.bf16.vlgmr.msra.gmra.mxu1 %vm2194_vm11, %v2430_v31 }
0x2396   :  { %4943 = vmatpush3.bf16.msra.mxu1 %v6416_v36  ;;  %4944 = vmatprep.mubr.msk.bf16.mxu1 %vm5668_vm7, %v5667_v37 }
0x2397   :  { %4964 = vmatprep.subr.bf16.mxu1 %v5667_v37 }
0x2455   :  { %v2468_v55 = vpop.f32.mrf.mxu1 }
0x2456   :  { %v2469_v2 = vadd.f32 %v2468_v55, %v6572_v51 }
0x2457   :  { %v4924_v28 = vpop.f32.mrf.mxu1 }
0x2458   :  { %v2475_v35 = vmin.f32 %v2469_v2, 20.0  ;;  %vm2474_vm2 = vcmp.gt.f32.partialorder %v2469_v2, 20.0 }
0x2459   :  { %v2471_v29 = vpop.f32.mrf.mxu1 }
0x245a   :  { %v2476_v11 = vmul.f32 1.442695, %v2475_v35 }
0x245b   :  { %v4925_v6 = vpop.f32.mrf.mxu1 }
0x245c   :  { %5499 = vpow2.f32 %v2476_v11 }
0x2469   :  { %v5500_v25 = vpop.eup %5499 }
0x246a   :  { %v2478_v0 = vadd.f32 1.0, %v5500_v25  ;;  %v2481_v17 = vmul.f32 -0.5, %v5500_v25  ;;  %v2484_v24 = vand.u32 2147483647, %v5500_v25 }
0x246c   :  { %5501 = vlog2.f32 %v2478_v0  ;;  %v2482_v19 = vadd.f32 1.0, %v2481_v17  ;;  %vm2485_vm1 = vcmp.lt.f32.partialorder %v2484_v24, 0.0004427343 }
0x246e   :  { %v2483_v3 = vmul.f32 %v5500_v25, %v2482_v19 }
0x2479   :  { %v5502_v50 = vpop.eup %5501 }
0x247a   :  { %v2480_v54 = vmul.f32 0.6931472, %v5502_v50 }
0x247c   :  { %v2486_v44 = vsel %vm2485_vm1, %v2483_v3, %v2480_v54 }
0x247d   :  { %v2487_v26 = vsel %vm2474_vm2, %v2469_v2, %v2486_v44 }
0x247e   :  { %v2488_v53 = vsel %vm314_vm4, %v2487_v26, %v2429_v45 }
0x247f   :  { %v2489_v56 = vpack.c.bf16 %v2488_v53, %v2488_v53 }
0x2481   :  { %4939 = vmatmul.mubr.msk.bf16.vlgmr.msra.gmra.mxu0 %vm2194_vm11, %v2489_v56 }
0x2482   :  { %4949 = vmatpush3.bf16.msra.mxu0 %v6448_v21  ;;  %4960 = vmatprep.mubr.msk.bf16.mxu0 %vm5668_vm7, %v5667_v37 }
0x2483   :  { %4950 = vmatprep.subr.bf16.mxu0 %v5667_v37 }
0x2486   :  { %4951 = vmatpush3.bf16.msra.mxu0 %v6455_v30 }
0x2487   :  { %4952 = vmatprep.subr.bf16.mxu0 %v5667_v37 }
0x248a   :  { %4953 = vmatpush3.bf16.msra.mxu0 %v6462_v63 }
0x248b   :  { %4954 = vmatprep.subr.bf16.mxu0 %v5667_v37 }
0x248e   :  { %4955 = vmatpush3.bf16.msra.mxu0 %v6469_v4 }
0x248f   :  { %4956 = vmatprep.subr.bf16.mxu0 %v5667_v37 }
0x2492   :  { %4957 = vmatpush3.bf16.msra.mxu0 %v6484_v7 }
0x2493   :  { %4958 = vmatprep.subr.bf16.mxu0 %v5667_v37 }
0x2496   :  { %4959 = vmatpush3.bf16.msra.mxu0 %v6499_v13 }
0x2497   :  { %4980 = vmatprep.subr.bf16.mxu0 %v5667_v37 }
0x2541   :  { %v2527_v23 = vpop.f32.mrf.mxu0 }
0x2542   :  { %v6689_v32 = vadd.f32 %v2527_v23, %v6594_v61 }
0x2543   :  { %v4940_v5 = vpop.f32.mrf.mxu0 }
0x2544   :  { %v4554_v9 = vmul.f32 -1.442695, %v6689_v32  ;;  %2541 = vrot.lane.b32.xlu0 %v6689_v32, %s5670_s10  ;;  %v2556_v39 = vmul.f32 0.1, %v6689_v32 }
0x2545   :  { %v2530_v57 = vpop.f32.mrf.mxu0 }
0x2546   :  { %5503 = vpow2.f32 %v4554_v9  ;;  %v2557_v60 = vadd.f32 %v2556_v39, %v6606_v41 }
0x2547   :  { %v4941_v59 = vpop.f32.mrf.mxu0 }
0x2553   :  { %v5504_v12 = vpop.eup %5503 }
0x2554   :  { %v2536_v45 = vadd.f32 1.0, %v5504_v12 }
0x2556   :  { %5505 = vrcp.f32 %v2536_v45 }
0x2563   :  { %v5506_v31 = vpop.eup %5505 }
0x2564   :  { %v6694_v58 = vmul.f32 0.31622776, %v5506_v31 }
0x2566   :  { %v2563_v43 = vmul.f32 %v2561_v27, %v6694_v58 }
0x2568   :  { %2565 = vrot.lane.b32.xlu1 %v2563_v43, %s5672_s25 }
0x25da   :  { %v2566_v8 = vpop.permute.xlu1 %2565 }
0x25db   :  { %v6700_v34 = vadd.f32 %v2566_v8, %v2557_v60 }
0x25dd   :  { %v2569_v62 = vpack.c.bf16 %v6700_v34, %v6700_v34 }
0x25df   :  { %4945 = vmatmul.mubr.msk.bf16.vlgmr.msra.gmra.mxu1 %vm2009_vm8, %v2569_v62 }
0x25e0   :  { %4965 = vmatpush3.bf16.msra.mxu1 %v6518_v42  ;;  %4976 = vmatprep.mubr.msk.bf16.mxu1 %vm5668_vm7, %v5667_v37 }
0x25e1   :  { %4966 = vmatprep.subr.bf16.mxu1 %v5667_v37 }
0x25e4   :  { %4967 = vmatpush3.bf16.msra.mxu1 %v6525_v14 }
0x25e5   :  { %4968 = vmatprep.subr.bf16.mxu1 %v5667_v37 }
0x25e8   :  { %4969 = vmatpush3.bf16.msra.mxu1 %v6532_v16 }
0x25e9   :  { %4970 = vmatprep.subr.bf16.mxu1 %v5667_v37 }
0x25ec   :  { %4971 = vmatpush3.bf16.msra.mxu1 %v6539_v10 }
0x25ed   :  { %4972 = vmatprep.subr.bf16.mxu1 %v5667_v37 }
0x25f0   :  { %4973 = vmatpush3.bf16.msra.mxu1 %v6546_v22 }
0x25f1   :  { %4974 = vmatprep.subr.bf16.mxu1 %v5667_v37 }
0x25f4   :  { %4975 = vmatpush3.bf16.msra.mxu1 %v6553_v48 }
0x25f5   :  { %4986 = vmatprep.subr.bf16.mxu1 %v5667_v37 }
0x269f   :  { %v2607_v18 = vpop.f32.mrf.mxu1 }
0x26a0   :  { %v2608_v1 = vadd.f32 %v6505_v15, %v2607_v18 }
0x26a1   :  { %v4946_v55 = vpop.f32.mrf.mxu1 }
0x26a2   :  { %v2614_v2 = vmin.f32 %v2608_v1, 20.0  ;;  %vm2613_vm6 = vcmp.gt.f32.partialorder %v2608_v1, 20.0 }
0x26a3   :  { %v2610_v28 = vpop.f32.mrf.mxu1 }
0x26a4   :  { %v2615_v35 = vmul.f32 1.442695, %v2614_v2 }
0x26a5   :  { %v4947_v29 = vpop.f32.mrf.mxu1 }
0x26a6   :  { %5507 = vpow2.f32 %v2615_v35 }
0x26b3   :  { %v5508_v11 = vpop.eup %5507 }
0x26b4   :  { %v2617_v6 = vadd.f32 1.0, %v5508_v11  ;;  %v2620_v25 = vmul.f32 -0.5, %v5508_v11  ;;  %v2623_v17 = vand.u32 2147483647, %v5508_v11 }
0x26b6   :  { %5509 = vlog2.f32 %v2617_v6  ;;  %v2621_v0 = vadd.f32 1.0, %v2620_v25  ;;  %vm2624_vm3 = vcmp.lt.f32.partialorder %v2623_v17, 0.0004427343 }
0x26b8   :  { %v2622_v50 = vmul.f32 %v5508_v11, %v2621_v0 }
0x26c3   :  { %v5510_v19 = vpop.eup %5509 }
0x26c4   :  { %v2619_v24 = vmul.f32 0.6931472, %v5510_v19  ;;  %v2758_v19 = vpop.permute.xlu0 %2757 }
0x26c6   :  { %v2625_v54 = vsel %vm2624_vm3, %v2622_v50, %v2619_v24 }
0x26c7   :  { %v2626_v3 = vsel %vm2613_vm6, %v2608_v1, %v2625_v54 }
0x26c8   :  { %v2627_v44 = vpack.c.bf16 %v2626_v3, %v2626_v3 }
0x26ca   :  { %4961 = vmatmul.mubr.msk.bf16.vlgmr.msra.gmra.mxu0 %vm2194_vm11, %v2627_v44 }
0x26cb   :  { %4981 = vmatpush3.bf16.msra.mxu0 %v6416_v36  ;;  %4982 = vmatprep.mubr.msk.bf16.mxu0 %vm5668_vm7, %v5667_v37 }
0x26cc   :  { %5002 = vmatprep.subr.bf16.mxu0 %v5667_v37 }
0x278a   :  { %v2665_v26 = vpop.f32.mrf.mxu0 }
0x278b   :  { %v2666_v53 = vadd.f32 %v2665_v26, %v6572_v51 }
0x278c   :  { %v4962_v56 = vpop.f32.mrf.mxu0 }
0x278d   :  { %v2672_v23 = vmin.f32 %v2666_v53, 20.0  ;;  %vm2671_vm10 = vcmp.gt.f32.partialorder %v2666_v53, 20.0 }
0x278e   :  { %v2668_v5 = vpop.f32.mrf.mxu0 }
0x278f   :  { %v2673_v9 = vmul.f32 1.442695, %v2672_v23 }
0x2790   :  { %v4963_v57 = vpop.f32.mrf.mxu0 }
0x2791   :  { %5511 = vpow2.f32 %v2673_v9 }
0x279e   :  { %v5512_v59 = vpop.eup %5511 }
0x279f   :  { %v2675_v12 = vadd.f32 1.0, %v5512_v59  ;;  %v2678_v45 = vmul.f32 -0.5, %v5512_v59  ;;  %v2681_v27 = vand.u32 2147483647, %v5512_v59 }
0x27a1   :  { %5513 = vlog2.f32 %v2675_v12  ;;  %v2679_v31 = vadd.f32 1.0, %v2678_v45  ;;  %vm2682_vm9 = vcmp.lt.f32.partialorder %v2681_v27, 0.0004427343 }
0x27a3   :  { %v2680_v60 = vmul.f32 %v5512_v59, %v2679_v31 }
0x27ae   :  { %v5514_v43 = vpop.eup %5513 }
0x27af   :  { %v2677_v39 = vmul.f32 0.6931472, %v5514_v43 }
0x27b1   :  { %v2683_v8 = vsel %vm2682_vm9, %v2680_v60, %v2677_v39 }
0x27b2   :  { %v2684_v62 = vsel %vm2671_vm10, %v2666_v53, %v2683_v8  ;;  %v2768_v53 = vrot.slane %v6505_v15, 4 }
0x27b3   :  { %v2685_v18 = vsel %vm314_vm4, %v2684_v62, %v2626_v3 }
0x27b4   :  { %v2686_v1 = vpack.c.bf16 %v2685_v18, %v2685_v18 }
0x27b6   :  { %4977 = vmatmul.mubr.msk.bf16.vlgmr.msra.gmra.mxu1 %vm2194_vm11, %v2686_v1 }
0x27b7   :  { %4987 = vmatpush3.bf16.msra.mxu1 %v6448_v21  ;;  %4998 = vmatprep.mubr.msk.bf16.mxu1 %vm5668_vm7, %v5667_v37 }
0x27b8   :  { %4988 = vmatprep.subr.bf16.mxu1 %v5667_v37 }
0x27bb   :  { %4989 = vmatpush3.bf16.msra.mxu1 %v6455_v30 }
0x27bc   :  { %4990 = vmatprep.subr.bf16.mxu1 %v5667_v37 }
0x27bf   :  { %4991 = vmatpush3.bf16.msra.mxu1 %v6462_v63 }
0x27c0   :  { %4992 = vmatprep.subr.bf16.mxu1 %v5667_v37 }
0x27c3   :  { %4993 = vmatpush3.bf16.msra.mxu1 %v6469_v4 }
0x27c4   :  { %4994 = vmatprep.subr.bf16.mxu1 %v5667_v37 }
0x27c7   :  { %4995 = vmatpush3.bf16.msra.mxu1 %v6484_v7 }
0x27c8   :  { %4996 = vmatprep.subr.bf16.mxu1 %v5667_v37 }
0x27cb   :  { %4997 = vmatpush3.bf16.msra.mxu1 %v6499_v13 }
0x27cc   :  { %5018 = vmatprep.subr.bf16.mxu1 %v5667_v37 }
0x2876   :  { %v2724_v55 = vpop.f32.mrf.mxu1 }
0x2877   :  { %v6743_v2 = vadd.f32 %v2724_v55, %v6594_v61 }
0x2878   :  { %v4978_v28 = vpop.f32.mrf.mxu1 }
0x2879   :  { %v4558_v35 = vmul.f32 -1.442695, %v6743_v2  ;;  %v2753_v50 = vmul.f32 0.1, %v6743_v2 }
0x287a   :  { %v2727_v29 = vpop.f32.mrf.mxu1 }
0x287b   :  { %5515 = vpow2.f32 %v4558_v35  ;;  %v2754_v54 = vadd.f32 %v2753_v50, %v6700_v34 }
0x287c   :  { %v4979_v11 = vpop.f32.mrf.mxu1 }
0x2888   :  { %v5516_v6 = vpop.eup %5515 }
0x2889   :  { %v2733_v25 = vadd.f32 1.0, %v5516_v6 }
0x288b   :  { %5517 = vrcp.f32 %v2733_v25 }
0x2898   :  { %v5518_v0 = vpop.eup %5517 }
0x2899   :  { %v6746_v17 = vmul.f32 0.31622776, %v5518_v0 }
0x289b   :  { %v2760_v24 = vmul.f32 %v2758_v19, %v6746_v17 }
0x289d   :  { %2762 = vrot.lane.b32.xlu1 %v2760_v24, %s5672_s25 }
0x290f   :  { %v2763_v3 = vpop.permute.xlu1 %2762 }
0x2910   :  { %v6752_v44 = vadd.f32 %v2763_v3, %v2754_v54 }
0x2912   :  { %v2766_v26 = vpack.c.bf16 %v6752_v44, %v6752_v44 }
0x2914   :  { %4983 = vmatmul.mubr.msk.bf16.vlgmr.msra.gmra.mxu0 %vm2009_vm8, %v2766_v26 }
0x2915   :  { %5003 = vmatpush3.bf16.msra.mxu0 %v6518_v42  ;;  %5014 = vmatprep.mubr.msk.bf16.mxu0 %vm5668_vm7, %v5667_v37 }
0x2916   :  { %5004 = vmatprep.subr.bf16.mxu0 %v5667_v37 }
0x2919   :  { %5005 = vmatpush3.bf16.msra.mxu0 %v6525_v14 }
0x291a   :  { %5006 = vmatprep.subr.bf16.mxu0 %v5667_v37 }
0x291d   :  { %5007 = vmatpush3.bf16.msra.mxu0 %v6532_v16 }
0x291e   :  { %5008 = vmatprep.subr.bf16.mxu0 %v5667_v37 }
0x2921   :  { %5009 = vmatpush3.bf16.msra.mxu0 %v6539_v10 }
0x2922   :  { %5010 = vmatprep.subr.bf16.mxu0 %v5667_v37 }
0x2925   :  { %5011 = vmatpush3.bf16.msra.mxu0 %v6546_v22 }
0x2926   :  { %5012 = vmatprep.subr.bf16.mxu0 %v5667_v37 }
0x2929   :  { %5013 = vmatpush3.bf16.msra.mxu0 %v6553_v48 }
0x292a   :  { %5024 = vmatprep.subr.bf16.mxu0 %v5667_v37 }
0x29d4   :  { %v2807_v56 = vpop.f32.mrf.mxu0 }
0x29d5   :  { %v2808_v23 = vadd.f32 %v2807_v56, %v2768_v53 }
0x29d6   :  { %v4984_v5 = vpop.f32.mrf.mxu0 }
0x29d7   :  { %v2814_v9 = vmin.f32 %v2808_v23, 20.0  ;;  %vm2813_vm13 = vcmp.gt.f32.partialorder %v2808_v23, 20.0 }
0x29d8   :  { %v2810_v57 = vpop.f32.mrf.mxu0 }
0x29d9   :  { %v2815_v59 = vmul.f32 1.442695, %v2814_v9 }
0x29da   :  { %v4985_v12 = vpop.f32.mrf.mxu0 }
0x29db   :  { %5519 = vpow2.f32 %v2815_v59 }
0x29e8   :  { %v5520_v45 = vpop.eup %5519 }
0x29e9   :  { %v2817_v31 = vadd.f32 1.0, %v5520_v45  ;;  %v2820_v27 = vmul.f32 -0.5, %v5520_v45  ;;  %v2823_v39 = vand.u32 2147483647, %v5520_v45 }
0x29eb   :  { %5521 = vlog2.f32 %v2817_v31  ;;  %v2821_v43 = vadd.f32 1.0, %v2820_v27  ;;  %vm2824_vm12 = vcmp.lt.f32.partialorder %v2823_v39, 0.0004427343 }
0x29ed   :  { %v2822_v62 = vmul.f32 %v5520_v45, %v2821_v43 }
0x29f8   :  { %v5522_v60 = vpop.eup %5521 }
0x29f9   :  { %v2819_v8 = vmul.f32 0.6931472, %v5522_v60  ;;  %v2958_v60 = vpop.permute.xlu0 %2957 }
0x29fb   :  { %v2825_v15 = vsel %vm2824_vm12, %v2822_v62, %v2819_v8 }
0x29fc   :  { %v2826_v18 = vsel %vm2813_vm13, %v2808_v23, %v2825_v15 }
0x29fd   :  { %v2827_v1 = vpack.c.bf16 %v2826_v18, %v2826_v18 }
0x29ff   :  { %4999 = vmatmul.mubr.msk.bf16.vlgmr.msra.gmra.mxu1 %vm2194_vm11, %v2827_v1 }
0x2a00   :  { %5019 = vmatpush3.bf16.msra.mxu1 %v6416_v36  ;;  %5020 = vmatprep.mubr.msk.bf16.mxu1 %vm5668_vm7, %v5667_v37 }
0x2a01   :  { %5040 = vmatprep.subr.bf16.mxu1 %v5667_v37 }
0x2abf   :  { %v2865_v55 = vpop.f32.mrf.mxu1 }
0x2ac0   :  { %v2866_v28 = vadd.f32 %v2865_v55, %v6572_v51 }
0x2ac1   :  { %v5000_v35 = vpop.f32.mrf.mxu1 }
0x2ac2   :  { %v2872_v29 = vmin.f32 %v2866_v28, 20.0  ;;  %vm2871_vm15 = vcmp.gt.f32.partialorder %v2866_v28, 20.0 }
0x2ac3   :  { %v2868_v11 = vpop.f32.mrf.mxu1 }
0x2ac4   :  { %v2873_v6 = vmul.f32 1.442695, %v2872_v29 }
0x2ac5   :  { %v5001_v25 = vpop.f32.mrf.mxu1 }
0x2ac6   :  { %5523 = vpow2.f32 %v2873_v6 }
0x2ad3   :  { %v5524_v0 = vpop.eup %5523 }
0x2ad4   :  { %v2875_v19 = vadd.f32 1.0, %v5524_v0  ;;  %v2878_v24 = vmul.f32 -0.5, %v5524_v0  ;;  %v2881_v54 = vand.u32 2147483647, %v5524_v0 }
0x2ad6   :  { %5525 = vlog2.f32 %v2875_v19  ;;  %v2879_v50 = vadd.f32 1.0, %v2878_v24  ;;  %vm2882_vm14 = vcmp.lt.f32.partialorder %v2881_v54, 0.0004427343 }
0x2ad8   :  { %v2880_v53 = vmul.f32 %v5524_v0, %v2879_v50 }
0x2ae3   :  { %v5526_v3 = vpop.eup %5525 }
0x2ae4   :  { %v2877_v26 = vmul.f32 0.6931472, %v5526_v3 }
0x2ae6   :  { %v2883_v56 = vsel %vm2882_vm14, %v2880_v53, %v2877_v26 }
0x2ae7   :  { %v2884_v23 = vsel %vm2871_vm15, %v2866_v28, %v2883_v56 }
0x2ae8   :  { %v2885_v5 = vsel %vm314_vm4, %v2884_v23, %v2826_v18 }
0x2ae9   :  { %v2886_v9 = vpack.c.bf16 %v2885_v5, %v2885_v5 }
0x2aeb   :  { %5015 = vmatmul.mubr.msk.bf16.vlgmr.msra.gmra.mxu0 %vm2194_vm11, %v2886_v9 }
0x2aec   :  { %5025 = vmatpush3.bf16.msra.mxu0 %v6448_v21  ;;  %5036 = vmatprep.mubr.msk.bf16.mxu0 %vm5668_vm7, %v5667_v37  ;;  %v2547_v21 = vmul.f32 2.0, %v6694_v58 }
0x2aed   :  { %5026 = vmatprep.subr.bf16.mxu0 %v5667_v37 }
0x2af0   :  { %5027 = vmatpush3.bf16.msra.mxu0 %v6455_v30  ;;  %v2548_v30 = vmul.f32 %v2547_v21, %v6694_v58 }
0x2af1   :  { %5028 = vmatprep.subr.bf16.mxu0 %v5667_v37 }
0x2af2   :  { %5527 = vrcp.f32 %v2548_v30 }
0x2af4   :  { %5029 = vmatpush3.bf16.msra.mxu0 %v6462_v63  ;;  %v2744_v63 = vmul.f32 2.0, %v6746_v17 }
0x2af5   :  { %5030 = vmatprep.subr.bf16.mxu0 %v5667_v37 }
0x2af6   :  { %v2745_v57 = vmul.f32 %v2744_v63, %v6746_v17 }
0x2af8   :  { %5031 = vmatpush3.bf16.msra.mxu0 %v6469_v4  ;;  %5529 = vrcp.f32 %v2745_v57 }
0x2af9   :  { %5032 = vmatprep.subr.bf16.mxu0 %v5667_v37 }
0x2afc   :  { %5033 = vmatpush3.bf16.msra.mxu0 %v6484_v7 }
0x2afd   :  { %5034 = vmatprep.subr.bf16.mxu0 %v5667_v37 }
0x2aff   :  { %v5528_v45 = vpop.eup %5527 }
0x2b00   :  { %5035 = vmatpush3.bf16.msra.mxu0 %v6499_v13 }
0x2b01   :  { %5056 = vmatprep.subr.bf16.mxu0 %v5667_v37 }
0x2b05   :  { %v5530_v31 = vpop.eup %5529 }
0x2bab   :  { %v2924_v4 = vpop.f32.mrf.mxu0 }
0x2bac   :  { %v6799_v59 = vadd.f32 %v2924_v4, %v6594_v61 }
0x2bad   :  { %v5016_v7 = vpop.f32.mrf.mxu0 }
0x2bae   :  { %v4562_v12 = vmul.f32 -1.442695, %v6799_v59  ;;  %2938 = vrot.lane.b32.xlu0 %v6799_v59, %s5670_s10  ;;  %v2953_v1 = vmul.f32 0.1, %v6799_v59 }
0x2baf   :  { %v2927_v13 = vpop.f32.mrf.mxu0 }
0x2bb0   :  { %5531 = vpow2.f32 %v4562_v12  ;;  %v2954_v55 = vadd.f32 %v2953_v1, %v6752_v44  ;;  %v6878_v1 = vld [vmem:[%s7298_s5 + $0x8] sm:$0xff]  }
0x2bb1   :  { %v5017_v58 = vpop.f32.mrf.mxu0 }
0x2bb2   :  { %2551 = vrot.lane.b32.xlu0 %v5528_v45, %s5672_s25 }
0x2bb6   :  { %2748 = vrot.lane.b32.xlu0 %v5530_v31, %s5672_s25 }
0x2bbd   :  { %v5532_v17 = vpop.eup %5531 }
0x2bbe   :  { %v2933_v27 = vadd.f32 1.0, %v5532_v17 }
0x2bc0   :  { %5533 = vrcp.f32 %v2933_v27 }
0x2bcd   :  { %v5534_v43 = vpop.eup %5533 }
0x2bce   :  { %v2936_v39 = vmul.f32 0.31622776, %v5534_v43 }
0x2bd0   :  { %v2944_v8 = vmul.f32 2.0, %v2936_v39  ;;  %v2960_v62 = vmul.f32 %v2958_v60, %v2936_v39  ;;  %v6841_v60 = vld [vmem:[%s7298_s5 + $0x30] sm:$0xff]  }
0x2bd2   :  { %v2945_v15 = vmul.f32 %v2944_v8, %v2936_v39  ;;  %2962 = vrot.lane.b32.xlu1 %v2960_v62, %s5672_s25  ;;  %v6850_v8 = vld [vmem:[%s7298_s5 + $0x28] sm:$0xff]   ;;  %v6857_v62 = vld [vmem:[%s7298_s5 + $0x20] sm:$0xff]  }
0x2bd4   :  { %5535 = vrcp.f32 %v2945_v15  ;;  %v6864_v15 = vld [vmem:[%s7298_s5 + $0x18] sm:$0xff]  }
0x2be1   :  { %v5536_v18 = vpop.eup %5535 }
0x2be2   :  { %2948 = vrot.lane.b32.xlu0 %v5536_v18, %s5672_s25  ;;  %v6871_v18 = vld [vmem:[%s7298_s5 + $0x10] sm:$0xff]  }
0x2c44   :  { %v2963_v28 = vpop.permute.xlu1 %2962 }
0x2c45   :  { %v6810_v35 = vadd.f32 %v2963_v28, %v2954_v55 }
0x2c47   :  { %v2966_v29 = vpack.c.bf16 %v6810_v35, %v6810_v35 }
0x2c49   :  { %5021 = vmatmul.mubr.msk.bf16.vlgmr.msra.gmra.mxu1 %vm2009_vm8, %v2966_v29 }
0x2c4a   :  { %5041 = vmatpush3.bf16.msra.mxu1 %v6518_v42  ;;  %5052 = vmatprep.mubr.msk.bf16.mxu1 %vm5668_vm7, %v5667_v37 }
0x2c4b   :  { %5042 = vmatprep.subr.bf16.mxu1 %v5667_v37 }
0x2c4e   :  { %5043 = vmatpush3.bf16.msra.mxu1 %v6525_v14 }
0x2c4f   :  { %5044 = vmatprep.subr.bf16.mxu1 %v5667_v37 }
0x2c52   :  { %5045 = vmatpush3.bf16.msra.mxu1 %v6532_v16 }
0x2c53   :  { %5046 = vmatprep.subr.bf16.mxu1 %v5667_v37 }
0x2c56   :  { %5047 = vmatpush3.bf16.msra.mxu1 %v6539_v10 }
0x2c57   :  { %5048 = vmatprep.subr.bf16.mxu1 %v5667_v37 }
0x2c5a   :  { %5049 = vmatpush3.bf16.msra.mxu1 %v6546_v22 }
0x2c5b   :  { %5050 = vmatprep.subr.bf16.mxu1 %v5667_v37 }
0x2c5e   :  { %5051 = vmatpush3.bf16.msra.mxu1 %v6553_v48 }
0x2c5f   :  { %5062 = vmatprep.subr.bf16.mxu1 %v5667_v37 }
0x2d09   :  { %v3004_v42 = vpop.f32.mrf.mxu1 }
0x2d0a   :  { %v3005_v14 = vadd.f32 %v3004_v42, %v6563_v46 }
0x2d0b   :  { %v5022_v11 = vpop.f32.mrf.mxu1 }
0x2d0c   :  { %v3011_v6 = vmin.f32 %v3005_v14, 20.0  ;;  %vm3010_vm2 = vcmp.gt.f32.partialorder %v3005_v14, 20.0 }
0x2d0d   :  { %v3007_v16 = vpop.f32.mrf.mxu1 }
0x2d0e   :  { %v3012_v25 = vmul.f32 1.442695, %v3011_v6 }
0x2d0f   :  { %v5023_v0 = vpop.f32.mrf.mxu1 }
0x2d10   :  { %5537 = vpow2.f32 %v3012_v25 }
0x2d1d   :  { %v5538_v10 = vpop.eup %5537 }
0x2d1e   :  { %v3014_v19 = vadd.f32 1.0, %v5538_v10  ;;  %v3017_v24 = vmul.f32 -0.5, %v5538_v10  ;;  %v3020_v50 = vand.u32 2147483647, %v5538_v10 }
0x2d20   :  { %5539 = vlog2.f32 %v3014_v19  ;;  %v3018_v22 = vadd.f32 1.0, %v3017_v24  ;;  %vm3021_vm1 = vcmp.lt.f32.partialorder %v3020_v50, 0.0004427343 }
0x2d22   :  { %v3019_v48 = vmul.f32 %v5538_v10, %v3018_v22  ;;  %v3155_v10 = vpop.permute.xlu0 %3154 }
0x2d2d   :  { %v5540_v54 = vpop.eup %5539 }
0x2d2e   :  { %v3016_v3 = vmul.f32 0.6931472, %v5540_v54 }
0x2d30   :  { %v3022_v26 = vsel %vm3021_vm1, %v3019_v48, %v3016_v3 }
0x2d31   :  { %v3023_v53 = vsel %vm3010_vm2, %v3005_v14, %v3022_v26 }
0x2d32   :  { %v3024_v56 = vpack.c.bf16 %v3023_v53, %v3023_v53 }
0x2d34   :  { %5037 = vmatmul.mubr.msk.bf16.vlgmr.msra.gmra.mxu0 %vm2194_vm11, %v3024_v56  ;;  %v6907_v56 = vld [vmem:[%s7298_s5 + $0x58] sm:$0xff]  }
0x2d35   :  { %5057 = vmatpush3.bf16.msra.mxu0 %v6416_v36  ;;  %5058 = vmatprep.mubr.msk.bf16.mxu0 %vm5668_vm7, %v5667_v37 }
0x2d36   :  { %5078 = vmatprep.subr.bf16.mxu0 %v5667_v37 }
0x2df4   :  { %v3062_v23 = vpop.f32.mrf.mxu0 }
0x2df5   :  { %v3063_v5 = vadd.f32 %v3062_v23, %v6572_v51  ;;  %v6914_v23 = vld [vmem:[%s7298_s5 + $0x50] sm:$0xff]  }
0x2df6   :  { %v5038_v9 = vpop.f32.mrf.mxu0 }
0x2df7   :  { %v3069_v21 = vmin.f32 %v3063_v5, 20.0  ;;  %vm3068_vm6 = vcmp.gt.f32.partialorder %v3063_v5, 20.0  ;;  %v6928_v9 = vld [vmem:[%s7298_s5 + $0x40] sm:$0xff]  }
0x2df8   :  { %v3065_v30 = vpop.f32.mrf.mxu0 }
0x2df9   :  { %v3070_v63 = vmul.f32 1.442695, %v3069_v21  ;;  %v6935_v21 = vld [vmem:[%s7298_s5 + $0x38] sm:$0xff]   ;;  %v3165_v30 = vrot.slane %v6563_v46, 4 }
0x2dfa   :  { %v5039_v57 = vpop.f32.mrf.mxu0 }
0x2dfb   :  { %5541 = vpow2.f32 %v3070_v63 }
0x2e08   :  { %v5542_v4 = vpop.eup %5541 }
0x2e09   :  { %v3072_v7 = vadd.f32 1.0, %v5542_v4  ;;  %v3075_v12 = vmul.f32 -0.5, %v5542_v4  ;;  %v3078_v45 = vand.u32 2147483647, %v5542_v4 }
0x2e0b   :  { %5543 = vlog2.f32 %v3072_v7  ;;  %v3076_v13 = vadd.f32 1.0, %v3075_v12  ;;  %vm3079_vm3 = vcmp.lt.f32.partialorder %v3078_v45, 0.0004427343 }
0x2e0d   :  { %v3077_v17 = vmul.f32 %v5542_v4, %v3076_v13 }
0x2e18   :  { %v5544_v58 = vpop.eup %5543 }
0x2e19   :  { %v3074_v31 = vmul.f32 0.6931472, %v5544_v58 }
0x2e1b   :  { %v3080_v27 = vsel %vm3079_vm3, %v3077_v17, %v3074_v31 }
0x2e1c   :  { %v3081_v43 = vsel %vm3068_vm6, %v3063_v5, %v3080_v27  ;;  %v6921_v5 = vld [vmem:[%s7298_s5 + $0x48] sm:$0xff]  }
0x2e1d   :  { %v3082_v51 = vsel %vm314_vm4, %v3081_v43, %v3023_v53  ;;  %v6898_v53 = vld [vmem:[%s7298_s5 + $0x60] sm:$0xff]  }
0x2e1e   :  { %v3083_v39 = vpack.c.bf16 %v3082_v51, %v3082_v51 }
0x2e20   :  { %5053 = vmatmul.mubr.msk.bf16.vlgmr.msra.gmra.mxu1 %vm2194_vm11, %v3083_v39 }
0x2e21   :  { %5063 = vmatpush3.bf16.msra.mxu1 %v6841_v60  ;;  %5074 = vmatprep.mubr.msk.bf16.mxu1 %vm5668_vm7, %v5667_v37 }
0x2e22   :  { %5064 = vmatprep.subr.bf16.mxu1 %v5667_v37 }
0x2e25   :  { %5065 = vmatpush3.bf16.msra.mxu1 %v6850_v8 }
0x2e26   :  { %5066 = vmatprep.subr.bf16.mxu1 %v5667_v37 }
0x2e29   :  { %5067 = vmatpush3.bf16.msra.mxu1 %v6857_v62 }
0x2e2a   :  { %5068 = vmatprep.subr.bf16.mxu1 %v5667_v37 }
0x2e2d   :  { %5069 = vmatpush3.bf16.msra.mxu1 %v6864_v15 }
0x2e2e   :  { %5070 = vmatprep.subr.bf16.mxu1 %v5667_v37 }
0x2e31   :  { %5071 = vmatpush3.bf16.msra.mxu1 %v6871_v18 }
0x2e32   :  { %5072 = vmatprep.subr.bf16.mxu1 %v5667_v37 }
0x2e35   :  { %5073 = vmatpush3.bf16.msra.mxu1 %v6878_v1 }
0x2e36   :  { %5094 = vmatprep.subr.bf16.mxu1 %v5667_v37 }
0x2ee0   :  { %v3121_v55 = vpop.f32.mrf.mxu1 }
0x2ee1   :  { %v6883_v28 = vadd.f32 %v3121_v55, %v6594_v61 }
0x2ee2   :  { %v5054_v29 = vpop.f32.mrf.mxu1 }
0x2ee3   :  { %v4566_v42 = vmul.f32 -1.442695, %v6883_v28  ;;  %v3150_v50 = vmul.f32 0.1, %v6883_v28 }
0x2ee4   :  { %v3124_v14 = vpop.f32.mrf.mxu1 }
0x2ee5   :  { %5545 = vpow2.f32 %v4566_v42  ;;  %v3151_v54 = vadd.f32 %v3150_v50, %v6810_v35 }
0x2ee6   :  { %v5055_v11 = vpop.f32.mrf.mxu1 }
0x2ee7   :  { %v6948_v11 = vld [vmem:[%s7299_s6 + $0x5] ss:$0 sm:$0xff] }
0x2ef2   :  { %v5546_v6 = vpop.eup %5545 }
0x2ef3   :  { %v3130_v16 = vadd.f32 1.0, %v5546_v6 }
0x2ef5   :  { %5547 = vrcp.f32 %v3130_v16 }
0x2f02   :  { %v5548_v25 = vpop.eup %5547 }
0x2f03   :  { %v3133_v0 = vmul.f32 0.31622776, %v5548_v25 }
0x2f05   :  { %v3141_v19 = vmul.f32 2.0, %v3133_v0  ;;  %v3157_v24 = vmul.f32 %v3155_v10, %v3133_v0 }
0x2f07   :  { %v3142_v22 = vmul.f32 %v3141_v19, %v3133_v0  ;;  %3159 = vrot.lane.b32.xlu1 %v3157_v24, %s5672_s25 }
0x2f09   :  { %5549 = vrcp.f32 %v3142_v22 }
0x2f16   :  { %v5550_v61 = vpop.eup %5549 }
0x2f17   :  { %3145 = vrot.lane.b32.xlu0 %v5550_v61, %s5672_s25 }
0x2f79   :  { %v3160_v3 = vpop.permute.xlu1 %3159 }
0x2f7a   :  { %v6890_v48 = vadd.f32 %v3160_v3, %v3151_v54 }
0x2f7c   :  { %v3163_v26 = vpack.c.bf16 %v6890_v48, %v6890_v48 }
0x2f7e   :  { %5059 = vmatmul.mubr.msk.bf16.vlgmr.msra.gmra.mxu0 %vm2009_vm8, %v3163_v26 }
0x2f7f   :  { %5079 = vmatpush3.bf16.msra.mxu0 %v6898_v53  ;;  %5090 = vmatprep.mubr.msk.bf16.mxu0 %vm5668_vm7, %v5667_v37 }
0x2f80   :  { %5080 = vmatprep.subr.bf16.mxu0 %v5667_v37 }
0x2f83   :  { %5081 = vmatpush3.bf16.msra.mxu0 %v6907_v56 }
0x2f84   :  { %5082 = vmatprep.subr.bf16.mxu0 %v5667_v37 }
0x2f87   :  { %5083 = vmatpush3.bf16.msra.mxu0 %v6914_v23 }
0x2f88   :  { %5084 = vmatprep.subr.bf16.mxu0 %v5667_v37 }
0x2f8b   :  { %5085 = vmatpush3.bf16.msra.mxu0 %v6921_v5 }
0x2f8c   :  { %5086 = vmatprep.subr.bf16.mxu0 %v5667_v37 }
0x2f8f   :  { %5087 = vmatpush3.bf16.msra.mxu0 %v6928_v9 }
0x2f90   :  { %5088 = vmatprep.subr.bf16.mxu0 %v5667_v37 }
0x2f93   :  { %5089 = vmatpush3.bf16.msra.mxu0 %v6935_v21 }
0x2f94   :  { %5100 = vmatprep.subr.bf16.mxu0 %v5667_v37 }
0x303e   :  { %v3204_v63 = vpop.f32.mrf.mxu0 }
0x303f   :  { %v3205_v57 = vadd.f32 %v3204_v63, %v3165_v30 }
0x3040   :  { %v5060_v4 = vpop.f32.mrf.mxu0 }
0x3041   :  { %v3211_v7 = vmin.f32 %v3205_v57, 20.0  ;;  %vm3210_vm10 = vcmp.gt.f32.partialorder %v3205_v57, 20.0 }
0x3042   :  { %v3207_v12 = vpop.f32.mrf.mxu0 }
0x3043   :  { %v3212_v13 = vmul.f32 1.442695, %v3211_v7 }
0x3044   :  { %v5061_v45 = vpop.f32.mrf.mxu0 }
0x3045   :  { %5551 = vpow2.f32 %v3212_v13  ;;  %v6970_v13 = vld [vmem:[%s7299_s6 + $0x6] ss:$0 sm:$0xff] }
0x3052   :  { %v5552_v58 = vpop.eup %5551 }
0x3053   :  { %v3214_v31 = vadd.f32 1.0, %v5552_v58  ;;  %v3217_v17 = vmul.f32 -0.5, %v5552_v58  ;;  %v3220_v43 = vand.u32 2147483647, %v5552_v58 }
0x3055   :  { %5553 = vlog2.f32 %v3214_v31  ;;  %v3218_v27 = vadd.f32 1.0, %v3217_v17  ;;  %vm3221_vm9 = vcmp.lt.f32.partialorder %v3220_v43, 0.0004427343 }
0x3057   :  { %v3219_v55 = vmul.f32 %v5552_v58, %v3218_v27 }
0x3062   :  { %v5554_v51 = vpop.eup %5553 }
0x3063   :  { %v3216_v39 = vmul.f32 0.6931472, %v5554_v51 }
0x3065   :  { %v3222_v46 = vsel %vm3221_vm9, %v3219_v55, %v3216_v39 }
0x3066   :  { %v3223_v29 = vsel %vm3210_vm10, %v3205_v57, %v3222_v46  ;;  %v3355_v46 = vpop.permute.xlu0 %3354 }
0x3067   :  { %v3224_v42 = vpack.c.bf16 %v3223_v29, %v3223_v29 }
0x3069   :  { %5075 = vmatmul.mubr.msk.bf16.vlgmr.msra.gmra.mxu1 %vm2194_vm11, %v3224_v42 }
0x306a   :  { %5095 = vmatpush3.bf16.msra.mxu1 %v6416_v36  ;;  %5096 = vmatprep.mubr.msk.bf16.mxu1 %vm5668_vm7, %v5667_v37 }
0x306b   :  { %5116 = vmatprep.subr.bf16.mxu1 %v5667_v37 }
0x3129   :  { %v3262_v14 = vpop.f32.mrf.mxu1 }
0x312a   :  { %v3263_v6 = vadd.f32 %v6948_v11, %v3262_v14 }
0x312b   :  { %v5076_v16 = vpop.f32.mrf.mxu1 }
0x312c   :  { %v3269_v25 = vmin.f32 %v3263_v6, 20.0  ;;  %vm3268_vm13 = vcmp.gt.f32.partialorder %v3263_v6, 20.0 }
0x312d   :  { %v3265_v0 = vpop.f32.mrf.mxu1 }
0x312e   :  { %v3270_v10 = vmul.f32 1.442695, %v3269_v25 }
0x312f   :  { %v5077_v19 = vpop.f32.mrf.mxu1 }
0x3130   :  { %5555 = vpow2.f32 %v3270_v10 }
0x313d   :  { %v5556_v24 = vpop.eup %5555 }
0x313e   :  { %v3272_v22 = vadd.f32 1.0, %v5556_v24  ;;  %v3275_v61 = vmul.f32 -0.5, %v5556_v24  ;;  %v3278_v54 = vand.u32 2147483647, %v5556_v24 }
0x3140   :  { %5557 = vlog2.f32 %v3272_v22  ;;  %v3276_v50 = vadd.f32 1.0, %v3275_v61  ;;  %vm3279_vm12 = vcmp.lt.f32.partialorder %v3278_v54, 0.0004427343 }
0x3142   :  { %v3277_v30 = vmul.f32 %v5556_v24, %v3276_v50 }
0x314d   :  { %v5558_v3 = vpop.eup %5557 }
0x314e   :  { %v3274_v26 = vmul.f32 0.6931472, %v5558_v3 }
0x3150   :  { %v3280_v63 = vsel %vm3279_vm12, %v3277_v30, %v3274_v26 }
0x3151   :  { %v3281_v57 = vsel %vm3268_vm13, %v3263_v6, %v3280_v63 }
0x3152   :  { %v3282_v4 = vsel %vm314_vm4, %v3281_v57, %v3223_v29 }
0x3153   :  { %v3283_v7 = vpack.c.bf16 %v3282_v4, %v3282_v4 }
0x3155   :  { %5091 = vmatmul.mubr.msk.bf16.vlgmr.msra.gmra.mxu0 %vm2194_vm11, %v3283_v7 }
0x3156   :  { %5101 = vmatpush3.bf16.msra.mxu0 %v6841_v60  ;;  %5112 = vmatprep.mubr.msk.bf16.mxu0 %vm5668_vm7, %v5667_v37 }
0x3157   :  { %5102 = vmatprep.subr.bf16.mxu0 %v5667_v37 }
0x315a   :  { %5103 = vmatpush3.bf16.msra.mxu0 %v6850_v8 }
0x315b   :  { %5104 = vmatprep.subr.bf16.mxu0 %v5667_v37 }
0x315e   :  { %5105 = vmatpush3.bf16.msra.mxu0 %v6857_v62 }
0x315f   :  { %5106 = vmatprep.subr.bf16.mxu0 %v5667_v37 }
0x3162   :  { %5107 = vmatpush3.bf16.msra.mxu0 %v6864_v15 }
0x3163   :  { %5108 = vmatprep.subr.bf16.mxu0 %v5667_v37 }
0x3166   :  { %5109 = vmatpush3.bf16.msra.mxu0 %v6871_v18 }
0x3167   :  { %5110 = vmatprep.subr.bf16.mxu0 %v5667_v37 }
0x316a   :  { %5111 = vmatpush3.bf16.msra.mxu0 %v6878_v1 }
0x316b   :  { %5132 = vmatprep.subr.bf16.mxu0 %v5667_v37 }
0x3215   :  { %v3321_v12 = vpop.f32.mrf.mxu0 }
0x3216   :  { %v6973_v45 = vadd.f32 %v6970_v13, %v3321_v12 }
0x3217   :  { %v5092_v58 = vpop.f32.mrf.mxu0 }
0x3218   :  { %v4570_v31 = vmul.f32 -1.442695, %v6973_v45  ;;  %v3350_v16 = vmul.f32 0.1, %v6973_v45 }
0x3219   :  { %v3324_v17 = vpop.f32.mrf.mxu0 }
0x321a   :  { %5559 = vpow2.f32 %v4570_v31  ;;  %v3351_v25 = vadd.f32 %v3350_v16, %v6890_v48 }
0x321b   :  { %v5093_v27 = vpop.f32.mrf.mxu0 }
0x3227   :  { %v5560_v43 = vpop.eup %5559 }
0x3228   :  { %v3330_v51 = vadd.f32 1.0, %v5560_v43 }
0x322a   :  { %5561 = vrcp.f32 %v3330_v51 }
0x3237   :  { %v5562_v39 = vpop.eup %5561 }
0x3238   :  { %v3333_v55 = vmul.f32 0.31622776, %v5562_v39 }
0x323a   :  { %v3341_v29 = vmul.f32 2.0, %v3333_v55  ;;  %v3357_v42 = vmul.f32 %v3355_v46, %v3333_v55 }
0x323c   :  { %v3342_v14 = vmul.f32 %v3341_v29, %v3333_v55  ;;  %3359 = vrot.lane.b32.xlu1 %v3357_v42, %s5672_s25 }
0x323e   :  { %5563 = vrcp.f32 %v3342_v14 }
0x324b   :  { %v5564_v6 = vpop.eup %5563 }
0x324c   :  { %3345 = vrot.lane.b32.xlu0 %v5564_v6, %s5672_s25 }
0x32ae   :  { %v3360_v0 = vpop.permute.xlu1 %3359 }
0x32af   :  { %v6980_v10 = vadd.f32 %v3360_v0, %v3351_v25 }
0x32b1   :  { %v3363_v19 = vpack.c.bf16 %v6980_v10, %v6980_v10 }
0x32b3   :  { %5097 = vmatmul.mubr.msk.bf16.vlgmr.msra.gmra.mxu1 %vm2009_vm8, %v3363_v19 }
0x32b4   :  { %5117 = vmatpush3.bf16.msra.mxu1 %v6898_v53  ;;  %5128 = vmatprep.mubr.msk.bf16.mxu1 %vm5668_vm7, %v5667_v37 }
0x32b5   :  { %5118 = vmatprep.subr.bf16.mxu1 %v5667_v37 }
0x32b8   :  { %5119 = vmatpush3.bf16.msra.mxu1 %v6907_v56 }
0x32b9   :  { %5120 = vmatprep.subr.bf16.mxu1 %v5667_v37 }
0x32bc   :  { %5121 = vmatpush3.bf16.msra.mxu1 %v6914_v23 }
0x32bd   :  { %5122 = vmatprep.subr.bf16.mxu1 %v5667_v37 }
0x32c0   :  { %5123 = vmatpush3.bf16.msra.mxu1 %v6921_v5 }
0x32c1   :  { %5124 = vmatprep.subr.bf16.mxu1 %v5667_v37 }
0x32c4   :  { %5125 = vmatpush3.bf16.msra.mxu1 %v6928_v9 }
0x32c5   :  { %5126 = vmatprep.subr.bf16.mxu1 %v5667_v37 }
0x32c8   :  { %5127 = vmatpush3.bf16.msra.mxu1 %v6935_v21 }
0x32c9   :  { %5138 = vmatprep.subr.bf16.mxu1 %v5667_v37 }
0x3373   :  { %v3401_v24 = vpop.f32.mrf.mxu1 }
0x3374   :  { %v3402_v22 = vadd.f32 %v6561_v49, %v3401_v24 }
0x3375   :  { %v5098_v61 = vpop.f32.mrf.mxu1 }
0x3376   :  { %v3408_v50 = vmin.f32 %v3402_v22, 20.0  ;;  %vm3407_vm15 = vcmp.gt.f32.partialorder %v3402_v22, 20.0 }
0x3377   :  { %v3404_v54 = vpop.f32.mrf.mxu1 }
0x3378   :  { %v3409_v3 = vmul.f32 1.442695, %v3408_v50 }
0x3379   :  { %v5099_v26 = vpop.f32.mrf.mxu1 }
0x337a   :  { %5565 = vpow2.f32 %v3409_v3 }
0x3387   :  { %v5566_v30 = vpop.eup %5565 }
0x3388   :  { %v3411_v63 = vadd.f32 1.0, %v5566_v30  ;;  %v3414_v57 = vmul.f32 -0.5, %v5566_v30  ;;  %v3417_v7 = vand.u32 2147483647, %v5566_v30 }
0x338a   :  { %5567 = vlog2.f32 %v3411_v63  ;;  %v3415_v4 = vadd.f32 1.0, %v3414_v57  ;;  %vm3418_vm14 = vcmp.lt.f32.partialorder %v3417_v7, 0.0004427343 }
0x338c   :  { %v3416_v31 = vmul.f32 %v5566_v30, %v3415_v4 }
0x3397   :  { %v5568_v12 = vpop.eup %5567 }
0x3398   :  { %v3413_v58 = vmul.f32 0.6931472, %v5568_v12 }
0x339a   :  { %v3419_v17 = vsel %vm3418_vm14, %v3416_v31, %v3413_v58 }
0x339b   :  { %v3420_v27 = vsel %vm3407_vm15, %v3402_v22, %v3419_v17 }
0x339c   :  { %v3421_v43 = vpack.c.bf16 %v3420_v27, %v3420_v27 }
0x339e   :  { %5113 = vmatmul.mubr.msk.bf16.vlgmr.msra.gmra.mxu0 %vm2194_vm11, %v3421_v43  ;;  %v3552_v43 = vpop.permute.xlu0 %3551 }
0x339f   :  { %5133 = vmatpush3.bf16.msra.mxu0 %v6416_v36  ;;  %5134 = vmatprep.mubr.msk.bf16.mxu0 %vm5668_vm7, %v5667_v37 }
0x33a0   :  { %5154 = vmatprep.subr.bf16.mxu0 %v5667_v37 }
0x345e   :  { %v3459_v51 = vpop.f32.mrf.mxu0 }
0x345f   :  { %v3460_v39 = vadd.f32 %v6948_v11, %v3459_v51 }
0x3460   :  { %v5114_v55 = vpop.f32.mrf.mxu0 }
0x3461   :  { %v3466_v46 = vmin.f32 %v3460_v39, 20.0  ;;  %vm3465_vm2 = vcmp.gt.f32.partialorder %v3460_v39, 20.0 }
0x3462   :  { %v3462_v29 = vpop.f32.mrf.mxu0 }
0x3463   :  { %v3467_v42 = vmul.f32 1.442695, %v3466_v46 }
0x3464   :  { %v5115_v14 = vpop.f32.mrf.mxu0 }
0x3465   :  { %5569 = vpow2.f32 %v3467_v42 }
0x3472   :  { %v5570_v6 = vpop.eup %5569 }
0x3473   :  { %v3469_v16 = vadd.f32 1.0, %v5570_v6  ;;  %v3472_v25 = vmul.f32 -0.5, %v5570_v6  ;;  %v3475_v19 = vand.u32 2147483647, %v5570_v6 }
0x3475   :  { %5571 = vlog2.f32 %v3469_v16  ;;  %v3473_v0 = vadd.f32 1.0, %v3472_v25  ;;  %vm3476_vm1 = vcmp.lt.f32.partialorder %v3475_v19, 0.0004427343  ;;  %v3562_v25 = vrot.slane %v6561_v49, 4 }
0x3477   :  { %v3474_v61 = vmul.f32 %v5570_v6, %v3473_v0 }
0x3482   :  { %v5572_v24 = vpop.eup %5571 }
0x3483   :  { %v3471_v22 = vmul.f32 0.6931472, %v5572_v24 }
0x3485   :  { %v3477_v50 = vsel %vm3476_vm1, %v3474_v61, %v3471_v22 }
0x3486   :  { %v3478_v54 = vsel %vm3465_vm2, %v3460_v39, %v3477_v50 }
0x3487   :  { %v3479_v3 = vsel %vm314_vm4, %v3478_v54, %v3420_v27 }
0x3488   :  { %v3480_v26 = vpack.c.bf16 %v3479_v3, %v3479_v3 }
0x348a   :  { %5129 = vmatmul.mubr.msk.bf16.vlgmr.msra.gmra.mxu1 %vm2194_vm11, %v3480_v26 }
0x348b   :  { %5139 = vmatpush3.bf16.msra.mxu1 %v6841_v60  ;;  %5150 = vmatprep.mubr.msk.bf16.mxu1 %vm5668_vm7, %v5667_v37 }
0x348c   :  { %5140 = vmatprep.subr.bf16.mxu1 %v5667_v37 }
0x348f   :  { %5141 = vmatpush3.bf16.msra.mxu1 %v6850_v8 }
0x3490   :  { %5142 = vmatprep.subr.bf16.mxu1 %v5667_v37 }
0x3493   :  { %5143 = vmatpush3.bf16.msra.mxu1 %v6857_v62 }
0x3494   :  { %5144 = vmatprep.subr.bf16.mxu1 %v5667_v37 }
0x3497   :  { %5145 = vmatpush3.bf16.msra.mxu1 %v6864_v15 }
0x3498   :  { %5146 = vmatprep.subr.bf16.mxu1 %v5667_v37 }
0x349b   :  { %5147 = vmatpush3.bf16.msra.mxu1 %v6871_v18 }
0x349c   :  { %5148 = vmatprep.subr.bf16.mxu1 %v5667_v37 }
0x349f   :  { %5149 = vmatpush3.bf16.msra.mxu1 %v6878_v1 }
0x34a0   :  { %5170 = vmatprep.subr.bf16.mxu1 %v5667_v37 }
0x354a   :  { %v3518_v30 = vpop.f32.mrf.mxu1 }
0x354b   :  { %v7023_v63 = vadd.f32 %v6970_v13, %v3518_v30 }
0x354c   :  { %v5130_v57 = vpop.f32.mrf.mxu1 }
0x354d   :  { %v4574_v4 = vmul.f32 -1.442695, %v7023_v63  ;;  %v3547_v29 = vmul.f32 0.1, %v7023_v63 }
0x354e   :  { %v3521_v7 = vpop.f32.mrf.mxu1 }
0x354f   :  { %5573 = vpow2.f32 %v4574_v4  ;;  %v3548_v42 = vadd.f32 %v3547_v29, %v6980_v10 }
0x3550   :  { %v5131_v12 = vpop.f32.mrf.mxu1 }
0x355c   :  { %v5574_v58 = vpop.eup %5573 }
0x355d   :  { %v3527_v31 = vadd.f32 1.0, %v5574_v58 }
0x355f   :  { %5575 = vrcp.f32 %v3527_v31 }
0x356c   :  { %v5576_v17 = vpop.eup %5575 }
0x356d   :  { %v3530_v27 = vmul.f32 0.31622776, %v5576_v17 }
0x356f   :  { %v3538_v51 = vmul.f32 2.0, %v3530_v27  ;;  %v3554_v39 = vmul.f32 %v3552_v43, %v3530_v27 }
0x3571   :  { %v3539_v55 = vmul.f32 %v3538_v51, %v3530_v27  ;;  %3556 = vrot.lane.b32.xlu1 %v3554_v39, %s5672_s25 }
0x3573   :  { %5577 = vrcp.f32 %v3539_v55 }
0x3580   :  { %v5578_v46 = vpop.eup %5577 }
0x3581   :  { %3542 = vrot.lane.b32.xlu0 %v5578_v46, %s5672_s25 }
0x35e3   :  { %v3557_v14 = vpop.permute.xlu1 %3556 }
0x35e4   :  { %v7030_v6 = vadd.f32 %v3557_v14, %v3548_v42 }
0x35e6   :  { %v3560_v16 = vpack.c.bf16 %v7030_v6, %v7030_v6 }
0x35e8   :  { %5135 = vmatmul.mubr.msk.bf16.vlgmr.msra.gmra.mxu0 %vm2009_vm8, %v3560_v16 }
0x35e9   :  { %5155 = vmatpush3.bf16.msra.mxu0 %v6898_v53  ;;  %5166 = vmatprep.mubr.msk.bf16.mxu0 %vm5668_vm7, %v5667_v37 }
0x35ea   :  { %5156 = vmatprep.subr.bf16.mxu0 %v5667_v37 }
0x35ed   :  { %5157 = vmatpush3.bf16.msra.mxu0 %v6907_v56 }
0x35ee   :  { %5158 = vmatprep.subr.bf16.mxu0 %v5667_v37 }
0x35f1   :  { %5159 = vmatpush3.bf16.msra.mxu0 %v6914_v23 }
0x35f2   :  { %5160 = vmatprep.subr.bf16.mxu0 %v5667_v37 }
0x35f5   :  { %5161 = vmatpush3.bf16.msra.mxu0 %v6921_v5 }
0x35f6   :  { %5162 = vmatprep.subr.bf16.mxu0 %v5667_v37 }
0x35f9   :  { %5163 = vmatpush3.bf16.msra.mxu0 %v6928_v9 }
0x35fa   :  { %5164 = vmatprep.subr.bf16.mxu0 %v5667_v37 }
0x35fd   :  { %5165 = vmatpush3.bf16.msra.mxu0 %v6935_v21 }
0x35fe   :  { %5176 = vmatprep.subr.bf16.mxu0 %v5667_v37 }
0x36a8   :  { %v3601_v0 = vpop.f32.mrf.mxu0 }
0x36a9   :  { %v3602_v19 = vadd.f32 %v3601_v0, %v3562_v25 }
0x36aa   :  { %v5136_v24 = vpop.f32.mrf.mxu0 }
0x36ab   :  { %v3608_v22 = vmin.f32 %v3602_v19, 20.0  ;;  %vm3607_vm6 = vcmp.gt.f32.partialorder %v3602_v19, 20.0 }
0x36ac   :  { %v3604_v61 = vpop.f32.mrf.mxu0 }
0x36ad   :  { %v3609_v50 = vmul.f32 1.442695, %v3608_v22 }
0x36ae   :  { %v5137_v54 = vpop.f32.mrf.mxu0 }
0x36af   :  { %5579 = vpow2.f32 %v3609_v50 }
0x36bc   :  { %v5580_v3 = vpop.eup %5579 }
0x36bd   :  { %v3611_v26 = vadd.f32 1.0, %v5580_v3  ;;  %v3614_v30 = vmul.f32 -0.5, %v5580_v3  ;;  %v3617_v4 = vand.u32 2147483647, %v5580_v3 }
0x36bf   :  { %5581 = vlog2.f32 %v3611_v26  ;;  %v3615_v57 = vadd.f32 1.0, %v3614_v30  ;;  %vm3618_vm3 = vcmp.lt.f32.partialorder %v3617_v4, 0.0004427343 }
0x36c1   :  { %v3616_v58 = vmul.f32 %v5580_v3, %v3615_v57 }
0x36cc   :  { %v5582_v7 = vpop.eup %5581 }
0x36cd   :  { %v3613_v12 = vmul.f32 0.6931472, %v5582_v7 }
0x36cf   :  { %v3619_v49 = vsel %vm3618_vm3, %v3616_v58, %v3613_v12 }
0x36d0   :  { %v3620_v31 = vsel %vm3607_vm6, %v3602_v19, %v3619_v49 }
0x36d1   :  { %v3621_v17 = vpack.c.bf16 %v3620_v31, %v3620_v31 }
0x36d3   :  { %5151 = vmatmul.mubr.msk.bf16.vlgmr.msra.gmra.mxu1 %vm2194_vm11, %v3621_v17 }
0x36d4   :  { %5171 = vmatpush3.bf16.msra.mxu1 %v6416_v36  ;;  %5172 = vmatprep.mubr.msk.bf16.mxu1 %vm5668_vm7, %v5667_v37 }
0x36d5   :  { %5192 = vmatprep.subr.bf16.mxu1 %v5667_v37 }
0x3793   :  { %v3659_v27 = vpop.f32.mrf.mxu1 }
0x3794   :  { %v3660_v43 = vadd.f32 %v6948_v11, %v3659_v27  ;;  %v3752_v27 = vpop.permute.xlu0 %3751 }
0x3795   :  { %v5152_v51 = vpop.f32.mrf.mxu1 }
0x3796   :  { %v3666_v39 = vmin.f32 %v3660_v43, 20.0  ;;  %vm3665_vm10 = vcmp.gt.f32.partialorder %v3660_v43, 20.0 }
0x3797   :  { %v3662_v55 = vpop.f32.mrf.mxu1 }
0x3798   :  { %v3667_v46 = vmul.f32 1.442695, %v3666_v39 }
0x3799   :  { %v5153_v29 = vpop.f32.mrf.mxu1 }
0x379a   :  { %5583 = vpow2.f32 %v3667_v46 }
0x37a7   :  { %v5584_v42 = vpop.eup %5583 }
0x37a8   :  { %v3669_v14 = vadd.f32 1.0, %v5584_v42  ;;  %v3672_v16 = vmul.f32 -0.5, %v5584_v42  ;;  %v3675_v0 = vand.u32 2147483647, %v5584_v42 }
0x37aa   :  { %5585 = vlog2.f32 %v3669_v14  ;;  %v3673_v25 = vadd.f32 1.0, %v3672_v16  ;;  %vm3676_vm9 = vcmp.lt.f32.partialorder %v3675_v0, 0.0004427343 }
0x37ac   :  { %v3674_v22 = vmul.f32 %v5584_v42, %v3673_v25 }
0x37b7   :  { %v5586_v19 = vpop.eup %5585 }
0x37b8   :  { %v3671_v24 = vmul.f32 0.6931472, %v5586_v19 }
0x37ba   :  { %v3677_v61 = vsel %vm3676_vm9, %v3674_v22, %v3671_v24 }
0x37bb   :  { %v3678_v50 = vsel %vm3665_vm10, %v3660_v43, %v3677_v61 }
0x37bc   :  { %v3679_v54 = vsel %vm314_vm4, %v3678_v50, %v3620_v31 }
0x37bd   :  { %v3680_v3 = vpack.c.bf16 %v3679_v54, %v3679_v54 }
0x37bf   :  { %5167 = vmatmul.mubr.msk.bf16.vlgmr.msra.gmra.mxu0 %vm2194_vm11, %v3680_v3 }
0x37c0   :  { %5177 = vmatpush3.bf16.msra.mxu0 %v6841_v60  ;;  %5188 = vmatprep.mubr.msk.bf16.mxu0 %vm5668_vm7, %v5667_v37 }
0x37c1   :  { %5178 = vmatprep.subr.bf16.mxu0 %v5667_v37 }
0x37c4   :  { %5179 = vmatpush3.bf16.msra.mxu0 %v6850_v8 }
0x37c5   :  { %5180 = vmatprep.subr.bf16.mxu0 %v5667_v37 }
0x37c8   :  { %5181 = vmatpush3.bf16.msra.mxu0 %v6857_v62 }
0x37c9   :  { %5182 = vmatprep.subr.bf16.mxu0 %v5667_v37 }
0x37cc   :  { %5183 = vmatpush3.bf16.msra.mxu0 %v6864_v15 }
0x37cd   :  { %5184 = vmatprep.subr.bf16.mxu0 %v5667_v37 }
0x37d0   :  { %5185 = vmatpush3.bf16.msra.mxu0 %v6871_v18 }
0x37d1   :  { %5186 = vmatprep.subr.bf16.mxu0 %v5667_v37 }
0x37d4   :  { %5187 = vmatpush3.bf16.msra.mxu0 %v6878_v1 }
0x37d5   :  { %5208 = vmatprep.subr.bf16.mxu0 %v5667_v37 }
0x387f   :  { %v3718_v26 = vpop.f32.mrf.mxu0 }
0x3880   :  { %v7073_v30 = vadd.f32 %v6970_v13, %v3718_v26 }
0x3881   :  { %v5168_v57 = vpop.f32.mrf.mxu0 }
0x3882   :  { %v4578_v4 = vmul.f32 -1.442695, %v7073_v30  ;;  %v3747_v46 = vmul.f32 0.1, %v7073_v30 }
0x3883   :  { %v3721_v7 = vpop.f32.mrf.mxu0 }
0x3884   :  { %5587 = vpow2.f32 %v4578_v4  ;;  %v3748_v29 = vadd.f32 %v3747_v46, %v7030_v6 }
0x3885   :  { %v5169_v12 = vpop.f32.mrf.mxu0 }
0x3891   :  { %v5588_v58 = vpop.eup %5587 }
0x3892   :  { %v3727_v49 = vadd.f32 1.0, %v5588_v58 }
0x3894   :  { %5589 = vrcp.f32 %v3727_v49 }
0x38a1   :  { %v5590_v31 = vpop.eup %5589 }
0x38a2   :  { %v3730_v17 = vmul.f32 0.31622776, %v5590_v31 }
0x38a4   :  { %v3738_v43 = vmul.f32 2.0, %v3730_v17  ;;  %v3754_v51 = vmul.f32 %v3752_v27, %v3730_v17 }
0x38a6   :  { %v3739_v39 = vmul.f32 %v3738_v43, %v3730_v17  ;;  %3756 = vrot.lane.b32.xlu1 %v3754_v51, %s5672_s25 }
0x38a8   :  { %5591 = vrcp.f32 %v3739_v39 }
0x38b5   :  { %v5592_v55 = vpop.eup %5591 }
0x38b6   :  { %3742 = vrot.lane.b32.xlu0 %v5592_v55, %s5672_s25 }
0x3918   :  { %v3757_v42 = vpop.permute.xlu1 %3756 }
0x3919   :  { %v7080_v14 = vadd.f32 %v3757_v42, %v3748_v29 }
0x391b   :  { %v3760_v16 = vpack.c.bf16 %v7080_v14, %v7080_v14 }
0x391d   :  { %5173 = vmatmul.mubr.msk.bf16.vlgmr.msra.gmra.mxu1 %vm2009_vm8, %v3760_v16 }
0x391e   :  { %5193 = vmatpush3.bf16.msra.mxu1 %v6898_v53  ;;  %5204 = vmatprep.mubr.msk.bf16.mxu1 %vm5668_vm7, %v5667_v37 }
0x391f   :  { %5194 = vmatprep.subr.bf16.mxu1 %v5667_v37 }
0x3922   :  { %5195 = vmatpush3.bf16.msra.mxu1 %v6907_v56 }
0x3923   :  { %5196 = vmatprep.subr.bf16.mxu1 %v5667_v37 }
0x3926   :  { %5197 = vmatpush3.bf16.msra.mxu1 %v6914_v23 }
0x3927   :  { %5198 = vmatprep.subr.bf16.mxu1 %v5667_v37 }
0x392a   :  { %5199 = vmatpush3.bf16.msra.mxu1 %v6921_v5 }
0x392b   :  { %5200 = vmatprep.subr.bf16.mxu1 %v5667_v37 }
0x392e   :  { %5201 = vmatpush3.bf16.msra.mxu1 %v6928_v9 }
0x392f   :  { %5202 = vmatprep.subr.bf16.mxu1 %v5667_v37 }
0x3932   :  { %5203 = vmatpush3.bf16.msra.mxu1 %v6935_v21 }
0x3933   :  { %5214 = vmatprep.subr.bf16.mxu1 %v5667_v37 }
0x39dd   :  { %v3798_v25 = vpop.f32.mrf.mxu1 }
0x39de   :  { %v3799_v0 = vadd.f32 %v3798_v25, %v6567_v52 }
0x39df   :  { %v5174_v19 = vpop.f32.mrf.mxu1 }
0x39e0   :  { %v3805_v24 = vmin.f32 %v3799_v0, 20.0  ;;  %vm3804_vm13 = vcmp.gt.f32.partialorder %v3799_v0, 20.0 }
0x39e1   :  { %v3801_v22 = vpop.f32.mrf.mxu1 }
0x39e2   :  { %v3806_v61 = vmul.f32 1.442695, %v3805_v24 }
0x39e3   :  { %v5175_v50 = vpop.f32.mrf.mxu1 }
0x39e4   :  { %5593 = vpow2.f32 %v3806_v61 }
0x39f1   :  { %v5594_v54 = vpop.eup %5593 }
0x39f2   :  { %v3808_v3 = vadd.f32 1.0, %v5594_v54  ;;  %v3811_v26 = vmul.f32 -0.5, %v5594_v54  ;;  %v3814_v4 = vand.u32 2147483647, %v5594_v54 }
0x39f4   :  { %5595 = vlog2.f32 %v3808_v3  ;;  %v3812_v57 = vadd.f32 1.0, %v3811_v26  ;;  %vm3815_vm12 = vcmp.lt.f32.partialorder %v3814_v4, 0.0004427343 }
0x39f6   :  { %v3813_v58 = vmul.f32 %v5594_v54, %v3812_v57 }
0x3a01   :  { %v5596_v7 = vpop.eup %5595 }
0x3a02   :  { %v3810_v12 = vmul.f32 0.6931472, %v5596_v7 }
0x3a04   :  { %v3816_v49 = vsel %vm3815_vm12, %v3813_v58, %v3810_v12 }
0x3a05   :  { %v3817_v31 = vsel %vm3804_vm13, %v3799_v0, %v3816_v49  ;;  %v3949_v49 = vpop.permute.xlu0 %3948  ;;  %vm4399_vm13 = vcmask 130048  }
0x3a06   :  { %v3818_v17 = vpack.c.bf16 %v3817_v31, %v3817_v31 }
0x3a08   :  { %5189 = vmatmul.mubr.msk.bf16.vlgmr.msra.gmra.mxu0 %vm2194_vm11, %v3818_v17 }
0x3a09   :  { %5209 = vmatpush3.bf16.msra.mxu0 %v6416_v36  ;;  %5210 = vmatprep.mubr.msk.bf16.mxu0 %vm5668_vm7, %v5667_v37 }
0x3a0a   :  { %5230 = vmatprep.subr.bf16.mxu0 %v5667_v37 }
0x3ac8   :  { %v3856_v27 = vpop.f32.mrf.mxu0 }
0x3ac9   :  { %v3857_v43 = vadd.f32 %v6948_v11, %v3856_v27 }
0x3aca   :  { %v5190_v51 = vpop.f32.mrf.mxu0 }
0x3acb   :  { %v3863_v39 = vmin.f32 %v3857_v43, 20.0  ;;  %vm3862_vm15 = vcmp.gt.f32.partialorder %v3857_v43, 20.0 }
0x3acc   :  { %v3859_v55 = vpop.f32.mrf.mxu0 }
0x3acd   :  { %v3864_v46 = vmul.f32 1.442695, %v3863_v39 }
0x3ace   :  { %v5191_v29 = vpop.f32.mrf.mxu0 }
0x3acf   :  { %5597 = vpow2.f32 %v3864_v46 }
0x3adc   :  { %v5598_v42 = vpop.eup %5597 }
0x3add   :  { %v3866_v16 = vadd.f32 1.0, %v5598_v42  ;;  %v3869_v25 = vmul.f32 -0.5, %v5598_v42  ;;  %v3872_v19 = vand.u32 2147483647, %v5598_v42 }
0x3adf   :  { %5599 = vlog2.f32 %v3866_v16  ;;  %v3870_v0 = vadd.f32 1.0, %v3869_v25  ;;  %vm3873_vm14 = vcmp.lt.f32.partialorder %v3872_v19, 0.0004427343 }
0x3ae1   :  { %v3871_v61 = vmul.f32 %v5598_v42, %v3870_v0 }
0x3aec   :  { %v5600_v24 = vpop.eup %5599 }
0x3aed   :  { %v3868_v22 = vmul.f32 0.6931472, %v5600_v24 }
0x3aef   :  { %v3874_v50 = vsel %vm3873_vm14, %v3871_v61, %v3868_v22  ;;  %vm4401_vm14 = vcmask 195584  }
0x3af0   :  { %v3875_v54 = vsel %vm3862_vm15, %v3857_v43, %v3874_v50  ;;  %vm4404_vm15 = vcmask 326656  }
0x3af1   :  { %v3876_v3 = vsel %vm314_vm4, %v3875_v54, %v3817_v31 }
0x3af2   :  { %v3877_v26 = vpack.c.bf16 %v3876_v3, %v3876_v3 }
0x3af4   :  { %5205 = vmatmul.mubr.msk.bf16.vlgmr.msra.gmra.mxu1 %vm2194_vm11, %v3877_v26 }
0x3af5   :  { %5215 = vmatpush3.bf16.msra.mxu1 %v6841_v60  ;;  %5226 = vmatprep.mubr.msk.bf16.mxu1 %vm5668_vm7, %v5667_v37 }
0x3af6   :  { %5216 = vmatprep.subr.bf16.mxu1 %v5667_v37 }
0x3af9   :  { %5217 = vmatpush3.bf16.msra.mxu1 %v6850_v8 }
0x3afa   :  { %5218 = vmatprep.subr.bf16.mxu1 %v5667_v37 }
0x3afd   :  { %5219 = vmatpush3.bf16.msra.mxu1 %v6857_v62 }
0x3afe   :  { %5220 = vmatprep.subr.bf16.mxu1 %v5667_v37 }
0x3b01   :  { %5221 = vmatpush3.bf16.msra.mxu1 %v6864_v15 }
0x3b02   :  { %5222 = vmatprep.subr.bf16.mxu1 %v5667_v37 }
0x3b05   :  { %5223 = vmatpush3.bf16.msra.mxu1 %v6871_v18 }
0x3b06   :  { %5224 = vmatprep.subr.bf16.mxu1 %v5667_v37 }
0x3b09   :  { %5225 = vmatpush3.bf16.msra.mxu1 %v6878_v1 }
0x3b0a   :  { %5246 = vmatprep.subr.bf16.mxu1 %v5667_v37 }
0x3bb4   :  { %v3915_v60 = vpop.f32.mrf.mxu1 }
0x3bb5   :  { %v7123_v8 = vadd.f32 %v6970_v13, %v3915_v60 }
0x3bb6   :  { %v5206_v57 = vpop.f32.mrf.mxu1 }
0x3bb7   :  { %v4582_v62 = vmul.f32 -1.442695, %v7123_v8  ;;  %v3944_v43 = vmul.f32 0.1, %v7123_v8 }
0x3bb8   :  { %v3918_v4 = vpop.f32.mrf.mxu1 }
0x3bb9   :  { %5601 = vpow2.f32 %v4582_v62  ;;  %v3945_v51 = vadd.f32 %v3944_v43, %v7080_v14 }
0x3bba   :  { %v5207_v15 = vpop.f32.mrf.mxu1 }
0x3bc6   :  { %v5602_v7 = vpop.eup %5601 }
0x3bc7   :  { %v3924_v12 = vadd.f32 1.0, %v5602_v7 }
0x3bc9   :  { %5603 = vrcp.f32 %v3924_v12 }
0x3bd6   :  { %v5604_v18 = vpop.eup %5603 }
0x3bd7   :  { %v3927_v58 = vmul.f32 0.31622776, %v5604_v18 }
0x3bd9   :  { %v3935_v31 = vmul.f32 2.0, %v3927_v58  ;;  %v3951_v1 = vmul.f32 %v3949_v49, %v3927_v58 }
0x3bdb   :  { %v3936_v17 = vmul.f32 %v3935_v31, %v3927_v58  ;;  %3953 = vrot.lane.b32.xlu1 %v3951_v1, %s5672_s25 }
0x3bdd   :  { %5605 = vrcp.f32 %v3936_v17 }
0x3bea   :  { %v5606_v27 = vpop.eup %5605 }
0x3beb   :  { %3939 = vrot.lane.b32.xlu0 %v5606_v27, %s5672_s25 }
0x3c4d   :  { %v3954_v39 = vpop.permute.xlu1 %3953 }
0x3c4e   :  { %v7130_v55 = vadd.f32 %v3954_v39, %v3945_v51  ;;  %v5651_v39 = vld [vmem:[%s7298_s5 + $0x30] sm:$0xff]  }
0x3c50   :  { %v3957_v46 = vpack.c.bf16 %v7130_v55, %v7130_v55 }
0x3c52   :  { %5211 = vmatmul.mubr.msk.bf16.vlgmr.msra.gmra.mxu0 %vm2009_vm8, %v3957_v46  ;;  %v5652_v46 = vld [vmem:[%s7298_s5 + $0x28] sm:$0xff]  }
0x3c53   :  { %5231 = vmatpush3.bf16.msra.mxu0 %v6898_v53  ;;  %5242 = vmatprep.mubr.msk.bf16.mxu0 %vm5668_vm7, %v5667_v37  ;;  %v3959_v53 = vrot.slane %v6567_v52, 4 }
0x3c54   :  { %5232 = vmatprep.subr.bf16.mxu0 %v5667_v37 }
0x3c57   :  { %5233 = vmatpush3.bf16.msra.mxu0 %v6907_v56 }
0x3c58   :  { %5234 = vmatprep.subr.bf16.mxu0 %v5667_v37 }
0x3c5b   :  { %5235 = vmatpush3.bf16.msra.mxu0 %v6914_v23 }
0x3c5c   :  { %5236 = vmatprep.subr.bf16.mxu0 %v5667_v37 }
0x3c5f   :  { %5237 = vmatpush3.bf16.msra.mxu0 %v6921_v5 }
0x3c60   :  { %5238 = vmatprep.subr.bf16.mxu0 %v5667_v37 }
0x3c63   :  { %5239 = vmatpush3.bf16.msra.mxu0 %v6928_v9 }
0x3c64   :  { %5240 = vmatprep.subr.bf16.mxu0 %v5667_v37 }
0x3c67   :  { %5241 = vmatpush3.bf16.msra.mxu0 %v6935_v21 }
0x3c68   :  { %5252 = vmatprep.subr.bf16.mxu0 %v5667_v37 }
0x3d12   :  { %v3998_v56 = vpop.f32.mrf.mxu0 }
0x3d13   :  { %v3999_v29 = vadd.f32 %v3998_v56, %v3959_v53  ;;  %v5653_v53 = vld [vmem:[%s7298_s5 + $0x20] sm:$0xff]   ;;  %v5654_v56 = vld [vmem:[%s7298_s5 + $0x18] sm:$0xff]  }
0x3d14   :  { %v5212_v42 = vpop.f32.mrf.mxu0 }
0x3d15   :  { %v4005_v23 = vmin.f32 %v3999_v29, 20.0  ;;  %vm4004_vm2 = vcmp.gt.f32.partialorder %v3999_v29, 20.0  ;;  %v5656_v42 = vld [vmem:[%s7298_s5 + $0x8] sm:$0xff]  }
0x3d16   :  { %v4001_v16 = vpop.f32.mrf.mxu0 }
0x3d17   :  { %v4006_v25 = vmul.f32 1.442695, %v4005_v23 }
0x3d18   :  { %v5213_v0 = vpop.f32.mrf.mxu0 }
0x3d19   :  { %5607 = vpow2.f32 %v4006_v25 }
0x3d26   :  { %v5608_v5 = vpop.eup %5607 }
0x3d27   :  { %v4008_v19 = vadd.f32 1.0, %v5608_v5  ;;  %v4011_v9 = vmul.f32 -0.5, %v5608_v5  ;;  %v4014_v22 = vand.u32 2147483647, %v5608_v5 }
0x3d29   :  { %5609 = vlog2.f32 %v4008_v19  ;;  %v4012_v24 = vadd.f32 1.0, %v4011_v9  ;;  %vm4015_vm1 = vcmp.lt.f32.partialorder %v4014_v22, 0.0004427343  ;;  %v2347_v22 = vmul.f32 2.0, %v6600_v33 }
0x3d2b   :  { %v4013_v50 = vmul.f32 %v5608_v5, %v4012_v24 }
0x3d36   :  { %v5610_v61 = vpop.eup %5609 }
0x3d37   :  { %v4010_v21 = vmul.f32 0.6931472, %v5610_v61  ;;  %v2348_v61 = vmul.f32 %v2347_v22, %v6600_v33 }
0x3d39   :  { %v4016_v52 = vsel %vm4015_vm1, %v4013_v50, %v4010_v21  ;;  %vm4406_vm1 = vcmask 392192  }
0x3d3a   :  { %v4017_v54 = vsel %vm4004_vm2, %v3999_v29, %v4016_v52  ;;  %v5655_v29 = vld [vmem:[%s7298_s5 + $0x10] sm:$0xff]   ;;  %v4149_v52 = vpop.permute.xlu0 %4148  ;;  %vm4408_vm2 = vcmask 457728  }
0x3d3b   :  { %v4018_v3 = vpack.c.bf16 %v4017_v54, %v4017_v54 }
0x3d3d   :  { %5227 = vmatmul.mubr.msk.bf16.vlgmr.msra.gmra.mxu1 %vm2194_vm11, %v4018_v3 }
0x3d3e   :  { %5247 = vmatpush3.bf16.msra.mxu1 %v6416_v36  ;;  %5248 = vmatprep.mubr.msk.bf16.mxu1 %vm5668_vm7, %v5667_v37 }
0x3d3f   :  { %5268 = vmatprep.subr.bf16.mxu1 %v5667_v37 }
0x3dfd   :  { %v4056_v26 = vpop.f32.mrf.mxu1 }
0x3dfe   :  { %v4057_v60 = vadd.f32 %v6948_v11, %v4056_v26 }
0x3dff   :  { %v5228_v57 = vpop.f32.mrf.mxu1 }
0x3e00   :  { %v4063_v62 = vmin.f32 %v4057_v60, 20.0  ;;  %vm4062_vm6 = vcmp.gt.f32.partialorder %v4057_v60, 20.0 }
0x3e01   :  { %v4059_v4 = vpop.f32.mrf.mxu1 }
0x3e02   :  { %v4064_v15 = vmul.f32 1.442695, %v4063_v62  ;;  %v5657_v4 = vld [vmem:[%s7298_s5 + $0x60] sm:$0xff]  }
0x3e03   :  { %v5229_v7 = vpop.f32.mrf.mxu1 }
0x3e04   :  { %5611 = vpow2.f32 %v4064_v15  ;;  %v5658_v15 = vld [vmem:[%s7298_s5 + $0x58] sm:$0xff]   ;;  %v5659_v7 = vld [vmem:[%s7298_s5 + $0x50] sm:$0xff]  }
0x3e11   :  { %v5612_v12 = vpop.eup %5611 }
0x3e12   :  { %v4066_v18 = vadd.f32 1.0, %v5612_v12  ;;  %v4069_v58 = vmul.f32 -0.5, %v5612_v12  ;;  %v4072_v36 = vand.u32 2147483647, %v5612_v12 }
0x3e14   :  { %5613 = vlog2.f32 %v4066_v18  ;;  %v4070_v49 = vadd.f32 1.0, %v4069_v58  ;;  %vm4073_vm3 = vcmp.lt.f32.partialorder %v4072_v36, 0.0004427343  ;;  %v5661_v18 = vld [vmem:[%s7298_s5 + $0x40] sm:$0xff]   ;;  %v5662_v58 = vld [vmem:[%s7298_s5 + $0x38] sm:$0xff]  }
0x3e16   :  { %v4071_v17 = vmul.f32 %v5612_v12, %v4070_v49  ;;  %v5660_v12 = vld [vmem:[%s7298_s5 + $0x48] sm:$0xff]  }
0x3e21   :  { %v5614_v31 = vpop.eup %5613 }
0x3e22   :  { %v4068_v1 = vmul.f32 0.6931472, %v5614_v31 }
0x3e24   :  { %v4074_v27 = vsel %vm4073_vm3, %v4071_v17, %v4068_v1  ;;  %vm4411_vm3 = vcmask 588800  }
0x3e25   :  { %v4075_v43 = vsel %vm4062_vm6, %v4057_v60, %v4074_v27  ;;  %vm4415_vm6 = vcmask 719872  }
0x3e26   :  { %v4076_v11 = vsel %vm314_vm4, %v4075_v43, %v4017_v54 }
0x3e27   :  { %v4077_v51 = vpack.c.bf16 %v4076_v11, %v4076_v11 }
0x3e29   :  { %5243 = vmatmul.mubr.msk.bf16.vlgmr.msra.gmra.mxu0 %vm2194_vm11, %v4077_v51 }
0x3e2a   :  { %5253 = vmatpush3.bf16.msra.mxu0 %v5651_v39  ;;  %5264 = vmatprep.mubr.msk.bf16.mxu0 %vm5668_vm7, %v5667_v37 }
0x3e2b   :  { %5254 = vmatprep.subr.bf16.mxu0 %v5667_v37 }
0x3e2e   :  { %5255 = vmatpush3.bf16.msra.mxu0 %v5652_v46 }
0x3e2f   :  { %5256 = vmatprep.subr.bf16.mxu0 %v5667_v37 }
0x3e32   :  { %5257 = vmatpush3.bf16.msra.mxu0 %v5653_v53 }
0x3e33   :  { %5258 = vmatprep.subr.bf16.mxu0 %v5667_v37 }
0x3e36   :  { %5259 = vmatpush3.bf16.msra.mxu0 %v5654_v56 }
0x3e37   :  { %5260 = vmatprep.subr.bf16.mxu0 %v5667_v37 }
0x3e3a   :  { %5261 = vmatpush3.bf16.msra.mxu0 %v5655_v29 }
0x3e3b   :  { %5262 = vmatprep.subr.bf16.mxu0 %v5667_v37 }
0x3e3e   :  { %5263 = vmatpush3.bf16.msra.mxu0 %v5656_v42 }
0x3ee9   :  { %v4115_v23 = vpop.f32.mrf.mxu0 }
0x3eea   :  { %v7184_v16 = vadd.f32 %v6970_v13, %v4115_v23 }
0x3eeb   :  { %v5244_v25 = vpop.f32.mrf.mxu0 }
0x3eec   :  { %v4586_v0 = vmul.f32 -1.442695, %v7184_v16  ;;  %v4144_v33 = vmul.f32 0.1, %v7184_v16 }
0x3eed   :  { %v4118_v5 = vpop.f32.mrf.mxu0 }
0x3eee   :  { %5615 = vpow2.f32 %v4586_v0  ;;  %v4145_v26 = vadd.f32 %v4144_v33, %v7130_v55  ;;  %v5663_v0 = vld [vmem:[%s7299_s6 + $0x5] ss:$0 sm:$0xff]  ;;  %s5673_s6 = smov 32  }
0x3eef   :  { %v5245_v19 = vpop.f32.mrf.mxu0 }
0x3efb   :  { %v5616_v9 = vpop.eup %5615 }
0x3efc   :  { %v4124_v24 = vadd.f32 1.0, %v5616_v9 }
0x3efe   :  { %5617 = vrcp.f32 %v4124_v24 }
0x3eff   :  { %5619 = vrcp.f32 %v2348_v61 }
0x3f0b   :  { %v5618_v21 = vpop.eup %5617 }
0x3f0c   :  { %v7189_v50 = vmul.f32 0.31622776, %v5618_v21  ;;  %v5620_v3 = vpop.eup %5619 }
0x3f0e   :  { %v4151_v54 = vmul.f32 %v4149_v52, %v7189_v50 }
0x3f10   :  { %4153 = vrot.lane.b32.xlu1 %v4151_v54, %s5672_s25 }
0x3f14   :  { %2341 = vrot.lane.b32.xlu1 %v6597_v40, %s5670_s10 }
0x3f18   :  { %2738 = vrot.lane.b32.xlu1 %v6743_v2, %s5670_s10 }
0x3f1c   :  { %2351 = vrot.lane.b32.xlu1 %v5620_v3, %s5672_s25 }
0x3f20   :  { %3135 = vrot.lane.b32.xlu1 %v6883_v28, %s5670_s10 }
0x3f24   :  { %3335 = vrot.lane.b32.xlu1 %v6973_v45, %s5670_s10 }
0x3f28   :  { %3532 = vrot.lane.b32.xlu1 %v7023_v63, %s5670_s10 }
0x3f2c   :  { %3732 = vrot.lane.b32.xlu1 %v7073_v30, %s5670_s10 }
0x3f30   :  { %3929 = vrot.lane.b32.xlu1 %v7123_v8, %s5670_s10 }
0x3f34   :  { %4129 = vrot.lane.b32.xlu1 %v7184_v16, %s5670_s10 }
0x3f82   :  { %v4154_v60 = vpop.permute.xlu1 %4153 }
0x3f83   :  { %v7212_v57 = vadd.f32 %v4154_v60, %v4145_v26 }
0x3f85   :  { %v4157_v62 = vpack.c.bf16 %v7212_v57, %v7212_v57 }
0x3f87   :  { %5249 = vmatmul.mubr.msk.bf16.vlgmr.msra.gmra.mxu1 %vm2009_vm8, %v4157_v62 }
0x3f88   :  { %5269 = vmatpush3.bf16.msra.mxu1 %v5657_v4  ;;  %5280 = vmatprep.mubr.msk.bf16.mxu1 %vm5668_vm7, %v5667_v37 }
0x3f89   :  { %5270 = vmatprep.subr.bf16.mxu1 %v5667_v37 }
0x3f8c   :  { %5271 = vmatpush3.bf16.msra.mxu1 %v5658_v15 }
0x3f8d   :  { %5272 = vmatprep.subr.bf16.mxu1 %v5667_v37 }
0x3f90   :  { %5273 = vmatpush3.bf16.msra.mxu1 %v5659_v7 }
0x3f91   :  { %5274 = vmatprep.subr.bf16.mxu1 %v5667_v37 }
0x3f94   :  { %5275 = vmatpush3.bf16.msra.mxu1 %v5660_v12 }
0x3f95   :  { %5276 = vmatprep.subr.bf16.mxu1 %v5667_v37 }
0x3f98   :  { %5277 = vmatpush3.bf16.msra.mxu1 %v5661_v18  ;;  %v4135_v18 = vmul.f32 2.0, %v7189_v50 }
0x3f99   :  { %5278 = vmatprep.subr.bf16.mxu1 %v5667_v37 }
0x3f9c   :  { %5279 = vmatpush3.bf16.msra.mxu1 %v5662_v58  ;;  %v4136_v58 = vmul.f32 %v4135_v18, %v7189_v50 }
0x4047   :  { %v4195_v49 = vpop.f32.mrf.mxu1 }
0x4048   :  { %v4196_v36 = vadd.f32 %v6565_v38, %v4195_v49 }
0x4049   :  { %v5250_v31 = vpop.f32.mrf.mxu1 }
0x404a   :  { %v4202_v1 = vmin.f32 %v4196_v36, 20.0  ;;  %vm4201_vm9 = vcmp.gt.f32.partialorder %v4196_v36, 20.0 }
0x404b   :  { %v4198_v17 = vpop.f32.mrf.mxu1 }
0x404c   :  { %v4203_v27 = vmul.f32 1.442695, %v4202_v1 }
0x404d   :  { %v5251_v43 = vpop.f32.mrf.mxu1 }
0x404e   :  { %5621 = vpow2.f32 %v4203_v27 }
0x405b   :  { %v5622_v11 = vpop.eup %5621 }
0x405c   :  { %v4205_v51 = vadd.f32 1.0, %v5622_v11  ;;  %v4208_v39 = vmul.f32 -0.5, %v5622_v11  ;;  %v4211_v37 = vand.u32 2147483647, %v5622_v11 }
0x405e   :  { %5623 = vlog2.f32 %v4205_v51  ;;  %v4209_v46 = vadd.f32 1.0, %v4208_v39  ;;  %vm4212_vm7 = vcmp.lt.f32.partialorder %v4211_v37, 0.0004427343 }
0x4060   :  { %v4210_v29 = vmul.f32 %v5622_v11, %v4209_v46  ;;  %v4346_v46 = vpop.permute.xlu0 %4345 }
0x406b   :  { %v5624_v53 = vpop.eup %5623 }
0x406c   :  { %v4207_v56 = vmul.f32 0.6931472, %v5624_v53 }
0x406e   :  { %v4213_v42 = vsel %vm4212_vm7, %v4210_v29, %v4207_v56  ;;  %vm4427_vm7 = vcmask 850944  }
0x406f   :  { %v4214_v23 = vsel %vm4201_vm9, %v4196_v36, %v4213_v42  ;;  %v2542_v42 = vpop.permute.xlu0 %2541 }
0x4070   :  { %v4215_v38 = vpack.c.bf16 %v4214_v23, %v4214_v23 }
0x4072   :  { %5265 = vmatmul.mubr.msk.bf16.vlgmr.msra.gmra.mxu0 %vm2194_vm11, %v4215_v38 }
0x4132   :  { %v4253_v25 = vpop.f32.mrf.mxu0 }
0x4133   :  { %v4254_v5 = vadd.f32 %v5663_v0, %v4253_v25 }
0x4134   :  { %v5266_v19 = vpop.f32.mrf.mxu0 }
0x4135   :  { %v4260_v9 = vmin.f32 %v4254_v5, 20.0  ;;  %vm4259_vm12 = vcmp.gt.f32.partialorder %v4254_v5, 20.0 }
0x4136   :  { %v4256_v24 = vpop.f32.mrf.mxu0 }
0x4137   :  { %v4261_v22 = vmul.f32 1.442695, %v4260_v9 }
0x4138   :  { %v5267_v61 = vpop.f32.mrf.mxu0 }
0x4139   :  { %5625 = vpow2.f32 %v4261_v22 }
0x4146   :  { %v5626_v21 = vpop.eup %5625 }
0x4147   :  { %v4263_v52 = vadd.f32 1.0, %v5626_v21  ;;  %v4266_v54 = vmul.f32 -0.5, %v5626_v21  ;;  %v4269_v33 = vand.u32 2147483647, %v5626_v21 }
0x4149   :  { %5627 = vlog2.f32 %v4263_v52  ;;  %v4267_v3 = vadd.f32 1.0, %v4266_v54  ;;  %vm4270_vm10 = vcmp.lt.f32.partialorder %v4269_v33, 0.0004427343 }
0x414a   :  { %5629 = vrcp.f32 %v4136_v58 }
0x414b   :  { %v4268_v62 = vmul.f32 %v5626_v21, %v4267_v3 }
0x4156   :  { %v5628_v26 = vpop.eup %5627 }
0x4157   :  { %v4265_v60 = vmul.f32 0.6931472, %v5628_v26  ;;  %v5630_v27 = vpop.eup %5629 }
0x4159   :  { %v4271_v4 = vsel %vm4270_vm10, %v4268_v62, %v4265_v60 }
0x415a   :  { %v4272_v15 = vsel %vm4259_vm12, %v4254_v5, %v4271_v4 }
0x415b   :  { %v4273_v7 = vsel %vm314_vm4, %v4272_v15, %v4214_v23  ;;  %v2939_v23 = vpop.permute.xlu0 %2938 }
0x415c   :  { %v4274_v12 = vpack.c.bf16 %v4273_v7, %v4273_v7  ;;  %v2941_v3 = vsub.f32 %v6799_v59, %v2939_v23 }
0x415e   :  { %5281 = vmatmul.mubr.msk.bf16.vlgmr.msra.gmra.mxu1 %vm2194_vm11, %v4274_v12  ;;  %v2942_v15 = vmul.f32 0.1, %v2941_v3 }
0x415f   :  { %v2552_v25 = vpop.permute.xlu0 %2551 }
0x4163   :  { %v2749_v5 = vpop.permute.xlu0 %2748 }
0x4167   :  { %v2949_v22 = vpop.permute.xlu0 %2948 }
0x416b   :  { %v3146_v60 = vpop.permute.xlu0 %3145 }
0x421e   :  { %v4312_v49 = vpop.f32.mrf.mxu1 }
0x421f   :  { %v7252_v36 = vadd.f32 %v6970_v13, %v4312_v49  ;;  %v3346_v49 = vpop.permute.xlu0 %3345 }
0x4220   :  { %v5282_v31 = vpop.f32.mrf.mxu1 }
0x4221   :  { %v4590_v1 = vmul.f32 -1.442695, %v7252_v36  ;;  %4326 = vrot.lane.b32.xlu1 %v7252_v36, %s5670_s10  ;;  %s5674_s10 = smov 48   ;;  %v4341_v4 = vmul.f32 0.1, %v7252_v36 }
0x4222   :  { %v4315_v17 = vpop.f32.mrf.mxu1 }
0x4223   :  { %5631 = vpow2.f32 %v4590_v1  ;;  %v2943_v17 = vmul.f32 %v2942_v15, %v2942_v15 }
0x4224   :  { %v5283_v43 = vpop.f32.mrf.mxu1 }
0x4225   :  { %4139 = vrot.lane.b32.xlu1 %v5630_v27, %s5672_s25 }
0x4230   :  { %v5632_v11 = vpop.eup %5631 }
0x4231   :  { %v4321_v51 = vadd.f32 1.0, %v5632_v11 }
0x4233   :  { %5633 = vrcp.f32 %v4321_v51 }
0x4240   :  { %v5634_v50 = vpop.eup %5633 }
0x4241   :  { %v4324_v39 = vmul.f32 0.31622776, %v5634_v50  ;;  %v2951_v50 = vmul.f32 %v2949_v22, %v2943_v17 }
0x4243   :  { %v4332_v13 = vmul.f32 2.0, %v4324_v39  ;;  %v4348_v37 = vmul.f32 %v4346_v46, %v4324_v39 }
0x4245   :  { %v4333_v53 = vmul.f32 %v4332_v13, %v4324_v39  ;;  %4350 = vrot.lane.b32.xlu1 %v4348_v37, %s5672_s25  ;;  %v3543_v39 = vpop.permute.xlu0 %3542 }
0x4247   :  { %5635 = vrcp.f32 %v4333_v53 }
0x4249   :  { %4359 = vrot.lane.b32.xlu1 %v6700_v34, %s5671_s19  ;;  %s5677_s19 = smov 40   ;;  %v2342_v34 = vpop.permute.xlu1 %2341 }
0x424a   :  { %v2344_v0 = vsub.f32 %v6597_v40, %v2342_v34  ;;  %v3743_v34 = vpop.permute.xlu0 %3742 }
0x424c   :  { %v2345_v19 = vmul.f32 0.1, %v2344_v0 }
0x424d   :  { %4367 = vrot.lane.b32.xlu1 %v6810_v35, %s5673_s6  ;;  %v2739_v35 = vpop.permute.xlu1 %2738 }
0x424e   :  { %v2346_v61 = vmul.f32 %v2345_v19, %v2345_v19  ;;  %v3940_v23 = vpop.permute.xlu0 %3939 }
0x4251   :  { %4375 = vrot.lane.b32.xlu1 %v6980_v10, %s5674_s10  ;;  %v2352_v10 = vpop.permute.xlu1 %2351 }
0x4252   :  { %v2354_v26 = vmul.f32 %v2352_v10, %v2346_v61 }
0x4254   :  { %v5636_v56 = vpop.eup %5635 }
0x4255   :  { %4336 = vrot.lane.b32.xlu0 %v5636_v56, %s5672_s25  ;;  %4383 = vrot.lane.b32.xlu1 %v7080_v14, %s5666_s29  ;;  %v3136_v14 = vpop.permute.xlu1 %3135  ;;  %s5680_s29 = smov 88   ;;  %s5682_s25 = smov 96  }
0x4256   :  { %v3138_v21 = vsub.f32 %v6883_v28, %v3136_v14 }
0x4259   :  { %4355 = vrot.lane.b32.xlu0 %v6606_v41, %s5669_s20  ;;  %4391 = vrot.lane.b32.xlu1 %v7212_v57, %s5675_s1  ;;  %v3336_v41 = vpop.permute.xlu1 %3335  ;;  %s5681_s20 = smov 104  }
0x425a   :  { %v3338_v40 = vsub.f32 %v6973_v45, %v3336_v41  ;;  %v4342_v45 = vadd.f32 %v4341_v4, %v7212_v57 }
0x425c   :  { %v3339_v28 = vmul.f32 0.1, %v3338_v40 }
0x425d   :  { %4363 = vrot.lane.b32.xlu0 %v6752_v44, %s5676_s30  ;;  %v3533_v29 = vpop.permute.xlu1 %3532 }
0x425e   :  { %v3535_v62 = vsub.f32 %v7023_v63, %v3533_v29  ;;  %v3340_v63 = vmul.f32 %v3339_v28, %v3339_v28 }
0x4260   :  { %v3536_v31 = vmul.f32 0.1, %v3535_v62  ;;  %v3348_v56 = vmul.f32 %v3346_v49, %v3340_v63 }
0x4261   :  { %4371 = vrot.lane.b32.xlu0 %v6890_v48, %s5677_s19  ;;  %v3733_v38 = vpop.permute.xlu1 %3732  ;;  %v2544_v48 = vsub.f32 %v6689_v32, %v2542_v42 }
0x4262   :  { %v3735_v58 = vsub.f32 %v7073_v30, %v3733_v38  ;;  %v3537_v13 = vmul.f32 %v3536_v31, %v3536_v31 }
0x4263   :  { %v2545_v9 = vmul.f32 0.1, %v2544_v48 }
0x4264   :  { %v3736_v11 = vmul.f32 0.1, %v3735_v58 }
0x4265   :  { %4379 = vrot.lane.b32.xlu0 %v7030_v6, %s5678_s8  ;;  %v3930_v44 = vpop.permute.xlu1 %3929  ;;  %v2741_v6 = vsub.f32 %v6743_v2, %v2739_v35  ;;  %v2546_v54 = vmul.f32 %v2545_v9, %v2545_v9  ;;  %v3139_v2 = vmul.f32 0.1, %v3138_v21  ;;  %v3545_v35 = vmul.f32 %v3543_v39, %v3537_v13 }
0x4266   :  { %v3932_v1 = vsub.f32 %v7123_v8, %v3930_v44  ;;  %v3737_v8 = vmul.f32 %v3736_v11, %v3736_v11 }
0x4267   :  { %v2742_v24 = vmul.f32 0.1, %v2741_v6  ;;  %v2554_v32 = vmul.f32 %v2552_v25, %v2546_v54  ;;  %v3140_v59 = vmul.f32 %v3139_v2, %v3139_v2 }
0x4268   :  { %v3933_v37 = vmul.f32 0.1, %v3932_v1  ;;  %v3745_v42 = vmul.f32 %v3743_v34, %v3737_v8 }
0x4269   :  { %4387 = vrot.lane.b32.xlu0 %v7130_v55, %s5679_s9  ;;  %v4130_v55 = vpop.permute.xlu1 %4129  ;;  %v2743_v33 = vmul.f32 %v2742_v24, %v2742_v24  ;;  %v2555_v12 = vadd.f32 %v2554_v32, %v2354_v26  ;;  %v3148_v46 = vmul.f32 %v3146_v60, %v3140_v59 }
0x426a   :  { %v4132_v30 = vsub.f32 %v7184_v16, %v4130_v55  ;;  %v3934_v10 = vmul.f32 %v3933_v37, %v3933_v37 }
0x426b   :  { %v2751_v7 = vmul.f32 %v2749_v5, %v2743_v33 }
0x426c   :  { %v4133_v14 = vmul.f32 0.1, %v4132_v30  ;;  %v3942_v16 = vmul.f32 %v3940_v23, %v3934_v10 }
0x426d   :  { %v2752_v27 = vadd.f32 %v2751_v7, %v2555_v12 }
0x426e   :  { %v4134_v25 = vmul.f32 %v4133_v14, %v4133_v14 }
0x426f   :  { %v2952_v53 = vadd.f32 %v2951_v50, %v2752_v27 }
0x4271   :  { %v3149_v57 = vadd.f32 %v3148_v46, %v2952_v53 }
0x4273   :  { %v3349_v29 = vadd.f32 %v3348_v56, %v3149_v57 }
0x4275   :  { %v3546_v38 = vadd.f32 %v3545_v35, %v3349_v29 }
0x4277   :  { %v3746_v0 = vadd.f32 %v3745_v42, %v3546_v38 }
0x4279   :  { %v3943_v5 = vadd.f32 %v3942_v16, %v3746_v0 }
0x4293   :  { %v4327_v52 = vpop.permute.xlu1 %4326 }
0x4294   :  { %v4329_v41 = vsub.f32 %v7252_v36, %v4327_v52 }
0x4296   :  { %v4330_v44 = vmul.f32 0.1, %v4329_v41 }
0x4297   :  { %v4140_v18 = vpop.permute.xlu1 %4139 }
0x4298   :  { %v4142_v48 = vmul.f32 %v4140_v18, %v4134_v25  ;;  %v4331_v6 = vmul.f32 %v4330_v44, %v4330_v44 }
0x429a   :  { %v4143_v55 = vadd.f32 %v4142_v48, %v3943_v5 }
0x42b7   :  { %v4351_v43 = vpop.permute.xlu1 %4350 }
0x42b8   :  { %v4353_v51 = vadd.f32 %v4351_v43, %v4342_v45 }
0x42ba   :  { %4395 = vrot.lane.b32.xlu0 %v4353_v51, %s5680_s29 }
0x42bb   :  { %v4360_v22 = vpop.permute.xlu1 %4359 }
0x42be   :  { %4424 = vrot.lane.b32.xlu0 %v6410_v20, %s5681_s20 }
0x42bf   :  { %v4368_v61 = vpop.permute.xlu1 %4367 }
0x42c3   :  { %v4376_v3 = vpop.permute.xlu1 %4375 }
0x42c7   :  { %v4337_v19 = vpop.permute.xlu0 %4336  ;;  %v4384_v60 = vpop.permute.xlu1 %4383 }
0x42c8   :  { %v4339_v9 = vmul.f32 %v4337_v19, %v4331_v6 }
0x42ca   :  { %v4340_v24 = vadd.f32 %v4339_v9, %v4143_v55 }
0x42cb   :  { %v4356_v36 = vpop.permute.xlu0 %4355  ;;  %v4392_v15 = vpop.permute.xlu1 %4391 }
0x42cc   :  { %4418 = vrot.lane.b32.xlu1 %v4340_v24, %s5682_s25  ;;  %v4398_v21 = vsel %vm2009_vm8, %v6438_v47, %v4356_v36  ;;  %vm4413_vm8 = vcmask 654336  }
0x42cd   :  { %v4400_v54 = vsel %vm4399_vm13, %v4398_v21, %v4360_v22 }
0x42cf   :  { %v4364_v20 = vpop.permute.xlu0 %4363 }
0x42d0   :  { %v4402_v33 = vsel %vm4401_vm14, %v4400_v54, %v4364_v20 }
0x42d1   :  { %v4403_v40 = vsel %vm1178_vm5, %v4402_v33, %v4368_v61  ;;  %vm4429_vm5 = vcmask 982016  }
0x42d3   :  { %v4372_v52 = vpop.permute.xlu0 %4371 }
0x42d4   :  { %v4405_v32 = vsel %vm4404_vm15, %v4403_v40, %v4372_v52 }
0x42d5   :  { %v4407_v2 = vsel %vm4406_vm1, %v4405_v32, %v4376_v3 }
0x42d7   :  { %v4380_v26 = vpop.permute.xlu0 %4379 }
0x42d8   :  { %v4409_v62 = vsel %vm4408_vm2, %v4407_v2, %v4380_v26 }
0x42d9   :  { %v4410_v47 = vsel %vm314_vm4, %v4409_v62, %v4384_v60 }
0x42db   :  { %v4388_v4 = vpop.permute.xlu0 %4387 }
0x42dc   :  { %v4412_v7 = vsel %vm4411_vm3, %v4410_v47, %v4388_v4 }
0x42dd   :  { %v4414_v18 = vsel %vm4413_vm8, %v4412_v7, %v4392_v15 }
0x432c   :  { %v4396_v12 = vpop.permute.xlu0 %4395 }
0x432d   :  { %v4416_v28 = vsel %vm4415_vm6, %v4414_v18, %v4396_v12 }
0x4330   :  { %v4425_v59 = vpop.permute.xlu0 %4424 }
0x433e   :  { %v4419_v58 = vpop.permute.xlu1 %4418 }
0x433f   :  { %v4421_v49 = vsel %vm2194_vm11, %v4416_v28, %v4419_v58 }
0x4340   :  { %v4422_v31 = vsel %vm180_vm0, %v4421_v49, 0.0 }
0x4341   :  { %v4428_v1 = vsel %vm4427_vm7, %v4422_v31, %v4425_v59 }
0x4342   :  { %v4430_v45 = vsel %vm4429_vm5, %v4428_v1, 0.0 }
0x4343   :  { %4431 = vst [vmem:[%s7303_s7] sm:$0xff] %v4430_v45 }

</bundles_post_ra>
